<compile_context>
chip_gen: v7x
topology: tpu7x:2x2x1
jax: 0.10.0
libtpu: 0.0.40
codegen_flags: <defaults>
</compile_context>

<pallas_src>
import functools

import jax
import jax.numpy as jnp
import numpy as np
from jax.experimental import pallas as pl
from jax.experimental.pallas import tpu as pltpu

PAD_TOKEN_ID = 0


def _round_up(x, m):
    return ((x + m - 1) // m) * m


def _vmem_capacity_bytes():
    try:
        return int(pltpu.get_tpu_info().vmem_capacity_bytes)
    except Exception:
        return 64 * 1024 * 1024            # conservative default (v7x per-core)


def _min_vocab_tile():
    # v6e/v7x MXUs are 2x256^2 -> keep the vocab (N) tile a multiple of 256;
    # v5e's 4x128^2 MXU is fine with 128-wide tiles.
    try:
        kind = jax.devices()[0].device_kind.lower()
    except Exception:
        kind = ""
    if "v5 lite" in kind or "v5lite" in kind or "v5e" in kind:
        return 128
    return 256


def _estimate_vmem(rows, hidden_dim, tv, cand_len, bb, gold_bytes, weight_bufs):
    """Per-step VMEM working set (bytes) for a (rows, tv) vocab tile."""
    return (weight_bufs * hidden_dim * tv * 2        # bf16 weight tile buffers
            + rows * hidden_dim * 2                  # hidden block (single buffer)
            + rows * 128 * 4                         # (rows,1) int32 targets (lane-padded)
            + 2 * bb * cand_len * tv * gold_bytes    # gold-logit out tile, 2 buffers
            + 3 * rows * tv * 4                      # f32 matmul result + select + exp temps
            + 3 * rows * 128 * 4                     # (rows,1) f32 accumulators (lane-padded)
            + (1 << 20))                             # slack


def _pick_vocab_tile(vocab, hidden_dim, rows, cand_len, tv_min, budget,
                     gold_bytes, weight_bufs):
    """Largest power-of-two vocab tile (>= tv_min, <= round_up(V, tv_min)) whose
    per-step working set fits the generation-aware VMEM budget."""
    cap_tv = max(tv_min, _round_up(vocab, tv_min))
    for tv in (4096, 2048, 1024, 512, 256, 128):
        if tv < tv_min or tv > cap_tv:
            continue
        if _estimate_vmem(rows, hidden_dim, tv, cand_len, 1,
                          gold_bytes, weight_bufs) <= budget:
            return tv
    return tv_min


def _simmcs_kernel(tgt_ref, hid_ref, w_ref, gold_ref, score_ref,
                   m_sc, l_sc, g_sc,
                   *, batch_block, num_cand, cand_len, vocab, mask_tail,
                   pad_token_id, score_mode, normalize, length_penalty, adding):
    """Grid = (batch blocks, vocab tiles); the vocab axis is the reduction axis.

    tgt_ref   : (rows, 1)       int32    shifted target ids (rows = BB*C*Lp)
    hid_ref   : (rows, H)       bf16     decoder hidden states, M dim pre-flattened
    w_ref     : (H, TV)         bf16     LM-head weight, one vocab tile
    gold_ref  : (BB, Lp, TV)    f32/bf16 gold-candidate logits, one vocab tile
    score_ref : (1, BB*C)       f32      per-candidate length-penalised score
    m/l/g_sc  : (rows, 1)       f32      running max / sum-exp / gathered target logit
    """
    BB, C, Lp = batch_block, num_cand, cand_len
    TV = w_ref.shape[-1]
    rows = BB * C * Lp
    v = pl.program_id(1)
    nv = pl.num_programs(1)

    @pl.when(v == 0)
    def _init():
        m_sc[...] = jnp.full(m_sc.shape, -jnp.inf, m_sc.dtype)
        l_sc[...] = jnp.zeros(l_sc.shape, l_sc.dtype)
        g_sc[...] = jnp.zeros(g_sc.shape, g_sc.dtype)

    # LM head on the MXU: (rows, H) @ (H, TV), bf16 in / f32 accumulate.
    lt = jnp.dot(hid_ref[...], w_ref[...], preferred_element_type=jnp.float32)

    # Only the gold candidate's logits (first Lp rows of each batch element in
    # this block) are consumed downstream -> C x less HBM writeback.
    for b in range(BB):
        r0 = b * C * Lp
        gold_ref[b] = lt[r0:r0 + Lp, :].astype(gold_ref.dtype)

    tgt = tgt_ref[...]                                               # (rows, 1)
    lane = jax.lax.broadcasted_iota(jnp.int32, (1, TV), 1) + v * TV  # (1, TV)

    # Gather logit[r, tgt[r]] for this vocab tile: lane compare + lane-axis
    # keepdims reduction (no lane<->sublane relayout).
    hit = lane == tgt                                                # (rows, TV)
    g_sc[...] += jnp.sum(jnp.where(hit, lt, 0.0), axis=-1, keepdims=True)

    if normalize:
        # Online logsumexp over the vocab axis, f32 throughout.  Padded vocab
        # lanes (lane >= vocab) are masked to -inf so they never contribute.
        lt_m = jnp.where(lane < vocab, lt, -jnp.inf) if mask_tail else lt
        m_new = jnp.maximum(m_sc[...], jnp.max(lt_m, axis=-1, keepdims=True))
        l_sc[...] = (l_sc[...] * jnp.exp(m_sc[...] - m_new)
                     + jnp.sum(jnp.exp(lt_m - m_new), axis=-1, keepdims=True))
        m_sc[...] = m_new

    @pl.when(v == nv - 1)
    def _finalize():
        maskf = (tgt != pad_token_id).astype(jnp.float32)            # (rows, 1)
        g = g_sc[...]
        if normalize:
            lse = m_sc[...] + jnp.log(l_sc[...])
            tok = (g - lse) if score_mode == "log" else jnp.exp(g - lse)
        else:
            tok = g
        tok = tok * maskf
        # Per-candidate sums over each length-Lp row segment via an indicator
        # matrix + sublane reduction: keeps the accumulators (rows, 1) the
        # whole time (no in-kernel reshape / relayout), runs once per batch
        # block so its cost is amortised over all vocab tiles.
        r_iota = jax.lax.broadcasted_iota(jnp.int32, (rows, BB * C), 0)
        c_lo = jax.lax.broadcasted_iota(jnp.int32, (rows, BB * C), 1) * Lp
        seg = ((r_iota >= c_lo) & (r_iota < c_lo + Lp)).astype(jnp.float32)
        num = jnp.sum(tok * seg, axis=0, keepdims=True)              # (1, BB*C)
        cnt = jnp.sum(maskf * seg, axis=0, keepdims=True)            # (1, BB*C)
        den = cnt + adding            # all-pad candidate -> div by 0, matches ref
        if length_penalty != 1.0:
            den = den ** length_penalty
        score_ref[...] = num / den


def simmcs_forward(text_id, candidate_id, emb_table, lm_head,
                   normalize=True, score_mode="base",
                   length_penalty=1.0, require_gold=True, adding=0.0,
                   pad_token_id=PAD_TOKEN_ID, vocab_tile=None, batch_block=None,
                   probs_dtype=jnp.float32, weight_buffers=2):
    # TODO(synk): the pretrained BART/Pegasus encoder-decoder is not
    # reimplemented; decoder hidden states are synthesized by a deterministic
    # embedding lookup of the candidate tokens (text_id unused), as JAX glue.
    del text_id

    B, C, L = candidate_id.shape
    H = emb_table.shape[1]
    V = lm_head.shape[1]

    # Pad candidate length to a sublane multiple (8): padded positions are pad
    # tokens -> masked out of the score, and sliced off the gold logits below.
    Lp = _round_up(L, 8)
    cand_p = candidate_id
    if Lp != L:
        cand_p = jnp.pad(candidate_id, ((0, 0), (0, 0), (0, Lp - L)),
                         constant_values=pad_token_id)
    CL = C * Lp

    # Shifted targets: position t scores token cand[..., t+1]; the last real
    # position and all padded positions get pad_token_id -> masked out.
    tgt = jnp.concatenate(
        [cand_p[:, :, 1:],
         jnp.full((B, C, 1), pad_token_id, cand_p.dtype)], axis=2)
    tgt_flat = tgt.reshape(B * CL, 1).astype(jnp.int32)              # (B*CL, 1)

    # Glue: stand-in "decoder hidden states", matmul M dim pre-flattened.
    hidden = emb_table[cand_p].astype(jnp.bfloat16).reshape(B * CL, H)

    # --- generation-aware tiling ------------------------------------------
    cap = _vmem_capacity_bytes()
    budget = int(0.30 * cap)                 # ~19 MiB on v7x, ~38 MiB on v5e/v6e
    tv_min = _min_vocab_tile()
    gold_bytes = jnp.dtype(probs_dtype).itemsize

    if vocab_tile is not None:
        tv = int(vocab_tile)
        assert tv % 128 == 0, "vocab tile must be a lane multiple (128)"
    else:
        tv = _pick_vocab_tile(V, H, CL, Lp, tv_min, budget, gold_bytes,
                              weight_buffers)
    V_pad = _round_up(V, tv)                 # pad vocab up to a tile multiple
    nvt = V_pad // tv

    # Batch fusion: largest divisor of B whose working set fits the budget --
    # reuses each weight tile across batch elements (weight HBM traffic / bb),
    # which is the dominant cost when C*L is below the HBM ridge.
    if batch_block is not None:
        bb = int(batch_block)
        assert B % bb == 0
    else:
        bb = 1
        for cand_bb in range(B, 0, -1):
            if B % cand_bb:
                continue
            if _estimate_vmem(cand_bb * CL, H, tv, Lp, cand_bb, gold_bytes,
                              weight_buffers) <= budget:
                bb = cand_bb
                break
    rows_bb = bb * CL

    w_bf16 = lm_head.astype(jnp.bfloat16)
    if V_pad != V:
        w_bf16 = jnp.pad(w_bf16, ((0, 0), (0, V_pad - V)))           # zero cols

    est = _estimate_vmem(rows_bb, H, tv, Lp, bb, gold_bytes, weight_buffers)
    vmem_limit = int(min(int(0.85 * cap), max(32 << 20, int(1.5 * est))))

    kernel = functools.partial(
        _simmcs_kernel,
        batch_block=bb, num_cand=C, cand_len=Lp,
        vocab=V, mask_tail=(V_pad != V),
        pad_token_id=pad_token_id, score_mode=score_mode,
        normalize=normalize, length_penalty=float(length_penalty),
        adding=float(adding))

    # TODO(synk): v7x megacore split of the candidate axis for B == 1
    # inference (second "parallel" grid axis over candidate chunks) not
    # implemented; only the batch-block axis is marked parallel.
    def _call(single_buffer_invariant):
        inv_mode = ({"pipeline_mode": pl.Buffered(1)}
                    if single_buffer_invariant else {})
        w_mode = ({"pipeline_mode": pl.Buffered(weight_buffers)}
                  if weight_buffers != 2 else {})
        return pl.pallas_call(
            kernel,
            grid=(B // bb, nvt),
            in_specs=[
                # vocab-invariant inputs: re-fetched only on batch-block change
                pl.BlockSpec((rows_bb, 1), lambda b, v: (b, 0), **inv_mode),
                pl.BlockSpec((rows_bb, H), lambda b, v: (b, 0), **inv_mode),
                pl.BlockSpec((H, tv), lambda b, v: (0, v), **w_mode),
            ],
            out_specs=[
                pl.BlockSpec((bb, Lp, tv), lambda b, v: (b, 0, v)),
                pl.BlockSpec((1, bb * C), lambda b, v: (b, 0)),
            ],
            out_shape=[
                jax.ShapeDtypeStruct((B, Lp, V_pad), probs_dtype),
                jax.ShapeDtypeStruct((B // bb, bb * C), jnp.float32),
            ],
            scratch_shapes=[pltpu.VMEM((rows_bb, 1), jnp.float32)] * 3,
            compiler_params=pltpu.CompilerParams(
                dimension_semantics=("parallel", "arbitrary"),
                vmem_limit_bytes=vmem_limit),
        )(tgt_flat, hidden, w_bf16)

    try:
        gold_pad, scores_raw = _call(True)
    except Exception:
        # Fallback if single-buffer pipeline_mode is unsupported on this jax.
        gold_pad, scores_raw = _call(False)

    scores = scores_raw.reshape(B, C)
    probs = gold_pad[:, :L, :V]              # drop length / vocab padding

    if require_gold:
        out = {"score": scores[:, 1:], "summary_score": scores[:, 0],
               "probs": probs}
    else:
        out = {"score": scores, "probs": probs}
    out["all_score"] = scores
    return out


def _reference_forward(candidate_id, emb_table, lm_head,
                       normalize=True, score_mode="base",
                       length_penalty=1.0, adding=0.0,
                       pad_token_id=PAD_TOKEN_ID):
    """Pure-JAX reference mirroring the PyTorch scoring math (bf16 matmul)."""
    hidden = emb_table[candidate_id].astype(jnp.bfloat16)            # (B,C,L,H)
    logits = jnp.einsum("bclh,hv->bclv", hidden, lm_head.astype(jnp.bfloat16),
                        preferred_element_type=jnp.float32)          # (B,C,L,V)
    probs_gold = logits[:, 0]
    out = logits[:, :, :-1]
    ids = candidate_id[:, :, 1:]
    if normalize:
        _out = (jax.nn.log_softmax(out, axis=3) if score_mode == "log"
                else jax.nn.softmax(out, axis=3))
    else:
        _out = out
    scores = jnp.take_along_axis(_out, ids[..., None], axis=3)[..., 0]
    mask = (ids != pad_token_id).astype(jnp.float32)
    scores = jnp.sum(scores * mask, axis=-1) / (
        jnp.sum(mask, axis=-1) + adding) ** length_penalty
    return scores, probs_gold


if __name__ == "__main__":
    # batch, candidates, cand_len, hidden, vocab.  L=12 (not a multiple of 8)
    # and V=500 (not a multiple of 128) deliberately exercise the new length /
    # vocab padding + padded-lane masking paths.
    B, C, L, H, V = 2, 4, 12, 128, 500
    SRC = 24                                  # (unused) source length

    key = jax.random.PRNGKey(0)
    k1, k2, k3, k4 = jax.random.split(key, 4)

    emb_table = jax.random.normal(k1, (V, H), dtype=jnp.float32) * 0.5
    lm_head = jax.random.normal(k2, (H, V), dtype=jnp.float32) * 0.1

    text_id = jax.random.randint(k3, (B, SRC), 1, V, dtype=jnp.int32)
    candidate_id = jax.random.randint(k4, (B, C, L), 1, V, dtype=jnp.int32)
    candidate_id = candidate_id.at[:, :, 0].set(2)                  # BOS
    candidate_id = candidate_id.at[0, 1, 9:].set(PAD_TOKEN_ID)      # padding
    candidate_id = candidate_id.at[1, 2, 5:].set(PAD_TOKEN_ID)
    candidate_id = candidate_id.at[1, 3, 8:].set(PAD_TOKEN_ID)

    # Run 1: softmax scores, auto batch-block (fuses the whole batch here),
    # vocab_tile=256 -> V padded to 512, 2 vocab tiles -> exercises the online
    # logsumexp reduction and padded-lane masking.
    out = simmcs_forward(text_id, candidate_id, emb_table, lm_head,
                         normalize=True, score_mode="base",
                         length_penalty=1.0, require_gold=True, adding=0.0,
                         vocab_tile=256)
    jax.block_until_ready(out["all_score"])

    ref_scores, ref_probs = _reference_forward(
        candidate_id, emb_table, lm_head,
        normalize=True, score_mode="base", length_penalty=1.0, adding=0.0)

    np.testing.assert_allclose(np.asarray(out["all_score"]),
                               np.asarray(ref_scores), rtol=1e-3, atol=1e-4)
    np.testing.assert_allclose(np.asarray(out["probs"]),
                               np.asarray(ref_probs), rtol=1e-3, atol=1e-3)
    assert out["score"].shape == (B, C - 1)
    assert out["summary_score"].shape == (B,)
    assert out["probs"].shape == (B, L, V)

    # Run 2: log-softmax scores with batch_block=1 (un-fused path).
    out_log = simmcs_forward(text_id, candidate_id, emb_table, lm_head,
                             normalize=True, score_mode="log",
                             length_penalty=1.0, require_gold=True, adding=0.0,
                             vocab_tile=256, batch_block=1)
    jax.block_until_ready(out_log["all_score"])
    ref_scores_log, _ = _reference_forward(
        candidate_id, emb_table, lm_head,
        normalize=True, score_mode="log", length_penalty=1.0, adding=0.0)
    np.testing.assert_allclose(np.asarray(out_log["all_score"]),
                               np.asarray(ref_scores_log), rtol=1e-3, atol=1e-3)

    print("KERNEL_OK")
</pallas_src>

<mosaic_0001>
module attributes {stable_mosaic.version = 11 : i64} {
  func.func @_simmcs_kernel(%arg0: i32, %arg1: i32, %arg2: memref<128x1xi32, #tpu.memory_space<vmem>>, %arg3: memref<128x128xbf16, #tpu.memory_space<vmem>>, %arg4: memref<128x256xbf16, #tpu.memory_space<vmem>>, %arg5: memref<2x16x256xf32, #tpu.memory_space<vmem>>, %arg6: memref<1x8xf32, #tpu.memory_space<vmem>>, %arg7: memref<128x1xf32, #tpu.memory_space<vmem>>, %arg8: memref<128x1xf32, #tpu.memory_space<vmem>>, %arg9: memref<128x1xf32, #tpu.memory_space<vmem>>) attributes {dimension_semantics = [#tpu.dimension_semantics<parallel>, #tpu.dimension_semantics<arbitrary>], iteration_bounds = array<i64: 1, 2>, scalar_prefetch = 0 : i64, scratch_operands = 3 : i64, tpu.core_type = #tpu.core_type<tc>, window_params = [{pipeline_mode = #tpu.pipeline_mode<synchronous>, transform_indices = @transform_0, window_bounds = array<i64: 128, 1>}, {pipeline_mode = #tpu.pipeline_mode<synchronous>, transform_indices = @transform_1, window_bounds = array<i64: 128, 128>}, {transform_indices = @transform_2, window_bounds = array<i64: 128, 256>}, {transform_indices = @transform_3, window_bounds = array<i64: 2, 16, 256>}, {transform_indices = @transform_4, window_bounds = array<i64: 1, 8>}]} {
    %c0_i32 = arith.constant 0 : i32
    %0 = arith.cmpi eq, %arg1, %c0_i32 : i32
    %1 = arith.extui %0 : i1 to i32
    %c0_i32_0 = arith.constant 0 : i32
    %2 = arith.cmpi ne, %1, %c0_i32_0 : i32
    scf.if %2 {
      %cst_31 = arith.constant 0xFF800000 : f32
      %55 = vector.broadcast %cst_31 : f32 to vector<128x1xf32>
      %c0_32 = arith.constant 0 : index
      %c0_33 = arith.constant 0 : index
      %56 = vector.load %arg7[%c0_32, %c0_33] : memref<128x1xf32, #tpu.memory_space<vmem>>, vector<128x1xf32>
      tpu.vector_store %arg7[%c0_32, %c0_33], %55 {strides = array<i32>} : memref<128x1xf32, #tpu.memory_space<vmem>>, vector<128x1xf32>,
      %cst_34 = arith.constant 0.000000e+00 : f32
      %57 = vector.broadcast %cst_34 : f32 to vector<128x1xf32>
      %c0_35 = arith.constant 0 : index
      %c0_36 = arith.constant 0 : index
      %58 = vector.load %arg8[%c0_35, %c0_36] : memref<128x1xf32, #tpu.memory_space<vmem>>, vector<128x1xf32>
      tpu.vector_store %arg8[%c0_35, %c0_36], %57 {strides = array<i32>} : memref<128x1xf32, #tpu.memory_space<vmem>>, vector<128x1xf32>,
      %cst_37 = arith.constant 0.000000e+00 : f32
      %59 = vector.broadcast %cst_37 : f32 to vector<128x1xf32>
      %c0_38 = arith.constant 0 : index
      %c0_39 = arith.constant 0 : index
      %60 = vector.load %arg9[%c0_38, %c0_39] : memref<128x1xf32, #tpu.memory_space<vmem>>, vector<128x1xf32>
      tpu.vector_store %arg9[%c0_38, %c0_39], %59 {strides = array<i32>} : memref<128x1xf32, #tpu.memory_space<vmem>>, vector<128x1xf32>,
    } else {
    }
    %c0 = arith.constant 0 : index
    %c0_1 = arith.constant 0 : index
    %3 = vector.load %arg3[%c0, %c0_1] : memref<128x128xbf16, #tpu.memory_space<vmem>>, vector<128x128xbf16>
    %c0_2 = arith.constant 0 : index
    %c0_3 = arith.constant 0 : index
    %4 = vector.load %arg4[%c0_2, %c0_3] : memref<128x256xbf16, #tpu.memory_space<vmem>>, vector<128x256xbf16>
    %cst = arith.constant dense<0.000000e+00> : vector<128x256xf32>
    %5 = tpu.matmul %3, %4, %cst {dimension_numbers = #tpu.dot_dimension_numbers<[1], [0], [0], [1], [0, 0, 1, 1], [], []>} : vector<128x128xbf16>, vector<128x256xbf16>, vector<128x256xf32> -> vector<128x256xf32>
    %6 = vector.extract_strided_slice %5 {offsets = [0, 0], sizes = [16, 256], strides = [1, 1]} : vector<128x256xf32> to vector<16x256xf32>
    %c0_4 = arith.constant 0 : index
    %c0_5 = arith.constant 0 : index
    %c0_6 = arith.constant 0 : index
    %7 = vector.load %arg5[%c0_4, %c0_5, %c0_6] : memref<2x16x256xf32, #tpu.memory_space<vmem>>, vector<1x16x256xf32>
    %8 = vector.shape_cast %7 : vector<1x16x256xf32> to vector<16x256xf32>
    %9 = vector.shape_cast %6 : vector<16x256xf32> to vector<1x16x256xf32>
    tpu.vector_store %arg5[%c0_4, %c0_5, %c0_6], %9 {strides = array<i32>} : memref<2x16x256xf32, #tpu.memory_space<vmem>>, vector<1x16x256xf32>,
    %10 = vector.extract_strided_slice %5 {offsets = [64, 0], sizes = [16, 256], strides = [1, 1]} : vector<128x256xf32> to vector<16x256xf32>
    %c1 = arith.constant 1 : index
    %c0_7 = arith.constant 0 : index
    %c0_8 = arith.constant 0 : index
    %11 = vector.load %arg5[%c1, %c0_7, %c0_8] : memref<2x16x256xf32, #tpu.memory_space<vmem>>, vector<1x16x256xf32>
    %12 = vector.shape_cast %11 : vector<1x16x256xf32> to vector<16x256xf32>
    %13 = vector.shape_cast %10 : vector<16x256xf32> to vector<1x16x256xf32>
    tpu.vector_store %arg5[%c1, %c0_7, %c0_8], %13 {strides = array<i32>} : memref<2x16x256xf32, #tpu.memory_space<vmem>>, vector<1x16x256xf32>,
    %c0_9 = arith.constant 0 : index
    %c0_10 = arith.constant 0 : index
    %14 = vector.load %arg2[%c0_9, %c0_10] : memref<128x1xi32, #tpu.memory_space<vmem>>, vector<128x1xi32>
    %15 = tpu.iota {dimensions = array<i32: 1>} : vector<1x256xi32>
    %c256_i32 = arith.constant 256 : i32
    %16 = arith.muli %arg1, %c256_i32 : i32
    %17 = vector.broadcast %16 : i32 to vector<1x256xi32>
    %18 = arith.addi %15, %17 : vector<1x256xi32>
    %19 = vector.broadcast %18 : vector<1x256xi32> to vector<128x256xi32>
    %20 = vector.broadcast %14 : vector<128x1xi32> to vector<128x256xi32>
    %21 = arith.cmpi eq, %19, %20 : vector<128x256xi32>
    %c0_11 = arith.constant 0 : index
    %c0_12 = arith.constant 0 : index
    %22 = vector.load %arg9[%c0_11, %c0_12] : memref<128x1xf32, #tpu.memory_space<vmem>>, vector<128x1xf32>
    %cst_13 = arith.constant 0.000000e+00 : f32
    %23 = vector.broadcast %cst_13 : f32 to vector<128x256xf32>
    %24 = arith.select %21, %5, %23 : vector<128x256xi1>, vector<128x256xf32>
    %cst_14 = arith.constant dense<0.000000e+00> : vector<128xf32>
    %25 = vector.multi_reduction <add>, %24, %cst_14 [1] : vector<128x256xf32> to vector<128xf32>
    %26 = vector.shape_cast %25 : vector<128xf32> to vector<128x1xf32>
    %27 = arith.addf %22, %26 : vector<128x1xf32>
    %c0_15 = arith.constant 0 : index
    %c0_16 = arith.constant 0 : index
    %28 = vector.load %arg9[%c0_15, %c0_16] : memref<128x1xf32, #tpu.memory_space<vmem>>, vector<128x1xf32>
    tpu.vector_store %arg9[%c0_15, %c0_16], %27 {strides = array<i32>} : memref<128x1xf32, #tpu.memory_space<vmem>>, vector<128x1xf32>,
    %c500_i32 = arith.constant 500 : i32
    %29 = vector.broadcast %c500_i32 : i32 to vector<1x256xi32>
    %30 = arith.cmpi slt, %18, %29 : vector<1x256xi32>
    %cst_17 = arith.constant 0xFF800000 : f32
    %31 = vector.shape_cast %30 : vector<1x256xi1> to vector<1x256xi1>
    %32 = vector.broadcast %31 : vector<1x256xi1> to vector<128x256xi1>
    %33 = vector.broadcast %cst_17 : f32 to vector<128x256xf32>
    %34 = arith.select %32, %5, %33 : vector<128x256xi1>, vector<128x256xf32>
    %c0_18 = arith.constant 0 : index
    %c0_19 = arith.constant 0 : index
    %35 = vector.load %arg7[%c0_18, %c0_19] : memref<128x1xf32, #tpu.memory_space<vmem>>, vector<128x1xf32>
    %cst_20 = arith.constant dense<0xFF800000> : vector<128xf32>
    %36 = vector.multi_reduction <maximumf>, %34, %cst_20 [1] : vector<128x256xf32> to vector<128xf32>
    %37 = vector.shape_cast %36 : vector<128xf32> to vector<128x1xf32>
    %38 = arith.maximumf %35, %37 : vector<128x1xf32>
    %c0_21 = arith.constant 0 : index
    %c0_22 = arith.constant 0 : index
    %39 = vector.load %arg8[%c0_21, %c0_22] : memref<128x1xf32, #tpu.memory_space<vmem>>, vector<128x1xf32>
    %c0_23 = arith.constant 0 : index
    %c0_24 = arith.constant 0 : index
    %40 = vector.load %arg7[%c0_23, %c0_24] : memref<128x1xf32, #tpu.memory_space<vmem>>, vector<128x1xf32>
    %41 = arith.subf %40, %38 : vector<128x1xf32>
    %42 = math.exp %41 : vector<128x1xf32>
    %43 = arith.mulf %39, %42 : vector<128x1xf32>
    %44 = vector.broadcast %38 : vector<128x1xf32> to vector<128x256xf32>
    %45 = arith.subf %34, %44 : vector<128x256xf32>
    %46 = math.exp %45 : vector<128x256xf32>
    %cst_25 = arith.constant dense<0.000000e+00> : vector<128xf32>
    %47 = vector.multi_reduction <add>, %46, %cst_25 [1] : vector<128x256xf32> to vector<128xf32>
    %48 = vector.shape_cast %47 : vector<128xf32> to vector<128x1xf32>
    %49 = arith.addf %43, %48 : vector<128x1xf32>
    %c0_26 = arith.constant 0 : index
    %c0_27 = arith.constant 0 : index
    %50 = vector.load %arg8[%c0_26, %c0_27] : memref<128x1xf32, #tpu.memory_space<vmem>>, vector<128x1xf32>
    tpu.vector_store %arg8[%c0_26, %c0_27], %49 {strides = array<i32>} : memref<128x1xf32, #tpu.memory_space<vmem>>, vector<128x1xf32>,
    %c0_28 = arith.constant 0 : index
    %c0_29 = arith.constant 0 : index
    %51 = vector.load %arg7[%c0_28, %c0_29] : memref<128x1xf32, #tpu.memory_space<vmem>>, vector<128x1xf32>
    tpu.vector_store %arg7[%c0_28, %c0_29], %38 {strides = array<i32>} : memref<128x1xf32, #tpu.memory_space<vmem>>, vector<128x1xf32>,
    %c1_i32 = arith.constant 1 : i32
    %52 = arith.cmpi eq, %arg1, %c1_i32 : i32
    %53 = arith.extui %52 : i1 to i32
    %c0_i32_30 = arith.constant 0 : i32
    %54 = arith.cmpi ne, %53, %c0_i32_30 : i32
    scf.if %54 {
      %c0_i32_31 = arith.constant 0 : i32
      %55 = vector.broadcast %c0_i32_31 : i32 to vector<128x1xi32>
      %56 = arith.cmpi ne, %14, %55 : vector<128x1xi32>
      %57 = arith.extui %56 : vector<128x1xi1> to vector<128x1xi32>
      %58 = arith.sitofp %57 : vector<128x1xi32> to vector<128x1xf32>
      %c0_32 = arith.constant 0 : index
      %c0_33 = arith.constant 0 : index
      %59 = vector.load %arg9[%c0_32, %c0_33] : memref<128x1xf32, #tpu.memory_space<vmem>>, vector<128x1xf32>
      %c0_34 = arith.constant 0 : index
      %c0_35 = arith.constant 0 : index
      %60 = vector.load %arg7[%c0_34, %c0_35] : memref<128x1xf32, #tpu.memory_space<vmem>>, vector<128x1xf32>
      %c0_36 = arith.constant 0 : index
      %c0_37 = arith.constant 0 : index
      %61 = vector.load %arg8[%c0_36, %c0_37] : memref<128x1xf32, #tpu.memory_space<vmem>>, vector<128x1xf32>
      %62 = math.log %61 : vector<128x1xf32>
      %63 = arith.addf %60, %62 : vector<128x1xf32>
      %64 = arith.subf %59, %63 : vector<128x1xf32>
      %65 = math.exp %64 : vector<128x1xf32>
      %66 = arith.mulf %65, %58 : vector<128x1xf32>
      %67 = tpu.iota {dimensions = array<i32: 0>} : vector<128x8xi32>
      %68 = tpu.iota {dimensions = array<i32: 1>} : vector<128x8xi32>
      %c16_i32 = arith.constant 16 : i32
      %69 = vector.broadcast %c16_i32 : i32 to vector<128x8xi32>
      %70 = arith.muli %68, %69 : vector<128x8xi32>
      %71 = arith.cmpi sge, %67, %70 : vector<128x8xi32>
      %c16_i32_38 = arith.constant 16 : i32
      %72 = vector.broadcast %c16_i32_38 : i32 to vector<128x8xi32>
      %73 = arith.addi %70, %72 : vector<128x8xi32>
      %74 = arith.cmpi slt, %67, %73 : vector<128x8xi32>
      %75 = arith.andi %71, %74 : vector<128x8xi1>
      %76 = arith.extui %75 : vector<128x8xi1> to vector<128x8xi32>
      %77 = arith.sitofp %76 : vector<128x8xi32> to vector<128x8xf32>
      %78 = vector.broadcast %66 : vector<128x1xf32> to vector<128x8xf32>
      %79 = arith.mulf %78, %77 : vector<128x8xf32>
      %cst_39 = arith.constant dense<0.000000e+00> : vector<8xf32>
      %80 = vector.multi_reduction <add>, %79, %cst_39 [0] : vector<128x8xf32> to vector<8xf32>
      %81 = vector.shape_cast %80 : vector<8xf32> to vector<1x8xf32>
      %82 = vector.broadcast %58 : vector<128x1xf32> to vector<128x8xf32>
      %83 = arith.mulf %82, %77 : vector<128x8xf32>
      %cst_40 = arith.constant dense<0.000000e+00> : vector<8xf32>
      %84 = vector.multi_reduction <add>, %83, %cst_40 [0] : vector<128x8xf32> to vector<8xf32>
      %85 = vector.shape_cast %84 : vector<8xf32> to vector<1x8xf32>
      %cst_41 = arith.constant 0.000000e+00 : f32
      %86 = vector.broadcast %cst_41 : f32 to vector<1x8xf32>
      %87 = arith.addf %85, %86 : vector<1x8xf32>
      %88 = arith.divf %81, %87 : vector<1x8xf32>
      %c0_42 = arith.constant 0 : index
      %c0_43 = arith.constant 0 : index
      %89 = vector.load %arg6[%c0_42, %c0_43] : memref<1x8xf32, #tpu.memory_space<vmem>>, vector<1x8xf32>
      tpu.vector_store %arg6[%c0_42, %c0_43], %88 {strides = array<i32>} : memref<1x8xf32, #tpu.memory_space<vmem>>, vector<1x8xf32>,
    } else {
    }
    return
  }
  func.func @transform_0(%arg0: i32, %arg1: i32) -> (i32, i32) {
    %c0_i32 = arith.constant 0 : i32
    %c0_i32_0 = arith.constant 0 : i32
    return %arg0, %c0_i32 : i32, i32
  }
  func.func @transform_1(%arg0: i32, %arg1: i32) -> (i32, i32) {
    %c0_i32 = arith.constant 0 : i32
    %c0_i32_0 = arith.constant 0 : i32
    return %arg0, %c0_i32 : i32, i32
  }
  func.func @transform_2(%arg0: i32, %arg1: i32) -> (i32, i32) {
    %c0_i32 = arith.constant 0 : i32
    %c0_i32_0 = arith.constant 0 : i32
    return %c0_i32, %arg1 : i32, i32
  }
  func.func @transform_3(%arg0: i32, %arg1: i32) -> (i32, i32, i32) {
    %c0_i32 = arith.constant 0 : i32
    %c0_i32_0 = arith.constant 0 : i32
    return %arg0, %c0_i32, %arg1 : i32, i32, i32
  }
  func.func @transform_4(%arg0: i32, %arg1: i32) -> (i32, i32) {
    %c0_i32 = arith.constant 0 : i32
    %c0_i32_0 = arith.constant 0 : i32
    return %arg0, %c0_i32 : i32, i32
  }
}

module attributes {stable_mosaic.version = 11 : i64} {
  func.func @_simmcs_kernel(%arg0: i32, %arg1: i32, %arg2: memref<128x1xi32, #tpu.memory_space<vmem>>, %arg3: memref<128x128xbf16, #tpu.memory_space<vmem>>, %arg4: memref<128x256xbf16, #tpu.memory_space<vmem>>, %arg5: memref<2x16x256xf32, #tpu.memory_space<vmem>>, %arg6: memref<1x8xf32, #tpu.memory_space<vmem>>, %arg7: memref<128x1xf32, #tpu.memory_space<vmem>>, %arg8: memref<128x1xf32, #tpu.memory_space<vmem>>, %arg9: memref<128x1xf32, #tpu.memory_space<vmem>>) attributes {dimension_semantics = [#tpu.dimension_semantics<parallel>, #tpu.dimension_semantics<arbitrary>], iteration_bounds = array<i64: 1, 2>, scalar_prefetch = 0 : i64, scratch_operands = 3 : i64, tpu.core_type = #tpu.core_type<tc>, window_params = [{transform_indices = @transform_0, window_bounds = array<i64: 128, 1>}, {transform_indices = @transform_1, window_bounds = array<i64: 128, 128>}, {transform_indices = @transform_2, window_bounds = array<i64: 128, 256>}, {transform_indices = @transform_3, window_bounds = array<i64: 2, 16, 256>}, {transform_indices = @transform_4, window_bounds = array<i64: 1, 8>}]} {
    %c0_i32 = arith.constant 0 : i32
    %0 = arith.cmpi eq, %arg1, %c0_i32 : i32
    %1 = arith.extui %0 : i1 to i32
    %c0_i32_0 = arith.constant 0 : i32
    %2 = arith.cmpi ne, %1, %c0_i32_0 : i32
    scf.if %2 {
      %cst_31 = arith.constant 0xFF800000 : f32
      %55 = vector.broadcast %cst_31 : f32 to vector<128x1xf32>
      %c0_32 = arith.constant 0 : index
      %c0_33 = arith.constant 0 : index
      %56 = vector.load %arg7[%c0_32, %c0_33] : memref<128x1xf32, #tpu.memory_space<vmem>>, vector<128x1xf32>
      tpu.vector_store %arg7[%c0_32, %c0_33], %55 {strides = array<i32>} : memref<128x1xf32, #tpu.memory_space<vmem>>, vector<128x1xf32>,
      %cst_34 = arith.constant 0.000000e+00 : f32
      %57 = vector.broadcast %cst_34 : f32 to vector<128x1xf32>
      %c0_35 = arith.constant 0 : index
      %c0_36 = arith.constant 0 : index
      %58 = vector.load %arg8[%c0_35, %c0_36] : memref<128x1xf32, #tpu.memory_space<vmem>>, vector<128x1xf32>
      tpu.vector_store %arg8[%c0_35, %c0_36], %57 {strides = array<i32>} : memref<128x1xf32, #tpu.memory_space<vmem>>, vector<128x1xf32>,
      %cst_37 = arith.constant 0.000000e+00 : f32
      %59 = vector.broadcast %cst_37 : f32 to vector<128x1xf32>
      %c0_38 = arith.constant 0 : index
      %c0_39 = arith.constant 0 : index
      %60 = vector.load %arg9[%c0_38, %c0_39] : memref<128x1xf32, #tpu.memory_space<vmem>>, vector<128x1xf32>
      tpu.vector_store %arg9[%c0_38, %c0_39], %59 {strides = array<i32>} : memref<128x1xf32, #tpu.memory_space<vmem>>, vector<128x1xf32>,
    } else {
    }
    %c0 = arith.constant 0 : index
    %c0_1 = arith.constant 0 : index
    %3 = vector.load %arg3[%c0, %c0_1] : memref<128x128xbf16, #tpu.memory_space<vmem>>, vector<128x128xbf16>
    %c0_2 = arith.constant 0 : index
    %c0_3 = arith.constant 0 : index
    %4 = vector.load %arg4[%c0_2, %c0_3] : memref<128x256xbf16, #tpu.memory_space<vmem>>, vector<128x256xbf16>
    %cst = arith.constant dense<0.000000e+00> : vector<128x256xf32>
    %5 = tpu.matmul %3, %4, %cst {dimension_numbers = #tpu.dot_dimension_numbers<[1], [0], [0], [1], [0, 0, 1, 1], [], []>} : vector<128x128xbf16>, vector<128x256xbf16>, vector<128x256xf32> -> vector<128x256xf32>
    %6 = vector.extract_strided_slice %5 {offsets = [0, 0], sizes = [16, 256], strides = [1, 1]} : vector<128x256xf32> to vector<16x256xf32>
    %c0_4 = arith.constant 0 : index
    %c0_5 = arith.constant 0 : index
    %c0_6 = arith.constant 0 : index
    %7 = vector.load %arg5[%c0_4, %c0_5, %c0_6] : memref<2x16x256xf32, #tpu.memory_space<vmem>>, vector<1x16x256xf32>
    %8 = vector.shape_cast %7 : vector<1x16x256xf32> to vector<16x256xf32>
    %9 = vector.shape_cast %6 : vector<16x256xf32> to vector<1x16x256xf32>
    tpu.vector_store %arg5[%c0_4, %c0_5, %c0_6], %9 {strides = array<i32>} : memref<2x16x256xf32, #tpu.memory_space<vmem>>, vector<1x16x256xf32>,
    %10 = vector.extract_strided_slice %5 {offsets = [64, 0], sizes = [16, 256], strides = [1, 1]} : vector<128x256xf32> to vector<16x256xf32>
    %c1 = arith.constant 1 : index
    %c0_7 = arith.constant 0 : index
    %c0_8 = arith.constant 0 : index
    %11 = vector.load %arg5[%c1, %c0_7, %c0_8] : memref<2x16x256xf32, #tpu.memory_space<vmem>>, vector<1x16x256xf32>
    %12 = vector.shape_cast %11 : vector<1x16x256xf32> to vector<16x256xf32>
    %13 = vector.shape_cast %10 : vector<16x256xf32> to vector<1x16x256xf32>
    tpu.vector_store %arg5[%c1, %c0_7, %c0_8], %13 {strides = array<i32>} : memref<2x16x256xf32, #tpu.memory_space<vmem>>, vector<1x16x256xf32>,
    %c0_9 = arith.constant 0 : index
    %c0_10 = arith.constant 0 : index
    %14 = vector.load %arg2[%c0_9, %c0_10] : memref<128x1xi32, #tpu.memory_space<vmem>>, vector<128x1xi32>
    %15 = tpu.iota {dimensions = array<i32: 1>} : vector<1x256xi32>
    %c256_i32 = arith.constant 256 : i32
    %16 = arith.muli %arg1, %c256_i32 : i32
    %17 = vector.broadcast %16 : i32 to vector<1x256xi32>
    %18 = arith.addi %15, %17 : vector<1x256xi32>
    %19 = vector.broadcast %18 : vector<1x256xi32> to vector<128x256xi32>
    %20 = vector.broadcast %14 : vector<128x1xi32> to vector<128x256xi32>
    %21 = arith.cmpi eq, %19, %20 : vector<128x256xi32>
    %c0_11 = arith.constant 0 : index
    %c0_12 = arith.constant 0 : index
    %22 = vector.load %arg9[%c0_11, %c0_12] : memref<128x1xf32, #tpu.memory_space<vmem>>, vector<128x1xf32>
    %cst_13 = arith.constant 0.000000e+00 : f32
    %23 = vector.broadcast %cst_13 : f32 to vector<128x256xf32>
    %24 = arith.select %21, %5, %23 : vector<128x256xi1>, vector<128x256xf32>
    %cst_14 = arith.constant dense<0.000000e+00> : vector<128xf32>
    %25 = vector.multi_reduction <add>, %24, %cst_14 [1] : vector<128x256xf32> to vector<128xf32>
    %26 = vector.shape_cast %25 : vector<128xf32> to vector<128x1xf32>
    %27 = arith.addf %22, %26 : vector<128x1xf32>
    %c0_15 = arith.constant 0 : index
    %c0_16 = arith.constant 0 : index
    %28 = vector.load %arg9[%c0_15, %c0_16] : memref<128x1xf32, #tpu.memory_space<vmem>>, vector<128x1xf32>
    tpu.vector_store %arg9[%c0_15, %c0_16], %27 {strides = array<i32>} : memref<128x1xf32, #tpu.memory_space<vmem>>, vector<128x1xf32>,
    %c500_i32 = arith.constant 500 : i32
    %29 = vector.broadcast %c500_i32 : i32 to vector<1x256xi32>
    %30 = arith.cmpi slt, %18, %29 : vector<1x256xi32>
    %cst_17 = arith.constant 0xFF800000 : f32
    %31 = vector.shape_cast %30 : vector<1x256xi1> to vector<1x256xi1>
    %32 = vector.broadcast %31 : vector<1x256xi1> to vector<128x256xi1>
    %33 = vector.broadcast %cst_17 : f32 to vector<128x256xf32>
    %34 = arith.select %32, %5, %33 : vector<128x256xi1>, vector<128x256xf32>
    %c0_18 = arith.constant 0 : index
    %c0_19 = arith.constant 0 : index
    %35 = vector.load %arg7[%c0_18, %c0_19] : memref<128x1xf32, #tpu.memory_space<vmem>>, vector<128x1xf32>
    %cst_20 = arith.constant dense<0xFF800000> : vector<128xf32>
    %36 = vector.multi_reduction <maximumf>, %34, %cst_20 [1] : vector<128x256xf32> to vector<128xf32>
    %37 = vector.shape_cast %36 : vector<128xf32> to vector<128x1xf32>
    %38 = arith.maximumf %35, %37 : vector<128x1xf32>
    %c0_21 = arith.constant 0 : index
    %c0_22 = arith.constant 0 : index
    %39 = vector.load %arg8[%c0_21, %c0_22] : memref<128x1xf32, #tpu.memory_space<vmem>>, vector<128x1xf32>
    %c0_23 = arith.constant 0 : index
    %c0_24 = arith.constant 0 : index
    %40 = vector.load %arg7[%c0_23, %c0_24] : memref<128x1xf32, #tpu.memory_space<vmem>>, vector<128x1xf32>
    %41 = arith.subf %40, %38 : vector<128x1xf32>
    %42 = math.exp %41 : vector<128x1xf32>
    %43 = arith.mulf %39, %42 : vector<128x1xf32>
    %44 = vector.broadcast %38 : vector<128x1xf32> to vector<128x256xf32>
    %45 = arith.subf %34, %44 : vector<128x256xf32>
    %46 = math.exp %45 : vector<128x256xf32>
    %cst_25 = arith.constant dense<0.000000e+00> : vector<128xf32>
    %47 = vector.multi_reduction <add>, %46, %cst_25 [1] : vector<128x256xf32> to vector<128xf32>
    %48 = vector.shape_cast %47 : vector<128xf32> to vector<128x1xf32>
    %49 = arith.addf %43, %48 : vector<128x1xf32>
    %c0_26 = arith.constant 0 : index
    %c0_27 = arith.constant 0 : index
    %50 = vector.load %arg8[%c0_26, %c0_27] : memref<128x1xf32, #tpu.memory_space<vmem>>, vector<128x1xf32>
    tpu.vector_store %arg8[%c0_26, %c0_27], %49 {strides = array<i32>} : memref<128x1xf32, #tpu.memory_space<vmem>>, vector<128x1xf32>,
    %c0_28 = arith.constant 0 : index
    %c0_29 = arith.constant 0 : index
    %51 = vector.load %arg7[%c0_28, %c0_29] : memref<128x1xf32, #tpu.memory_space<vmem>>, vector<128x1xf32>
    tpu.vector_store %arg7[%c0_28, %c0_29], %38 {strides = array<i32>} : memref<128x1xf32, #tpu.memory_space<vmem>>, vector<128x1xf32>,
    %c1_i32 = arith.constant 1 : i32
    %52 = arith.cmpi eq, %arg1, %c1_i32 : i32
    %53 = arith.extui %52 : i1 to i32
    %c0_i32_30 = arith.constant 0 : i32
    %54 = arith.cmpi ne, %53, %c0_i32_30 : i32
    scf.if %54 {
      %c0_i32_31 = arith.constant 0 : i32
      %55 = vector.broadcast %c0_i32_31 : i32 to vector<128x1xi32>
      %56 = arith.cmpi ne, %14, %55 : vector<128x1xi32>
      %57 = arith.extui %56 : vector<128x1xi1> to vector<128x1xi32>
      %58 = arith.sitofp %57 : vector<128x1xi32> to vector<128x1xf32>
      %c0_32 = arith.constant 0 : index
      %c0_33 = arith.constant 0 : index
      %59 = vector.load %arg9[%c0_32, %c0_33] : memref<128x1xf32, #tpu.memory_space<vmem>>, vector<128x1xf32>
      %c0_34 = arith.constant 0 : index
      %c0_35 = arith.constant 0 : index
      %60 = vector.load %arg7[%c0_34, %c0_35] : memref<128x1xf32, #tpu.memory_space<vmem>>, vector<128x1xf32>
      %c0_36 = arith.constant 0 : index
      %c0_37 = arith.constant 0 : index
      %61 = vector.load %arg8[%c0_36, %c0_37] : memref<128x1xf32, #tpu.memory_space<vmem>>, vector<128x1xf32>
      %62 = math.log %61 : vector<128x1xf32>
      %63 = arith.addf %60, %62 : vector<128x1xf32>
      %64 = arith.subf %59, %63 : vector<128x1xf32>
      %65 = math.exp %64 : vector<128x1xf32>
      %66 = arith.mulf %65, %58 : vector<128x1xf32>
      %67 = tpu.iota {dimensions = array<i32: 0>} : vector<128x8xi32>
      %68 = tpu.iota {dimensions = array<i32: 1>} : vector<128x8xi32>
      %c16_i32 = arith.constant 16 : i32
      %69 = vector.broadcast %c16_i32 : i32 to vector<128x8xi32>
      %70 = arith.muli %68, %69 : vector<128x8xi32>
      %71 = arith.cmpi sge, %67, %70 : vector<128x8xi32>
      %c16_i32_38 = arith.constant 16 : i32
      %72 = vector.broadcast %c16_i32_38 : i32 to vector<128x8xi32>
      %73 = arith.addi %70, %72 : vector<128x8xi32>
      %74 = arith.cmpi slt, %67, %73 : vector<128x8xi32>
      %75 = arith.andi %71, %74 : vector<128x8xi1>
      %76 = arith.extui %75 : vector<128x8xi1> to vector<128x8xi32>
      %77 = arith.sitofp %76 : vector<128x8xi32> to vector<128x8xf32>
      %78 = vector.broadcast %66 : vector<128x1xf32> to vector<128x8xf32>
      %79 = arith.mulf %78, %77 : vector<128x8xf32>
      %cst_39 = arith.constant dense<0.000000e+00> : vector<8xf32>
      %80 = vector.multi_reduction <add>, %79, %cst_39 [0] : vector<128x8xf32> to vector<8xf32>
      %81 = vector.shape_cast %80 : vector<8xf32> to vector<1x8xf32>
      %82 = vector.broadcast %58 : vector<128x1xf32> to vector<128x8xf32>
      %83 = arith.mulf %82, %77 : vector<128x8xf32>
      %cst_40 = arith.constant dense<0.000000e+00> : vector<8xf32>
      %84 = vector.multi_reduction <add>, %83, %cst_40 [0] : vector<128x8xf32> to vector<8xf32>
      %85 = vector.shape_cast %84 : vector<8xf32> to vector<1x8xf32>
      %cst_41 = arith.constant 0.000000e+00 : f32
      %86 = vector.broadcast %cst_41 : f32 to vector<1x8xf32>
      %87 = arith.addf %85, %86 : vector<1x8xf32>
      %88 = arith.divf %81, %87 : vector<1x8xf32>
      %c0_42 = arith.constant 0 : index
      %c0_43 = arith.constant 0 : index
      %89 = vector.load %arg6[%c0_42, %c0_43] : memref<1x8xf32, #tpu.memory_space<vmem>>, vector<1x8xf32>
      tpu.vector_store %arg6[%c0_42, %c0_43], %88 {strides = array<i32>} : memref<1x8xf32, #tpu.memory_space<vmem>>, vector<1x8xf32>,
    } else {
    }
    return
  }
  func.func @transform_0(%arg0: i32, %arg1: i32) -> (i32, i32) {
    %c0_i32 = arith.constant 0 : i32
    %c0_i32_0 = arith.constant 0 : i32
    return %arg0, %c0_i32 : i32, i32
  }
  func.func @transform_1(%arg0: i32, %arg1: i32) -> (i32, i32) {
    %c0_i32 = arith.constant 0 : i32
    %c0_i32_0 = arith.constant 0 : i32
    return %arg0, %c0_i32 : i32, i32
  }
  func.func @transform_2(%arg0: i32, %arg1: i32) -> (i32, i32) {
    %c0_i32 = arith.constant 0 : i32
    %c0_i32_0 = arith.constant 0 : i32
    return %c0_i32, %arg1 : i32, i32
  }
  func.func @transform_3(%arg0: i32, %arg1: i32) -> (i32, i32, i32) {
    %c0_i32 = arith.constant 0 : i32
    %c0_i32_0 = arith.constant 0 : i32
    return %arg0, %c0_i32, %arg1 : i32, i32, i32
  }
  func.func @transform_4(%arg0: i32, %arg1: i32) -> (i32, i32) {
    %c0_i32 = arith.constant 0 : i32
    %c0_i32_0 = arith.constant 0 : i32
    return %arg0, %c0_i32 : i32, i32
  }
}

</mosaic_0001>

<bundles_post_ra>
// kernel: tpu_custom_call.1
= control target key start
LH: loop header
LB: loop body
LE: loop exit
PB: predicated region body
PF: predicated region fallthrough
CT: control target
= control target key end

     0   :  { %10 = vsyncpa [#allocation6], 0  ;;  %s3933_s0 = inlined_call_operand.vmem [shape: s32[128,1], index: 0, kind: input, shape index: {}]   ;;  %s3934_s1 = inlined_call_operand.vmem [shape: bf16[128,128], index: 1, kind: input, shape index: {}]   ;;  %s3935_s2 = inlined_call_operand.hbm [shape: bf16[128,512], index: 2, kind: input, shape index: {}]   ;;  %s3936_s3 = inlined_call_operand.hbm [shape: f32[2,16,512], index: 3, kind: output, shape index: {0}]   ;;  %s3937_s4 = inlined_call_operand.hbm [shape: f32[1,8], index: 4, kind: output, shape index: {1}]  }
   0x1   :  { %12 = vsyncpa [#allocation6 + $0x1], 0 }
   0x2   :  { %13 = vsyncpa [#allocation7], 0 }
   0x3   :  { %15 = vsyncpa [#allocation7 + $0x1], 0 }
   0x4   :  { %16 = vsyncpa [#allocation10], 0  ;;  %s2660_s15 = smov 0   ;;  %s2662_s16 = smov 0  }
   0x5   :  { %s2664_s17 = smov 0   ;;  %s2666_s18 = smov 0  }
   0x6   :  { %s2668_s19 = smov 0   ;;  %s2670_s20 = smov 0  }
   0x7 LB: > { %s2059_s21 = sadd.s32 4294967295, %s2619_s20   ;;  %s2060_s22 = sadd.s32 4294967294, %s2619_s20   ;;  %s2619_s20 = sphi %s2670_s20, %s22_s20   ;;  %s2615_s19 = sphi %s2668_s19, %s4112_s19   ;;  %s2611_s18 = sphi %s2666_s18, %s4111_s18   ;;  %s2607_s17 = sphi %s2664_s17, %s4110_s17   ;;  %s2603_s16 = sphi %s2662_s16, %s4109_s16   ;;  %s2599_s15 = sphi %s2660_s15, %s4108_s15  }
   0x8   : > { %s31_s23 = sadd.s32 1, %s2615_s19  ;;  %s93_s24 = sadd.s32 1, %s2607_s17 }
   0x9   : > { %p32_p0 = scmp.ge.s32.totalorder %s31_s23, 2  ;;  %p100_p1 = scmp.ne.s32.totalorder %s2607_s17, %s2603_s16 }
   0xa   : > { %p101_p2 = scmp.eq.s32.totalorder %s2619_s20, 0  ;;  %p106_p3 = scmp.ne.s32.totalorder %s2603_s16, %s2599_s15 }
   0xb   : > { %s4114_s23 = smov (%p32_p0, %s31_s23), 0  ;;  %p107_p5 = scmp.eq.s32.totalorder %s2059_s21, 0 }
   0xc   : > { %p2701_p4 = por %p101_p2, %p100_p1  ;;  %s90_s26 = ssub.s32 %s2615_s19, %s4114_s23 }
   0xd   : > { %p2707_p6 = scmp.eq.s32.totalorder %s2059_s21, 1  ;;  %p91_p7 = scmp.eq.s32.totalorder %s90_s26, 0 }
   0xe   : > { %p2711_p8 = por %p107_p5, %p106_p3  ;;  %p138_p10 = scmp.eq.s32.totalorder %s2060_s22, 1 }
   0xf   : > { %s3991_s27 = scalar_select %p2707_p6, 1, 0 }
  0x10   : > { %p2717_p9 = por %p2707_p6, %p100_p1  ;;  %p2724_p11 = por %p138_p10, %p106_p3 }
  0x11   : > { %s2722_s30 = scalar_select %p91_p7, %s2607_s17, %s93_s24  }
  0x12   : > { %s3993_s29 = scalar_select %p2717_p9, 1, 0 }
  0x13   : > { %s3994_s5 = scalar_select %p2724_p11, 1, 0 }
  0x14   : > { %p2175_p13 = scmp.lt.s32.totalorder %s2619_s20, 2  ;;  %s202_s6 = sand.u32 1, %s2607_s17  }
  0x15   : > { %s2065_s7 = sshll.u32 %s202_s6, 7  ;;  %s2141_s8 = sshll.u32 %s2615_s19, 7 }
  0x16   : > { %s2735_s11 = scalar_lea.hbm %s3935_s2, %s2141_s8  ;;  %s206_s12 = scalar_lea.vmem [#allocation5], %s2065_s7 }
  0x17   : > { %s213_s13 = sshll.u32 %s206_s12, 4  ;;  %p2741_p0 = pnand %p2175_p13, %p2701_p4  ;;  %s2737_s13 = int_to_ptr.vmem [resolvable:$true] %s213_s13 }
  0x18   : > { %s2745_s21 = scalar_lea.sflag [#allocation6], %s202_s6  ;;  %s2477_s22 = scalar_lea.hbm %s2735_s11, 2048 }
  0x19   : > { %p2478_p1 = scmp.ne.s32.totalorder %s2735_s11, %s2477_s22  ;;  %p2479_p2 = pneg %p2741_p0 }
  0x1a   : > { %s2482_s25 = scalar_lea.hbm %s3935_s2, 4096  ;;  %p2483_p4 = scmp.lt.u32.totalorder %s2735_s11, %s3935_s2 }
  0x1b   : > { %p2480_p3 = pnand %p2479_p2, %p2478_p1  ;;  %p2484_p7 = scmp.lt.u32.totalorder %s2482_s25, %s2477_s22 }
  0x1c   : > { %p2486_p13 = scmp.lt.u32.totalorder %s2477_s22, %s2735_s11 }
  0x1d   : > { %p2481_p5 = pneg %p2480_p3  ;;  %p2485_p10 = por %p2484_p7, %p2483_p4 }
  0x1f   : > { %p2487_p12 = por %p2486_p13, %p2485_p10 }
  0x21   : > { %p2488_p11 = pnand %p2487_p12, %p2481_p5 }
  0x23   : > { %2491 = shalt.err (!%p2488_p11)
}
  0x24   : > { %s2492_s6 = scalar_lea.vmem %s2737_s13, 2048  ;;  %s2621_s9 = smov [#allocation5]  }
  0x25   : > { %p2493_p1 = scmp.ne.s32.totalorder %s2737_s13, %s2492_s6  ;;  %s2497_s10 = sshll.u32 %s2621_s9, 4  ;;  %s2498_s10 = int_to_ptr.vmem [resolvable:$false] %s2497_s10 }
  0x26   : > { %s2499_s12 = scalar_lea.vmem %s2498_s10, 4096  ;;  %p2500_p9 = scmp.lt.s32.totalorder %s2737_s13, %s2498_s10 }
  0x27   : > { %p2495_p3 = pnand %p2493_p1, %p2479_p2  ;;  %p2501_p4 = scmp.lt.s32.totalorder %s2499_s12, %s2492_s6 }
  0x29   : > { %p2496_p6 = pneg %p2495_p3  ;;  %p2502_p7 = por %p2501_p4, %p2500_p9 }
  0x2b   : > { %p2503_p10 = pnand %p2502_p7, %p2496_p6 }
  0x2d   : > { %2506 = shalt.err (!%p2503_p10)
}
  0x2e   : > { %s2622_s22 = smov 256   ;;  %s2623_s24 = smov 128  }
  0x2f   : > { %s2624_s26 = smov 8   ;;  %p2068_p11 = scmp.ge.s32.totalorder %s2619_s20, 1 }
  0x30   : > { %2170 = dma.hbm_to_vmem [thread:$0]  (!%p2741_p0), %s2735_s11, 2048, %s2737_s13, %s2745_s21, %s2622_s22, %s2623_s24, %s2624_s26  }
  0x31   : > { %p221_p12 = scmp.lt.s32.totalorder %s2619_s20, 3 }
  0x33   : > { %p222_p2 = pnand %p2068_p11, %p221_p12 }
  0x35   : > { %225 = sbr.rel (%p222_p2) target bundleno = 1138 (0x472), region = 32 }
  0x3c   : > { %s2776_s25 = sand.u32 1, %s2603_s16  }
  0x3d   : > { %s2069_s7 = sshll.u32 %s2776_s25, 7  ;;  %s228_s8 = scalar_lea.sflag [#allocation6], %s2776_s25 }
  0x3e   : > { %s2780_s6 = scalar_lea.vmem [#allocation5], %s2069_s7 }
  0x3f   : > { %2586 = dma.done.wait (%p2711_p8), %s228_s8, 2048  }
  0x40   : > { %2588 = vsyncadd (%p2711_p8), %s228_s8, 4294965248  ;;  %s2070_s11 = sshll.u32 %s2776_s25, 6  ;;  %p2071_p6 = scmp.ne.s32.totalorder %s2611_s18, 0 }
  0x41   : > { %s2787_s13 = scalar_lea.vmem [#allocation8], %s2070_s11  ;;  %vm286_vm0 = vcmask (!%p2071_p6), 7168   ;;  %v2625_v0 = vmov (!%p2071_p6), -inf   ;;  %v2626_v1 = vmov (!%p2071_p6), 0.0  }
  0x42   : > { %285 = sbr.rel (%p2071_p6) target bundleno = 90 (0x5a), region = 40  ;;  %287 = vst.msk [vmem:[#allocation2] sm:$0xff] (!%p2071_p6), %vm286_vm0, %v2625_v0  ;;  %288 = vst.msk [vmem:[#allocation2 + $0x8] sm:$0xff] (!%p2071_p6), %vm286_vm0, %v2625_v0 }
  0x43   : > { %289 = vst.msk [vmem:[#allocation2 + $0x10] sm:$0xff] (!%p2071_p6), %vm286_vm0, %v2625_v0  ;;  %290 = vst.msk [vmem:[#allocation2 + $0x18] sm:$0xff] (!%p2071_p6), %vm286_vm0, %v2625_v0 }
  0x44   : > { %291 = vst.msk [vmem:[#allocation2 + $0x20] sm:$0xff] (!%p2071_p6), %vm286_vm0, %v2625_v0  ;;  %292 = vst.msk [vmem:[#allocation2 + $0x28] sm:$0xff] (!%p2071_p6), %vm286_vm0, %v2625_v0 }
  0x45   : > { %293 = vst.msk [vmem:[#allocation2 + $0x30] sm:$0xff] (!%p2071_p6), %vm286_vm0, %v2625_v0  ;;  %294 = vst.msk [vmem:[#allocation2 + $0x38] sm:$0xff] (!%p2071_p6), %vm286_vm0, %v2625_v0 }
  0x46   : > { %295 = vst.msk [vmem:[#allocation2 + $0x40] sm:$0xff] (!%p2071_p6), %vm286_vm0, %v2625_v0  ;;  %296 = vst.msk [vmem:[#allocation2 + $0x48] sm:$0xff] (!%p2071_p6), %vm286_vm0, %v2625_v0 }
  0x47   : > { %297 = vst.msk [vmem:[#allocation2 + $0x50] sm:$0xff] (!%p2071_p6), %vm286_vm0, %v2625_v0  ;;  %298 = vst.msk [vmem:[#allocation2 + $0x58] sm:$0xff] (!%p2071_p6), %vm286_vm0, %v2625_v0 }
  0x48   : > { %299 = vst.msk [vmem:[#allocation2 + $0x60] sm:$0xff] (!%p2071_p6), %vm286_vm0, %v2625_v0  ;;  %300 = vst.msk [vmem:[#allocation2 + $0x68] sm:$0xff] (!%p2071_p6), %vm286_vm0, %v2625_v0 }
  0x49   : > { %301 = vst.msk [vmem:[#allocation2 + $0x70] sm:$0xff] %vm286_vm0, %v2625_v0  ;;  %302 = vst.msk [vmem:[#allocation2 + $0x78] sm:$0xff] %vm286_vm0, %v2625_v0 }
  0x4a   : > { %303 = vst.msk [vmem:[#allocation3] sm:$0xff] %vm286_vm0, %v2626_v1  ;;  %304 = vst.msk [vmem:[#allocation3 + $0x8] sm:$0xff] %vm286_vm0, %v2626_v1 }
  0x4b   : > { %305 = vst.msk [vmem:[#allocation3 + $0x10] sm:$0xff] %vm286_vm0, %v2626_v1  ;;  %306 = vst.msk [vmem:[#allocation3 + $0x18] sm:$0xff] %vm286_vm0, %v2626_v1 }
  0x4c   : > { %307 = vst.msk [vmem:[#allocation3 + $0x20] sm:$0xff] %vm286_vm0, %v2626_v1  ;;  %308 = vst.msk [vmem:[#allocation3 + $0x28] sm:$0xff] %vm286_vm0, %v2626_v1 }
  0x4d   : > { %309 = vst.msk [vmem:[#allocation3 + $0x30] sm:$0xff] %vm286_vm0, %v2626_v1  ;;  %310 = vst.msk [vmem:[#allocation3 + $0x38] sm:$0xff] %vm286_vm0, %v2626_v1 }
  0x4e   : > { %311 = vst.msk [vmem:[#allocation3 + $0x40] sm:$0xff] %vm286_vm0, %v2626_v1  ;;  %312 = vst.msk [vmem:[#allocation3 + $0x48] sm:$0xff] %vm286_vm0, %v2626_v1 }
  0x4f   : > { %313 = vst.msk [vmem:[#allocation3 + $0x50] sm:$0xff] %vm286_vm0, %v2626_v1  ;;  %314 = vst.msk [vmem:[#allocation3 + $0x58] sm:$0xff] %vm286_vm0, %v2626_v1 }
  0x50   : > { %315 = vst.msk [vmem:[#allocation3 + $0x60] sm:$0xff] %vm286_vm0, %v2626_v1  ;;  %316 = vst.msk [vmem:[#allocation3 + $0x68] sm:$0xff] %vm286_vm0, %v2626_v1 }
  0x51   : > { %317 = vst.msk [vmem:[#allocation3 + $0x70] sm:$0xff] %vm286_vm0, %v2626_v1  ;;  %318 = vst.msk [vmem:[#allocation3 + $0x78] sm:$0xff] %vm286_vm0, %v2626_v1 }
  0x52   : > { %319 = vst.msk [vmem:[#allocation4] sm:$0xff] %vm286_vm0, %v2626_v1  ;;  %320 = vst.msk [vmem:[#allocation4 + $0x8] sm:$0xff] %vm286_vm0, %v2626_v1 }
  0x53   : > { %321 = vst.msk [vmem:[#allocation4 + $0x10] sm:$0xff] %vm286_vm0, %v2626_v1  ;;  %322 = vst.msk [vmem:[#allocation4 + $0x18] sm:$0xff] %vm286_vm0, %v2626_v1 }
  0x54   : > { %323 = vst.msk [vmem:[#allocation4 + $0x20] sm:$0xff] %vm286_vm0, %v2626_v1  ;;  %324 = vst.msk [vmem:[#allocation4 + $0x28] sm:$0xff] %vm286_vm0, %v2626_v1 }
  0x55   : > { %325 = vst.msk [vmem:[#allocation4 + $0x30] sm:$0xff] %vm286_vm0, %v2626_v1  ;;  %326 = vst.msk [vmem:[#allocation4 + $0x38] sm:$0xff] %vm286_vm0, %v2626_v1 }
  0x56   : > { %327 = vst.msk [vmem:[#allocation4 + $0x40] sm:$0xff] %vm286_vm0, %v2626_v1  ;;  %328 = vst.msk [vmem:[#allocation4 + $0x48] sm:$0xff] %vm286_vm0, %v2626_v1 }
  0x57   : > { %329 = vst.msk [vmem:[#allocation4 + $0x50] sm:$0xff] %vm286_vm0, %v2626_v1  ;;  %330 = vst.msk [vmem:[#allocation4 + $0x58] sm:$0xff] %vm286_vm0, %v2626_v1 }
  0x58   : > { %331 = vst.msk [vmem:[#allocation4 + $0x60] sm:$0xff] %vm286_vm0, %v2626_v1  ;;  %332 = vst.msk [vmem:[#allocation4 + $0x68] sm:$0xff] %vm286_vm0, %v2626_v1 }
  0x59   : > { %333 = vst.msk [vmem:[#allocation4 + $0x70] sm:$0xff] %vm286_vm0, %v2626_v1  ;;  %334 = vst.msk [vmem:[#allocation4 + $0x78] sm:$0xff] %vm286_vm0, %v2626_v1 }
  0x5a PF: > { %v2241_v2 = vld [vmem:[%s2780_s6 + $0x4] ss:$8 sps:$4 sm:$0xff]   ;;  %v2243_v3 = vld [vmem:[%s2780_s6] ss:$8 sps:$4 sm:$0xff]   ;;  %v2627_v4 = vmov 0   ;;  %v2863_v17 = vld [vmem:[%s3933_s0 + $0x10] sm:$0xff]  ;;  %v3941_v38 = vlaneseq }
  0x5b   : > { %527 = vmatprep.mubr.bf16.mxu0 %v2627_v4  ;;  %567 = vmatprep.mubr.bf16.mxu1 %v2627_v4  ;;  %v2244_v5 = vld [vmem:[%s2780_s6 + $0x14] ss:$8 sps:$4 sm:$0xff]   ;;  %v2246_v6 = vld [vmem:[%s2780_s6 + $0x10] ss:$8 sps:$4 sm:$0xff]   ;;  %v2247_v7 = vld [vmem:[%s2780_s6 + $0x24] ss:$8 sps:$4 sm:$0xff]  }
  0x5c   : > { %495 = vmatprep.subr.bf16.mxu0 %v2241_v2  ;;  %2143 = vmatprep.subr.bf16.mxu1 %v2241_v2  ;;  %v2249_v8 = vld [vmem:[%s2780_s6 + $0x20] ss:$8 sps:$4 sm:$0xff]   ;;  %v2250_v9 = vld [vmem:[%s2780_s6 + $0x34] ss:$8 sps:$4 sm:$0xff]   ;;  %v2252_v10 = vld [vmem:[%s2780_s6 + $0x30] ss:$8 sps:$4 sm:$0xff]  }
  0x5d   : > { %496 = vmatpush1.bf16.msra.mxu0 %v2243_v3  ;;  %2151 = vmatpush1.bf16.msra.mxu1 %v2243_v3  ;;  %v2253_v11 = vld [vmem:[%s2780_s6 + $0x44] ss:$8 sps:$4 sm:$0xff]   ;;  %v2255_v12 = vld [vmem:[%s2780_s6 + $0x40] ss:$8 sps:$4 sm:$0xff]   ;;  %v2256_v13 = vld [vmem:[%s2780_s6 + $0x54] ss:$8 sps:$4 sm:$0xff]  }
  0x5e   : > { %497 = vmatprep.subr.bf16.mxu0 %v2244_v5  ;;  %2144 = vmatprep.subr.bf16.mxu1 %v2244_v5  ;;  %v2856_v14 = vld [vmem:[%s3933_s0] sm:$0xff]  ;;  %v2258_v15 = vld [vmem:[%s2780_s6 + $0x50] ss:$8 sps:$4 sm:$0xff]   ;;  %3997 = vst [vmem:[#allocation15_spill] sm:$0xff] %v2863_v17  ;;  %v2870_v18 = vld [vmem:[%s3933_s0 + $0x8] sm:$0xff]  ;;  %v2945_v40 = vand.u32 127, %v3941_v38 }
  0x5f   : > { %2239 = vset.pattern.permute.xlu0 %v2627_v4  ;;  %2240 = vset.pattern.permute.xlu1 %v2627_v4  ;;  %3996 = vst [vmem:[#allocation14_spill] sm:$0xff] %v2856_v14  ;;  %v2259_v16 = vld [vmem:[%s2780_s6 + $0x64] ss:$8 sps:$4 sm:$0xff]   ;;  %3998 = vst [vmem:[#allocation16_spill] sm:$0xff] %v2870_v18  ;;  %v2875_v19 = vld [vmem:[%s3933_s0 + $0x18] sm:$0xff]  ;;  %s2100_s26 = sshll.u32 %s2611_s18, 8 }
  0x60   : > { %641 = vperm.xlu0 %2239, %v2856_v14   ;;  %647 = vperm.xlu1 %2240, %v2863_v17   ;;  %3999 = vst [vmem:[#allocation17_spill] sm:$0xff] %v2875_v19  ;;  %v2261_v20 = vld [vmem:[%s2780_s6 + $0x60] ss:$8 sps:$4 sm:$0xff]   ;;  %v2262_v21 = vld [vmem:[%s2780_s6 + $0x74] ss:$8 sps:$4 sm:$0xff]   ;;  %4005 = vst [vmem:[#allocation23_spill] sm:$0xff] %v2945_v40  ;;  %v637_v43 = vstv %s2100_s26 }
  0x61   : > { %498 = vmatpush1.bf16.msra.mxu0 %v2246_v6  ;;  %2152 = vmatpush1.bf16.msra.mxu1 %v2246_v6  ;;  %v2884_v22 = vld [vmem:[%s3933_s0 + $0x20] sm:$0xff]  ;;  %v2889_v23 = vld [vmem:[%s3933_s0 + $0x28] sm:$0xff]  ;;  %v2264_v24 = vld [vmem:[%s2780_s6 + $0x70] ss:$8 sps:$4 sm:$0xff]   ;;  %v635_v42 = vadd.s32 128, %v2945_v40  ;;  %v2954_v44 = vadd.s32 %v637_v43, %v2945_v40  ;;  %p2101_p8 = scmp.ne.s32.totalorder %s2611_s18, 1 }
  0x62   : > { %499 = vmatprep.subr.bf16.mxu0 %v2247_v7  ;;  %2145 = vmatprep.subr.bf16.mxu1 %v2247_v7  ;;  %4000 = vst [vmem:[#allocation18_spill] sm:$0xff] %v2884_v22  ;;  %4001 = vst [vmem:[#allocation19_spill] sm:$0xff] %v2889_v23  ;;  %v2265_v25 = vld [vmem:[%s3934_s1] sm:$0xff]   ;;  %v2903_v27 = vld [vmem:[%s3933_s0 + $0x30] sm:$0xff] }
  0x63   : > { %v2266_v26 = vld [vmem:[%s3934_s1 + $0x20] sm:$0xff]   ;;  %4002 = vst [vmem:[#allocation20_spill] sm:$0xff] %v2903_v27  ;;  %v2908_v28 = vld [vmem:[%s3933_s0 + $0x38] sm:$0xff]  ;;  %v2267_v30 = vld [vmem:[%s3934_s1 + $0x8] sm:$0xff]   ;;  %v2956_v45 = vadd.s32 %v637_v43, %v635_v42  ;;  %vm849_vm3 = vcmp.lt.s32.totalorder %v2954_v44, 500 }
  0x64   : > { %644 = vperm.xlu0 %2239, %v2870_v18   ;;  %650 = vperm.xlu1 %2240, %v2875_v19   ;;  %4003 = vst [vmem:[#allocation21_spill] sm:$0xff] %v2908_v28  ;;  %v2915_v29 = vld [vmem:[%s3933_s0 + $0x40] sm:$0xff]  ;;  %v2268_v31 = vld [vmem:[%s3934_s1 + $0x28] sm:$0xff]   ;;  %v2269_v32 = vld [vmem:[%s3934_s1 + $0x10] sm:$0xff]  }
  0x65   : > { %500 = vmatpush1.bf16.msra.mxu0 %v2249_v8  ;;  %2153 = vmatpush1.bf16.msra.mxu1 %v2249_v8  ;;  %4004 = vst [vmem:[#allocation22_spill] sm:$0xff] %v2915_v29  ;;  %v2270_v33 = vld [vmem:[%s3934_s1 + $0x30] sm:$0xff]   ;;  %v2271_v34 = vld [vmem:[%s3934_s1 + $0x18] sm:$0xff]   ;;  %vm850_vm6 = vcmp.lt.s32.totalorder %v2956_v45, 500 }
  0x66   : > { %501 = vmatprep.subr.bf16.mxu0 %v2250_v9  ;;  %2146 = vmatprep.subr.bf16.mxu1 %v2250_v9  ;;  %v2272_v35 = vld [vmem:[%s3934_s1 + $0x38] sm:$0xff]  }
  0x68   : > { %653 = vperm.xlu0 %2239, %v2884_v22   ;;  %656 = vperm.xlu1 %2240, %v2889_v23  }
  0x69   : > { %502 = vmatpush1.bf16.msra.mxu0 %v2252_v10  ;;  %2154 = vmatpush1.bf16.msra.mxu1 %v2252_v10 }
  0x6a   : > { %503 = vmatprep.subr.bf16.mxu0 %v2253_v11  ;;  %2147 = vmatprep.subr.bf16.mxu1 %v2253_v11 }
  0x6c   : > { %659 = vperm.xlu0 %2239, %v2903_v27   ;;  %662 = vperm.xlu1 %2240, %v2908_v28  }
  0x6d   : > { %504 = vmatpush1.bf16.msra.mxu0 %v2255_v12  ;;  %2155 = vmatpush1.bf16.msra.mxu1 %v2255_v12 }
  0x6e   : > { %505 = vmatprep.subr.bf16.mxu0 %v2256_v13  ;;  %2148 = vmatprep.subr.bf16.mxu1 %v2256_v13 }
  0x70   : > { %665 = vperm.xlu0 %2239, %v2915_v29  }
  0x71   : > { %506 = vmatpush1.bf16.msra.mxu0 %v2258_v15  ;;  %2156 = vmatpush1.bf16.msra.mxu1 %v2258_v15 }
  0x72   : > { %507 = vmatprep.subr.bf16.mxu0 %v2259_v16  ;;  %2149 = vmatprep.subr.bf16.mxu1 %v2259_v16 }
  0x75   : > { %508 = vmatpush1.bf16.msra.mxu0 %v2261_v20  ;;  %2157 = vmatpush1.bf16.msra.mxu1 %v2261_v20 }
  0x76   : > { %509 = vmatprep.subr.bf16.mxu0 %v2262_v21  ;;  %2150 = vmatprep.subr.bf16.mxu1 %v2262_v21 }
  0x79   : > { %510 = vmatpush1.bf16.msra.mxu0 %v2264_v24  ;;  %2158 = vmatpush1.bf16.msra.mxu1 %v2264_v24 }
  0x7c   : > { %528 = vmatmul.mubr.bf16.vlgmr.msra.gmra.mrb[0].mxu0 %v2265_v25  ;;  %568 = vmatmul.mubr.bf16.vlgmr.msra.gmra.mrb[0].mxu1 %v2266_v26 }
  0x7d   : > { %537 = vmatprep.mubr.bf16.mxu0 %v2627_v4  ;;  %577 = vmatprep.mubr.bf16.mxu1 %v2627_v4 }
  0x84   : > { %538 = vmatmul.mubr.bf16.gmra.mrb[4].mxu0 %v2267_v30  ;;  %578 = vmatmul.mubr.bf16.gmra.mrb[4].mxu1 %v2268_v31 }
  0x85   : > { %547 = vmatprep.mubr.bf16.mxu0 %v2627_v4  ;;  %587 = vmatprep.mubr.bf16.mxu1 %v2627_v4 }
  0x8c   : > { %548 = vmatmul.mubr.bf16.gmra.mrb[8].mxu0 %v2269_v32  ;;  %588 = vmatmul.mubr.bf16.gmra.mrb[8].mxu1 %v2270_v33 }
  0x8d   : > { %557 = vmatprep.mubr.bf16.mxu0 %v2627_v4  ;;  %597 = vmatprep.mubr.bf16.mxu1 %v2627_v4 }
  0x94   : > { %558 = vmatmul.mubr.bf16.gmra.mrb[12].mxu0 %v2271_v34  ;;  %598 = vmatmul.mubr.bf16.gmra.mrb[12].mxu1 %v2272_v35 }
  0xdf   : > { %v642_v36 = vpop.permute.xlu0 %641  ;;  %v648_v47 = vpop.permute.xlu1 %647 }
  0xe0   : > { %vm688_vm1 = vcmp.eq.s32.totalorder %v2954_v44, %v642_v36  ;;  %vm689_vm4 = vcmp.eq.s32.totalorder %v2956_v45, %v642_v36  ;;  %vm692_vm9 = vcmp.eq.s32.totalorder %v2954_v44, %v648_v47  ;;  %vm693_vm10 = vcmp.eq.s32.totalorder %v2956_v45, %v648_v47 }
  0xe3   : > { %v645_v37 = vpop.permute.xlu0 %644  ;;  %v651_v8 = vpop.permute.xlu1 %650 }
  0xe4   : > { %vm690_vm7 = vcmp.eq.s32.totalorder %v2954_v44, %v645_v37  ;;  %vm691_vm8 = vcmp.eq.s32.totalorder %v2956_v45, %v645_v37  ;;  %vm694_vm11 = vcmp.eq.s32.totalorder %v2954_v44, %v651_v8  ;;  %vm695_vm12 = vcmp.eq.s32.totalorder %v2956_v45, %v651_v8 }
  0xe7   : > { %v2942_v39 = vpop.permute.xlu0 %653 }
  0xe8   : > { %vm696_vm13 = vcmp.eq.s32.totalorder %v2954_v44, %v2942_v39  ;;  %vm697_vm14 = vcmp.eq.s32.totalorder %v2956_v45, %v2942_v39 }
  0xeb   : > { %v2948_v41 = vpop.permute.xlu0 %659 }
  0xef   : > { %v666_v46 = vpop.permute.xlu0 %665 }
  0xf0   : > { %vm704_vm2 = vcmp.eq.s32.totalorder %v2954_v44, %v666_v46  ;;  %vm705_vm5 = vcmp.eq.s32.totalorder %v2956_v45, %v666_v46 }
 0x14f   : > { %v529_v48 = vpop.f32.mrb[0].mxu0  ;;  %v569_v49 = vpop.f32.mrb[0].mxu1 }
 0x150   : > { %608 = vst [vmem:[%s2787_s13] sm:$0xff] %v529_v48  ;;  %2096 = vst [vmem:[%s2787_s13 + $0x20] sm:$0xff] %v569_v49  ;;  %v531_v50 = vpop.f32.mrb[1].mxu0  ;;  %v571_v51 = vpop.f32.mrb[1].mxu1  ;;  %v2970_v52 = vsel %vm849_vm3, %v569_v49, -inf  ;;  %v2974_v53 = vsel %vm849_vm3, %v529_v48, -inf  ;;  %v736_v54 = vsel %vm688_vm1, %v529_v48, 0.0  ;;  %vm700_vm1 = vcmp.eq.s32.totalorder %v2954_v44, %v2948_v41 }
 0x151   : > { %v752_v55 = vsel %vm704_vm2, %v569_v49, 0.0  ;;  %609 = vst [vmem:[%s2787_s13 + $0x8] sm:$0xff] %v531_v50  ;;  %2097 = vst [vmem:[%s2787_s13 + $0x28] sm:$0xff] %v571_v51  ;;  %v533_v56 = vpop.f32.mrb[2].mxu0  ;;  %v2982_v57 = vpop.f32.mrb[2].mxu1  ;;  %v2986_v58 = vsel %vm850_vm6, %v571_v51, -inf  ;;  %vm701_vm2 = vcmp.eq.s32.totalorder %v2956_v45, %v2948_v41 }
 0x152   : > { %v2990_v59 = vsel %vm850_vm6, %v531_v50, -inf  ;;  %v737_v60 = vsel %vm689_vm4, %v531_v50, 0.0  ;;  %v753_v61 = vsel %vm705_vm5, %v571_v51, 0.0  ;;  %610 = vst [vmem:[%s2787_s13 + $0x10] sm:$0xff] %v533_v56  ;;  %v535_v62 = vpop.f32.mrb[3].mxu0  ;;  %2098 = vst [vmem:[%s2787_s13 + $0x30] sm:$0xff] %v2982_v57  ;;  %v927_v0 = vmax.f32 %v2970_v52, %v2986_v58  ;;  %v657_v49 = vpop.permute.xlu1 %656 }
 0x153   : > { %v2999_v63 = vpop.f32.mrb[3].mxu1  ;;  %v903_v1 = vmax.f32 %v2974_v53, %v2990_v59  ;;  %v3008_v2 = vsel %vm849_vm3, %v2982_v57, -inf  ;;  %v3012_v3 = vsel %vm849_vm3, %v533_v56, -inf  ;;  %611 = vst [vmem:[%s2787_s13 + $0x18] sm:$0xff] %v535_v62  ;;  %v3024_v5 = vsel %vm850_vm6, %v535_v62, -inf }
 0x154   : > { %2099 = vst [vmem:[%s2787_s13 + $0x38] sm:$0xff] %v2999_v63  ;;  %v3020_v4 = vsel %vm850_vm6, %v2999_v63, -inf  ;;  %v3026_v6 = vadd.f32 %v737_v60, %v736_v54  ;;  %v738_v7 = vsel %vm690_vm7, %v533_v56, 0.0  ;;  %928 = vmax.xlane.f32.xlu1 %v927_v0  ;;  %v739_v10 = vsel %vm691_vm8, %v535_v62, 0.0 }
 0x155   : > { %904 = vmax.xlane.f32.xlu0 %v903_v1  ;;  %v930_v9 = vmax.f32 %v3008_v2, %v3020_v4  ;;  %v3034_v11 = vadd.f32 %v753_v61, %v752_v55  ;;  %v3036_v12 = vadd.f32 %v739_v10, %v738_v7  ;;  %v906_v13 = vmax.f32 %v3012_v3, %v3024_v5 }
 0x156   : > { %vm698_vm15 = vcmp.eq.s32.totalorder %v2954_v44, %v657_v49  ;;  %vm699_vm0 = vcmp.eq.s32.totalorder %v2956_v45, %v657_v49 }
 0x157   : > { %v539_v15 = vpop.f32.mrb[4].mxu0  ;;  %v3043_v16 = vpop.f32.mrb[4].mxu1 }
 0x158   : > { %v3047_v20 = vsel %vm849_vm3, %v539_v15, -inf  ;;  %v3053_v21 = vsel %vm849_vm3, %v3043_v16, -inf  ;;  %907 = vmax.xlane.f32.xlu1 %v906_v13  ;;  %v541_v24 = vpop.f32.mrb[5].mxu0  ;;  %v3055_v25 = vpop.f32.mrb[5].mxu1  ;;  %v740_v26 = vsel %vm692_vm9, %v539_v15, 0.0 }
 0x159   : > { %931 = vmax.xlane.f32.xlu0 %v930_v9  ;;  %v741_v30 = vsel %vm693_vm10, %v541_v24, 0.0  ;;  %v3059_v31 = vsel %vm850_vm6, %v541_v24, -inf  ;;  %v543_v32 = vpop.f32.mrb[6].mxu0  ;;  %v3064_v33 = vsel %vm850_vm6, %v3055_v25, -inf  ;;  %v3066_v34 = vpop.f32.mrb[6].mxu1 }
 0x15a   : > { %v742_v35 = vsel %vm694_vm11, %v543_v32, 0.0  ;;  %v545_v36 = vpop.f32.mrb[7].mxu0  ;;  %v3068_v37 = vpop.f32.mrb[7].mxu1  ;;  %v909_v42 = vmax.f32 %v3047_v20, %v3059_v31  ;;  %v3074_v43 = vsel %vm849_vm3, %v543_v32, -inf  ;;  %v933_v48 = vmax.f32 %v3053_v21, %v3064_v33 }
 0x15b   : > { %v743_v46 = vsel %vm695_vm12, %v545_v36, 0.0  ;;  %v3080_v47 = vsel %vm850_vm6, %v545_v36, -inf  ;;  %v3084_v50 = vadd.f32 %v741_v30, %v740_v26  ;;  %v3097_v55 = vsel %vm849_vm3, %v3066_v34, -inf }
 0x15c   : > { %v3086_v51 = vadd.f32 %v743_v46, %v742_v35  ;;  %934 = vmax.xlane.f32.xlu1 %v933_v48  ;;  %v912_v54 = vmax.f32 %v3074_v43, %v3080_v47  ;;  %v3102_v56 = vsel %vm850_vm6, %v3068_v37, -inf  ;;  %v663_v48 = vpop.permute.xlu1 %662 }
 0x15d   : > { %910 = vmax.xlane.f32.xlu0 %v909_v42  ;;  %v936_v32 = vmax.f32 %v3097_v55, %v3102_v56  ;;  %vm702_vm4 = vcmp.eq.s32.totalorder %v2954_v44, %v663_v48  ;;  %vm703_vm5 = vcmp.eq.s32.totalorder %v2956_v45, %v663_v48 }
 0x15f   : > { %v549_v60 = vpop.f32.mrb[8].mxu0  ;;  %v3105_v61 = vpop.f32.mrb[8].mxu1 }
 0x160   : > { %v744_v62 = vsel %vm696_vm13, %v549_v60, 0.0  ;;  %v3109_v39 = vsel %vm849_vm3, %v549_v60, -inf  ;;  %v551_v0 = vpop.f32.mrb[9].mxu0  ;;  %v3112_v1 = vpop.f32.mrb[9].mxu1  ;;  %v3117_v7 = vsel %vm849_vm3, %v3105_v61, -inf }
 0x161   : > { %913 = vmax.xlane.f32.xlu0 %v912_v54  ;;  %v745_v8 = vsel %vm697_vm14, %v551_v0, 0.0  ;;  %v3121_v9 = vsel %vm850_vm6, %v551_v0, -inf  ;;  %v553_v10 = vpop.f32.mrb[10].mxu0  ;;  %v3126_v13 = vsel %vm850_vm6, %v3112_v1, -inf  ;;  %v3128_v15 = vpop.f32.mrb[10].mxu1 }
 0x162   : > { %4006 = vst [vmem:[#allocation24_spill] sm:$0xff] %v3126_v13  ;;  %v746_v24 = vsel %vm698_vm15, %v553_v10, 0.0  ;;  %v555_v26 = vpop.f32.mrb[11].mxu0  ;;  %v3130_v30 = vpop.f32.mrb[11].mxu1  ;;  %v915_v35 = vmax.f32 %v3109_v39, %v3121_v9  ;;  %v3138_v36 = vsel %vm849_vm3, %v553_v10, -inf  ;;  %v939_v54 = vmax.f32 %v3117_v7, %v3126_v13 }
 0x163   : > { %v747_v42 = vsel %vm699_vm0, %v555_v26, 0.0  ;;  %v3144_v46 = vsel %vm850_vm6, %v555_v26, -inf  ;;  %v3150_v0 = vadd.f32 %v745_v8, %v744_v62  ;;  %v3159_v10 = vsel %vm849_vm3, %v3128_v15, -inf }
 0x164   : > { %916 = vmax.xlane.f32.xlu1 %v915_v35  ;;  %v783_v60 = vadd.f32 %v747_v42, %v746_v24  ;;  %v918_v49 = vmax.f32 %v3138_v36, %v3144_v46  ;;  %v3164_v24 = vsel %vm850_vm6, %v3130_v30, -inf }
 0x165   : > { %937 = vmax.xlane.f32.xlu0 %v936_v32  ;;  %v942_v27 = vmax.f32 %v3159_v10, %v3164_v24 }
 0x167   : > { %v559_v26 = vpop.f32.mrb[12].mxu0  ;;  %v3167_v62 = vpop.f32.mrb[12].mxu1 }
 0x168   : > { %v748_v8 = vsel %vm700_vm1, %v559_v26, 0.0  ;;  %v3171_v41 = vsel %vm849_vm3, %v559_v26, -inf  ;;  %940 = vmax.xlane.f32.xlu1 %v939_v54  ;;  %v561_v32 = vpop.f32.mrb[13].mxu0  ;;  %v3173_v35 = vpop.f32.mrb[13].mxu1  ;;  %v3179_v42 = vsel %vm849_vm3, %v3167_v62, -inf }
 0x169   : > { %4007 = vst [vmem:[#allocation25_spill] sm:$0xff] %v3171_v41  ;;  %919 = vmax.xlane.f32.xlu0 %v918_v49  ;;  %4008 = vst [vmem:[#allocation26_spill] sm:$0xff] %v3179_v42  ;;  %v749_v38 = vsel %vm701_vm2, %v561_v32, 0.0  ;;  %v3183_v40 = vsel %vm850_vm6, %v561_v32, -inf  ;;  %v563_v29 = vpop.f32.mrb[14].mxu0  ;;  %v3188_v54 = vsel %vm850_vm6, %v3173_v35, -inf }
 0x16a   : > { %4009 = vst [vmem:[#allocation27_spill] sm:$0xff] %v3183_v40  ;;  %4010 = vst [vmem:[#allocation28_spill] sm:$0xff] %v3188_v54  ;;  %v3190_v49 = vpop.f32.mrb[14].mxu1  ;;  %v750_v26 = vsel %vm702_vm4, %v563_v29, 0.0  ;;  %v565_v48 = vpop.f32.mrb[15].mxu0  ;;  %v921_v23 = vmax.f32 %v3171_v41, %v3183_v40  ;;  %v3200_v32 = vsel %vm849_vm3, %v563_v29, -inf  ;;  %v945_v17 = vmax.f32 %v3179_v42, %v3188_v54 }
 0x16b   : > { %v3192_v28 = vpop.f32.mrb[15].mxu1  ;;  %v751_v22 = vsel %vm703_vm5, %v565_v48, 0.0  ;;  %v3204_v19 = vsel %vm850_vm6, %v565_v48, -inf  ;;  %v3208_v14 = vadd.f32 %v749_v38, %v748_v8  ;;  %v3215_v29 = vsel %vm849_vm3, %v3190_v49, -inf  ;;  %v3245_v38 = vld [vmem:[#allocation2 + $0x40] sm:$0xff]  ;;  %v3255_v8 = vld [vmem:[#allocation2 + $0x48] sm:$0xff] }
 0x16c   : > { %922 = vmax.xlane.f32.xlu1 %v921_v23  ;;  %v789_v18 = vadd.f32 %v751_v22, %v750_v26  ;;  %v924_v40 = vmax.f32 %v3200_v32, %v3204_v19  ;;  %4011 = vst [vmem:[#allocation29_spill] sm:$0xff] %v3215_v29  ;;  %v3220_v48 = vsel %vm850_vm6, %v3192_v28, -inf  ;;  %v3229_v23 = vld [vmem:[%s3933_s0 + $0x48] sm:$0xff]  ;;  %4016 = vst [vmem:[#allocation34_spill] sm:$0xff] %v3245_v38  ;;  %vm832_vm3 = vcmask 7168  }
 0x16d   : > { %943 = vmax.xlane.f32.xlu0 %v942_v27  ;;  %4012 = vst [vmem:[#allocation30_spill] sm:$0xff] %v3220_v48  ;;  %v948_v22 = vmax.f32 %v3215_v29, %v3220_v48  ;;  %4013 = vst [vmem:[#allocation31_spill] sm:$0xff] %v3229_v23  ;;  %v3242_v27 = vld [vmem:[%s3933_s0 + $0x60] sm:$0xff]  ;;  %v3257_v26 = vld [vmem:[#allocation2 + $0x8] sm:$0xff] }
 0x16e   : > { %4015 = vst [vmem:[#allocation33_spill] sm:$0xff] %v3242_v27  ;;  %4020 = vst [vmem:[#allocation38_spill] sm:$0xff] %v3255_v8  ;;  %v3322_v54 = vld [vmem:[#allocation2 + $0x28] sm:$0xff] }
 0x16f   : > { %4021 = vst [vmem:[#allocation39_spill] sm:$0xff] %v3257_v26  ;;  %4031 = vst [vmem:[#allocation49_spill] sm:$0xff] %v3322_v54 }
 0x170   : > { %946 = vmax.xlane.f32.xlu1 %v945_v17  ;;  %v3236_v17 = vld [vmem:[%s3933_s0 + $0x50] sm:$0xff] }
 0x171   : > { %925 = vmax.xlane.f32.xlu0 %v924_v40  ;;  %4014 = vst [vmem:[#allocation32_spill] sm:$0xff] %v3236_v17  ;;  %v3247_v40 = vld [vmem:[#allocation2] sm:$0xff] }
 0x172   : > { %4017 = vst [vmem:[#allocation35_spill] sm:$0xff] %v3247_v40 }
 0x175   : > { %949 = vmax.xlane.f32.xlu0 %v948_v22  ;;  %v3339_v22 = vld [vmem:[#allocation2 + $0x68] sm:$0xff] }
 0x176   : > { %4033 = vst [vmem:[#allocation51_spill] sm:$0xff] %v3339_v22 }
 0x179   : > { %769 = vadd.xlane.f32.xlu0 %v3026_v6 }
 0x17d   : > { %775 = vadd.xlane.f32.xlu0 %v3084_v50 }
 0x181   : > { %778 = vadd.xlane.f32.xlu0 %v3086_v51  ;;  %668 = vperm.xlu1 %2240, %v3229_v23   ;;  %v3283_v23 = vld [vmem:[#allocation2 + $0x50] sm:$0xff] }
 0x182   : > { %4023 = vst [vmem:[#allocation41_spill] sm:$0xff] %v3283_v23 }
 0x185   : > { %784 = vadd.xlane.f32.xlu0 %v783_v60  ;;  %671 = vperm.xlu1 %2240, %v3236_v17  }
 0x189   : > { %790 = vadd.xlane.f32.xlu0 %v789_v18  ;;  %677 = vperm.xlu1 %2240, %v3242_v27   ;;  %v3274_v18 = vld [vmem:[#allocation2 + $0x10] sm:$0xff] }
 0x18a   : > { %4022 = vst [vmem:[#allocation40_spill] sm:$0xff] %v3274_v18 }
 0x1e1   : > { %v929_v6 = vpop.xlane.xlu1 %928 }
 0x1e2   : > { %v905_v50 = vpop.xlane.xlu0 %904  ;;  %v3250_v51 = vmax.f32 %v3245_v38, %v929_v6 }
 0x1e3   : > { %v3253_v60 = vmax.f32 %v3247_v40, %v905_v50  ;;  %v3291_v40 = vld [vmem:[#allocation2 + $0x18] sm:$0xff] }
 0x1e4   : > { %4018 = vst [vmem:[#allocation36_spill] sm:$0xff] %v3250_v51  ;;  %1311 = vst.msk [vmem:[#allocation2 + $0x40] sm:$0xff] %vm832_vm3, %v3250_v51 }
 0x1e5   : > { %4019 = vst [vmem:[#allocation37_spill] sm:$0xff] %v3253_v60  ;;  %1303 = vst.msk [vmem:[#allocation2] sm:$0xff] %vm832_vm3, %v3253_v60  ;;  %1049 = vperm.xlu1 %2240, %v3253_v60   ;;  %v908_v50 = vpop.xlane.xlu1 %907 }
 0x1e6   : > { %v932_v6 = vpop.xlane.xlu0 %931  ;;  %v3272_v17 = vmax.f32 %v3257_v26, %v908_v50  ;;  %4026 = vst [vmem:[#allocation44_spill] sm:$0xff] %v3291_v40  ;;  %v3307_v26 = vld [vmem:[#allocation2 + $0x20] sm:$0xff] }
 0x1e7   : > { %v3269_v27 = vmax.f32 %v3255_v8, %v932_v6  ;;  %v3305_v8 = vld [vmem:[#allocation2 + $0x58] sm:$0xff]  ;;  %4028 = vst [vmem:[#allocation46_spill] sm:$0xff] %v3307_v26 }
 0x1e8   : > { %1304 = vst.msk [vmem:[#allocation2 + $0x8] sm:$0xff] %vm832_vm3, %v3272_v17  ;;  %4027 = vst [vmem:[#allocation45_spill] sm:$0xff] %v3305_v8 }
 0x1e9   : > { %1312 = vst.msk [vmem:[#allocation2 + $0x48] sm:$0xff] %vm832_vm3, %v3269_v27  ;;  %1089 = vperm.xlu1 %2240, %v3250_v51   ;;  %v935_v50 = vpop.xlane.xlu1 %934 }
 0x1ea   : > { %v911_v6 = vpop.xlane.xlu0 %910  ;;  %v3289_v60 = vmax.f32 %v3283_v23, %v935_v50 }
 0x1eb   : > { %v3286_v38 = vmax.f32 %v3274_v18, %v911_v6  ;;  %v3320_v18 = vld [vmem:[#allocation2 + $0x60] sm:$0xff] }
 0x1ec   : > { %4025 = vst [vmem:[#allocation43_spill] sm:$0xff] %v3289_v60  ;;  %1313 = vst.msk [vmem:[#allocation2 + $0x50] sm:$0xff] %vm832_vm3, %v3289_v60 }
 0x1ed   : > { %4024 = vst [vmem:[#allocation42_spill] sm:$0xff] %v3286_v38  ;;  %1305 = vst.msk [vmem:[#allocation2 + $0x10] sm:$0xff] %vm832_vm3, %v3286_v38  ;;  %1059 = vperm.xlu1 %2240, %v3286_v38  }
 0x1ee   : > { %v914_v6 = vpop.xlane.xlu0 %913  ;;  %4030 = vst [vmem:[#allocation48_spill] sm:$0xff] %v3320_v18 }
 0x1ef   : > { %v3303_v50 = vmax.f32 %v3291_v40, %v914_v6 }
 0x1f1   : > { %1306 = vst.msk [vmem:[#allocation2 + $0x18] sm:$0xff] %vm832_vm3, %v3303_v50  ;;  %1099 = vperm.xlu1 %2240, %v3289_v60   ;;  %v917_v23 = vpop.xlane.xlu1 %916  ;;  %v3358_v60 = vld [vmem:[#allocation2 + $0x70] sm:$0xff] }
 0x1f2   : > { %v938_v51 = vpop.xlane.xlu0 %937  ;;  %v3318_v6 = vmax.f32 %v3307_v26, %v917_v23  ;;  %4036 = vst [vmem:[#allocation54_spill] sm:$0xff] %v3358_v60 }
 0x1f3   : > { %v3315_v38 = vmax.f32 %v3305_v8, %v938_v51  ;;  %v3341_v8 = vld [vmem:[#allocation2 + $0x30] sm:$0xff] }
 0x1f4   : > { %4029 = vst [vmem:[#allocation47_spill] sm:$0xff] %v3318_v6  ;;  %1307 = vst.msk [vmem:[#allocation2 + $0x20] sm:$0xff] %vm832_vm3, %v3318_v6 }
 0x1f5   : > { %1314 = vst.msk [vmem:[#allocation2 + $0x58] sm:$0xff] %vm832_vm3, %v3315_v38  ;;  %1069 = vperm.xlu1 %2240, %v3318_v6   ;;  %v941_v23 = vpop.xlane.xlu1 %940  ;;  %4034 = vst [vmem:[#allocation52_spill] sm:$0xff] %v3341_v8 }
 0x1f6   : > { %v920_v51 = vpop.xlane.xlu0 %919  ;;  %v3334_v40 = vmax.f32 %v3320_v18, %v941_v23  ;;  %v3360_v18 = vld [vmem:[#allocation2 + $0x38] sm:$0xff] }
 0x1f7   : > { %v3337_v42 = vmax.f32 %v3322_v54, %v920_v51  ;;  %4037 = vst [vmem:[#allocation55_spill] sm:$0xff] %v3360_v18 }
 0x1f8   : > { %4032 = vst [vmem:[#allocation50_spill] sm:$0xff] %v3334_v40  ;;  %1315 = vst.msk [vmem:[#allocation2 + $0x60] sm:$0xff] %vm832_vm3, %v3334_v40 }
 0x1f9   : > { %1308 = vst.msk [vmem:[#allocation2 + $0x28] sm:$0xff] %vm832_vm3, %v3337_v42  ;;  %1109 = vperm.xlu1 %2240, %v3334_v40   ;;  %v923_v51 = vpop.xlane.xlu1 %922  ;;  %v720_v40 = vld [vmem:[#allocation4] sm:$0xff] }
 0x1fa   : > { %v944_v23 = vpop.xlane.xlu0 %943  ;;  %v3356_v48 = vmax.f32 %v3341_v8, %v923_v51 }
 0x1fb   : > { %v3353_v26 = vmax.f32 %v3339_v22, %v944_v23 }
 0x1fc   : > { %4035 = vst [vmem:[#allocation53_spill] sm:$0xff] %v3356_v48  ;;  %1309 = vst.msk [vmem:[#allocation2 + $0x30] sm:$0xff] %vm832_vm3, %v3356_v48 }
 0x1fd   : > { %1316 = vst.msk [vmem:[#allocation2 + $0x68] sm:$0xff] %vm832_vm3, %v3353_v26  ;;  %1079 = vperm.xlu1 %2240, %v3356_v48   ;;  %v947_v23 = vpop.xlane.xlu1 %946  ;;  %v3386_v48 = vld [vmem:[#allocation2 + $0x78] sm:$0xff] }
 0x1fe   : > { %v926_v51 = vpop.xlane.xlu0 %925  ;;  %v3372_v54 = vmax.f32 %v3358_v60, %v947_v23  ;;  %4039 = vst [vmem:[#allocation57_spill] sm:$0xff] %v3386_v48 }
 0x1ff   : > { %v3375_v29 = vmax.f32 %v3360_v18, %v926_v51  ;;  %v3391_v51 = vld [vmem:[%s3933_s0 + $0x68] sm:$0xff] }
 0x200   : > { %4038 = vst [vmem:[#allocation56_spill] sm:$0xff] %v3372_v54  ;;  %1317 = vst.msk [vmem:[#allocation2 + $0x70] sm:$0xff] %vm832_vm3, %v3372_v54 }
 0x201   : > { %1310 = vst.msk [vmem:[#allocation2 + $0x38] sm:$0xff] %vm832_vm3, %v3375_v29  ;;  %1119 = vperm.xlu1 %2240, %v3372_v54   ;;  %v669_v23 = vpop.permute.xlu1 %668  ;;  %4040 = vst [vmem:[#allocation58_spill] sm:$0xff] %v3391_v51 }
 0x202   : > { %v950_v8 = vpop.xlane.xlu0 %949  ;;  %vm706_vm6 = vcmp.eq.s32.totalorder %v2954_v44, %v669_v23  ;;  %vm707_vm7 = vcmp.eq.s32.totalorder %v2956_v45, %v669_v23 }
 0x203   : > { %v3396_v6 = vmax.f32 %v3386_v48, %v950_v8  ;;  %v754_v60 = vsel %vm706_vm6, %v2982_v57, 0.0  ;;  %v755_v54 = vsel %vm707_vm7, %v2999_v63, 0.0  ;;  %v3408_v8 = vld [vmem:[%s3933_s0 + $0x78] sm:$0xff]  ;;  %v722_v63 = vld [vmem:[#allocation4 + $0x10] sm:$0xff] }
 0x204   : > { %v795_v18 = vadd.f32 %v755_v54, %v754_v60  ;;  %4041 = vst [vmem:[#allocation59_spill] sm:$0xff] %v3408_v8 }
 0x205   : > { %680 = vperm.xlu1 %2240, %v3391_v51   ;;  %1318 = vst.msk [vmem:[#allocation2 + $0x78] sm:$0xff] %vm832_vm3, %v3396_v6  ;;  %v672_v41 = vpop.permute.xlu1 %671 }
 0x206   : > { %v770_v13 = vpop.xlane.xlu0 %769  ;;  %vm708_vm8 = vcmp.eq.s32.totalorder %v2954_v44, %v672_v41  ;;  %vm709_vm9 = vcmp.eq.s32.totalorder %v2956_v45, %v672_v41  ;;  %796 = vadd.xlane.f32.xlu0 %v795_v18  ;;  %v723_v41 = vld [vmem:[#allocation4 + $0x18] sm:$0xff] }
 0x207   : > { %v816_v57 = vadd.f32 %v770_v13, %v720_v40  ;;  %v756_v54 = vsel %vm708_vm8, %v3043_v16, 0.0  ;;  %v757_v60 = vsel %vm709_vm9, %v3055_v25, 0.0 }
 0x208   : > { %v798_v23 = vadd.f32 %v757_v60, %v756_v54 }
 0x209   : > { %833 = vst.msk [vmem:[#allocation4] sm:$0xff] %vm832_vm3, %v816_v57  ;;  %686 = vperm.xlu1 %2240, %v3408_v8   ;;  %v678_v22 = vpop.permute.xlu1 %677  ;;  %v725_v57 = vld [vmem:[#allocation4 + $0x28] sm:$0xff]  ;;  %v727_v8 = vld [vmem:[#allocation4 + $0x38] sm:$0xff] }
 0x20a   : > { %v776_v51 = vpop.xlane.xlu0 %775  ;;  %vm712_vm10 = vcmp.eq.s32.totalorder %v2954_v44, %v678_v22  ;;  %vm713_vm11 = vcmp.eq.s32.totalorder %v2956_v45, %v678_v22 }
 0x20b   : > { %v818_v48 = vadd.f32 %v776_v51, %v722_v63  ;;  %v760_v13 = vsel %vm712_vm10, %v3105_v61, 0.0  ;;  %v761_v40 = vsel %vm713_vm11, %v3112_v1, 0.0  ;;  %v3427_v61 = vld [vmem:[%s3933_s0 + $0x58] sm:$0xff]  ;;  %v3442_v1 = vld [vmem:[%s3933_s0 + $0x70] sm:$0xff] }
 0x20c   : > { %v804_v16 = vadd.f32 %v761_v40, %v760_v13 }
 0x20d   : > { %835 = vst.msk [vmem:[#allocation4 + $0x10] sm:$0xff] %vm832_vm3, %v818_v48 }
 0x20e   : > { %v779_v25 = vpop.xlane.xlu0 %778 }
 0x20f   : > { %v819_v18 = vadd.f32 %v779_v25, %v723_v41 }
 0x211   : > { %836 = vst.msk [vmem:[#allocation4 + $0x18] sm:$0xff] %vm832_vm3, %v819_v18 }
 0x212   : > { %v785_v54 = vpop.xlane.xlu0 %784 }
 0x213   : > { %v821_v60 = vadd.f32 %v785_v54, %v725_v57 }
 0x215   : > { %838 = vst.msk [vmem:[#allocation4 + $0x28] sm:$0xff] %vm832_vm3, %v821_v60  ;;  %v729_v60 = vld [vmem:[#allocation4 + $0x48] sm:$0xff] }
 0x216   : > { %v791_v22 = vpop.xlane.xlu0 %790 }
 0x217   : > { %v823_v51 = vadd.f32 %v791_v22, %v727_v8 }
 0x219   : > { %840 = vst.msk [vmem:[#allocation4 + $0x38] sm:$0xff] %vm832_vm3, %v823_v51 }
 0x21c   : > { %674 = vperm.xlu0 %2239, %v3427_v61  }
 0x220   : > { %1054 = vperm.xlu0 %2239, %v3272_v17  }
 0x224   : > { %1064 = vperm.xlu0 %2239, %v3303_v50  }
 0x228   : > { %1074 = vperm.xlu0 %2239, %v3337_v42  }
 0x22c   : > { %1094 = vperm.xlu0 %2239, %v3269_v27  }
 0x22d   : > { %772 = vadd.xlane.f32.xlu1 %v3036_v12 }
 0x230   : > { %1104 = vperm.xlu0 %2239, %v3315_v38  }
 0x231   : > { %781 = vadd.xlane.f32.xlu1 %v3150_v0 }
 0x234   : > { %1114 = vperm.xlu0 %2239, %v3353_v26  }
 0x235   : > { %787 = vadd.xlane.f32.xlu1 %v3208_v14 }
 0x238   : > { %683 = vperm.xlu0 %2239, %v3442_v1  }
 0x239   : > { %793 = vadd.xlane.f32.xlu1 %v3034_v11 }
 0x23c   : > { %1084 = vperm.xlu0 %2239, %v3375_v29  }
 0x23d   : > { %799 = vadd.xlane.f32.xlu1 %v798_v23 }
 0x240   : > { %1124 = vperm.xlu0 %2239, %v3396_v6  }
 0x241   : > { %805 = vadd.xlane.f32.xlu1 %v804_v16 }
 0x264   : > { %v1050_v12 = vpop.permute.xlu1 %1049 }
 0x268   : > { %v1090_v0 = vpop.permute.xlu1 %1089 }
 0x26c   : > { %v3448_v14 = vpop.permute.xlu1 %1059 }
 0x270   : > { %v3450_v48 = vpop.permute.xlu1 %1099 }
 0x274   : > { %v3452_v8 = vpop.permute.xlu1 %1069 }
 0x278   : > { %v3454_v63 = vpop.permute.xlu1 %1109 }
 0x27c   : > { %v3456_v41 = vpop.permute.xlu1 %1079 }
 0x280   : > { %v3458_v11 = vpop.permute.xlu1 %1119 }
 0x284   : > { %v681_v23 = vpop.permute.xlu1 %680 }
 0x285   : > { %vm714_vm12 = vcmp.eq.s32.totalorder %v2954_v44, %v681_v23  ;;  %vm715_vm13 = vcmp.eq.s32.totalorder %v2956_v45, %v681_v23 }
 0x286   : > { %v762_v13 = vsel %vm714_vm12, %v3128_v15, 0.0  ;;  %v763_v40 = vsel %vm715_vm13, %v3130_v30, 0.0 }
 0x287   : > { %v807_v16 = vadd.f32 %v763_v40, %v762_v13 }
 0x288   : > { %v687_v25 = vpop.permute.xlu1 %686 }
 0x289   : > { %vm718_vm14 = vcmp.eq.s32.totalorder %v2954_v44, %v687_v25  ;;  %vm719_vm15 = vcmp.eq.s32.totalorder %v2956_v45, %v687_v25 }
 0x28a   : > { %v766_v18 = vsel %vm718_vm14, %v3190_v49, 0.0  ;;  %v767_v57 = vsel %vm719_vm15, %v3192_v28, 0.0  ;;  %vm1334_vm15 = vcmp.ne.s32.totalorder (!%p2101_p8), %v3427_v61, 0  ;;  %v4100_v61 = vld [vmem:[#allocation58_spill] sm:$0xff] (!%p2101_p8) }
 0x28b   : > { %v813_v54 = vadd.f32 %v767_v57, %v766_v18 }
 0x293   : > { %v797_v22 = vpop.xlane.xlu0 %796 }
 0x294   : > { %v825_v51 = vadd.f32 %v797_v22, %v729_v60  ;;  %v1127_v60 = vsub.f32 %v2974_v53, %v1050_v12  ;;  %v1128_v22 = vsub.f32 %v2990_v59, %v1050_v12  ;;  %v1131_v53 = vsub.f32 %v3047_v20, %v3448_v14 }
 0x296   : > { %842 = vst.msk [vmem:[#allocation4 + $0x48] sm:$0xff] %vm832_vm3, %v825_v51  ;;  %v1167_v20 = vmul.f32 1.442695, %v1131_v53 }
 0x29b   : > { %v675_v23 = vpop.permute.xlu0 %674 }
 0x29c   : > { %vm710_vm0 = vcmp.eq.s32.totalorder %v2954_v44, %v675_v23  ;;  %vm711_vm1 = vcmp.eq.s32.totalorder %v2956_v45, %v675_v23  ;;  %v1159_v23 = vmul.f32 1.442695, %v1127_v60 }
 0x29d   : > { %v758_v15 = vsel %vm710_vm0, %v3066_v34, 0.0  ;;  %v759_v30 = vsel %vm711_vm1, %v3068_v37, 0.0  ;;  %v1143_v34 = vsub.f32 %v2970_v52, %v1090_v0  ;;  %v1144_v37 = vsub.f32 %v2986_v58, %v1090_v0 }
 0x29e   : > { %v801_v13 = vadd.f32 %v759_v30, %v758_v15  ;;  %v1132_v58 = vsub.f32 %v3059_v31, %v3448_v14  ;;  %vm1336_vm1 = vcmp.ne.s32.totalorder (!%p2101_p8), %v4100_v61, 0 }
 0x29f   : > { %v1055_v40 = vpop.permute.xlu0 %1054  ;;  %v1193_v30 = vmul.f32 1.442695, %v1144_v37 }
 0x2a0   : > { %v1129_v49 = vsub.f32 %v3012_v3, %v1055_v40  ;;  %v1130_v28 = vsub.f32 %v3024_v5, %v1055_v40  ;;  %802 = vadd.xlane.f32.xlu0 %v801_v13  ;;  %v1161_v3 = vmul.f32 1.442695, %v1128_v22  ;;  %v1191_v5 = vmul.f32 1.442695, %v1143_v34 }
 0x2a1   : > { %v1169_v31 = vmul.f32 1.442695, %v1132_v58  ;;  %v1148_v22 = vsub.f32 %v3064_v33, %v3450_v48 }
 0x2a2   : > { %v1163_v25 = vmul.f32 1.442695, %v1129_v49  ;;  %v1165_v18 = vmul.f32 1.442695, %v1130_v28 }
 0x2a3   : > { %v1065_v57 = vpop.permute.xlu0 %1064  ;;  %v1201_v33 = vmul.f32 1.442695, %v1148_v22 }
 0x2a4   : > { %2273 = vpow2.f32 %v1163_v25  ;;  %808 = vadd.xlane.f32.xlu0 %v807_v16  ;;  %v1133_v15 = vsub.f32 %v3074_v43, %v1065_v57  ;;  %v1134_v16 = vsub.f32 %v3080_v47, %v1065_v57  ;;  %v1147_v47 = vsub.f32 %v3053_v21, %v3450_v48 }
 0x2a5   : > { %2275 = vpow2.f32 %v1165_v18  ;;  %v1136_v48 = vsub.f32 %v3121_v9, %v3452_v8 }
 0x2a6   : > { %2277 = vpow2.f32 %v1159_v23  ;;  %v1171_v0 = vmul.f32 1.442695, %v1133_v15  ;;  %v1173_v49 = vmul.f32 1.442695, %v1134_v16 }
 0x2a7   : > { %v1075_v51 = vpop.permute.xlu0 %1074  ;;  %2279 = vpow2.f32 %v1161_v3 }
 0x2a8   : > { %814 = vadd.xlane.f32.xlu0 %v813_v54  ;;  %2281 = vpow2.f32 %v1191_v5  ;;  %v1137_v14 = vsub.f32 %v3138_v36, %v1075_v51  ;;  %v1138_v57 = vsub.f32 %v3144_v46, %v1075_v51  ;;  %v721_v5 = vld [vmem:[#allocation4 + $0x8] sm:$0xff] }
 0x2a9   : > { %2283 = vpow2.f32 %v1193_v30 }
 0x2aa   : > { %v1179_v37 = vmul.f32 1.442695, %v1137_v14  ;;  %v1181_v3 = vmul.f32 1.442695, %v1138_v57 }
 0x2ab   : > { %v1095_v13 = vpop.permute.xlu0 %1094 }
 0x2ac   : > { %v1145_v59 = vsub.f32 %v3008_v2, %v1095_v13  ;;  %v1146_v52 = vsub.f32 %v3020_v4, %v1095_v13 }
 0x2ae   : > { %v2274_v12 = vpop.eup %2273  ;;  %v1195_v43 = vmul.f32 1.442695, %v1145_v59  ;;  %v1197_v54 = vmul.f32 1.442695, %v1146_v52 }
 0x2af   : > { %v2276_v40 = vpop.eup %2275  ;;  %v1105_v28 = vpop.permute.xlu0 %1104 }
 0x2b0   : > { %2285 = vpow2.f32 %v1195_v43  ;;  %v1149_v2 = vsub.f32 %v3097_v55, %v1105_v28  ;;  %v1150_v4 = vsub.f32 %v3102_v56, %v1105_v28  ;;  %v1226_v25 = vadd.f32 %v2276_v40, %v2274_v12  ;;  %v2278_v34 = vpop.eup %2277  ;;  %v4042_v40 = vld [vmem:[#allocation24_spill] sm:$0xff] }
 0x2b1   : > { %2287 = vpow2.f32 %v1197_v54  ;;  %v1199_v55 = vmul.f32 1.442695, %v1147_v47  ;;  %v1135_v56 = vsub.f32 %v3109_v39, %v3452_v8  ;;  %v2280_v23 = vpop.eup %2279  ;;  %v1177_v54 = vmul.f32 1.442695, %v1136_v48  ;;  %v728_v48 = vld [vmem:[#allocation4 + $0x40] sm:$0xff] }
 0x2b2   : > { %2289 = vpow2.f32 %v1171_v0  ;;  %v1203_v18 = vmul.f32 1.442695, %v1149_v2  ;;  %1227 = vadd.xlane.f32.xlu0 %v1226_v25  ;;  %v1205_v60 = vmul.f32 1.442695, %v1150_v4  ;;  %v3499_v15 = vpop.eup %2281  ;;  %v724_v0 = vld [vmem:[#allocation4 + $0x20] sm:$0xff]  ;;  %v1223_v2 = vadd.f32 %v2280_v23, %v2278_v34 }
 0x2b3   : > { %2291 = vpow2.f32 %v1173_v49  ;;  %v1115_v21 = vpop.permute.xlu0 %1114  ;;  %v2284_v39 = vpop.eup %2283 }
 0x2b4   : > { %2293 = vpow2.f32 %v1167_v20  ;;  %v1153_v36 = vsub.f32 %v3159_v10, %v1115_v21  ;;  %v1154_v46 = vsub.f32 %v3164_v24, %v1115_v21  ;;  %v1175_v10 = vmul.f32 1.442695, %v1135_v56  ;;  %v4045_v21 = vld [vmem:[#allocation30_spill] sm:$0xff] }
 0x2b5   : > { %2295 = vpow2.f32 %v1169_v31  ;;  %v726_v31 = vld [vmem:[#allocation4 + $0x30] sm:$0xff] }
 0x2b6   : > { %2297 = vpow2.f32 %v1203_v18  ;;  %v1211_v13 = vmul.f32 1.442695, %v1153_v36  ;;  %v4043_v18 = vld [vmem:[#allocation25_spill] sm:$0xff] }
 0x2b7   : > { %2299 = vpow2.f32 %v1205_v60  ;;  %v684_v51 = vpop.permute.xlu0 %683  ;;  %v1139_v57 = vsub.f32 %v4043_v18, %v3456_v41 }
 0x2b8   : > { %2301 = vpow2.f32 %v1199_v55  ;;  %vm716_vm2 = vcmp.eq.s32.totalorder %v2954_v44, %v684_v51  ;;  %vm717_vm4 = vcmp.eq.s32.totalorder %v2956_v45, %v684_v51  ;;  %v1151_v44 = vsub.f32 %v3117_v7, %v3454_v63 }
 0x2b9   : > { %v764_v53 = vsel %vm716_vm2, %v3167_v62, 0.0  ;;  %v765_v24 = vsel %vm717_vm4, %v3173_v35, 0.0  ;;  %2303 = vpow2.f32 %v1179_v37  ;;  %v1213_v45 = vmul.f32 1.442695, %v1154_v46  ;;  %v4046_v37 = vld [vmem:[#allocation27_spill] sm:$0xff] }
 0x2ba   : > { %v773_v30 = vpop.xlane.xlu1 %772  ;;  %v2286_v16 = vpop.eup %2285  ;;  %v810_v52 = vadd.f32 %v765_v24, %v764_v53  ;;  %2305 = vpow2.f32 %v1181_v3  ;;  %v1152_v7 = vsub.f32 %v4042_v40, %v3454_v63  ;;  %v1207_v25 = vmul.f32 1.442695, %v1151_v44  ;;  %v4044_v63 = vld [vmem:[#allocation29_spill] sm:$0xff]  ;;  %v4047_v53 = vld [vmem:[#allocation26_spill] sm:$0xff] }
 0x2bb   : > { %v817_v59 = vadd.f32 %v773_v30, %v721_v5  ;;  %v2288_v58 = vpop.eup %2287  ;;  %v1085_v12 = vpop.permute.xlu0 %1084  ;;  %2307 = vpow2.f32 %v1201_v33  ;;  %v1140_v36 = vsub.f32 %v4046_v37, %v3456_v41  ;;  %v1247_v5 = vadd.f32 %v2284_v39, %v3499_v15  ;;  %v4049_v37 = vld [vmem:[#allocation39_spill] sm:$0xff] }
 0x2bc   : > { %v2290_v9 = vpop.eup %2289  ;;  %v1141_v62 = vsub.f32 %v3200_v32, %v1085_v12  ;;  %v1142_v35 = vsub.f32 %v3204_v19, %v1085_v12  ;;  %811 = vadd.xlane.f32.xlu1 %v810_v52  ;;  %v1250_v8 = vadd.f32 %v2288_v58, %v2286_v16  ;;  %2309 = vpow2.f32 %v1175_v10  ;;  %v730_v12 = vld [vmem:[#allocation4 + $0x50] sm:$0xff] }
 0x2bd   : > { %834 = vst.msk [vmem:[#allocation4 + $0x8] sm:$0xff] %vm832_vm3, %v817_v59  ;;  %v2292_v43 = vpop.eup %2291  ;;  %2311 = vpow2.f32 %v1211_v13  ;;  %v1209_v34 = vmul.f32 1.442695, %v1152_v7  ;;  %v1183_v30 = vmul.f32 1.442695, %v1139_v57  ;;  %v1155_v24 = vsub.f32 %v4047_v53, %v3458_v11  ;;  %v4048_v59 = vld [vmem:[#allocation28_spill] sm:$0xff] }
 0x2be   : > { %v782_v20 = vpop.xlane.xlu1 %781  ;;  %v2294_v47 = vpop.eup %2293  ;;  %v1187_v49 = vmul.f32 1.442695, %v1141_v62  ;;  %1251 = vadd.xlane.f32.xlu0 %v1250_v8  ;;  %2313 = vpow2.f32 %v1213_v45  ;;  %v1189_v32 = vmul.f32 1.442695, %v1142_v35  ;;  %v1232_v55 = vadd.f32 %v2292_v43, %v2290_v9  ;;  %v732_v7 = vld [vmem:[#allocation4 + $0x60] sm:$0xff] }
 0x2bf   : > { %v820_v28 = vadd.f32 %v782_v20, %v724_v0  ;;  %v2296_v4 = vpop.eup %2295  ;;  %v1125_v19 = vpop.permute.xlu0 %1124  ;;  %2315 = vpow2.f32 %v1177_v54  ;;  %v1185_v13 = vmul.f32 1.442695, %v1140_v36  ;;  %v1156_v52 = vsub.f32 %v4048_v59, %v3458_v11 }
 0x2c0   : > { %v2298_v14 = vpop.eup %2297  ;;  %v1157_v60 = vsub.f32 %v4044_v63, %v1125_v19  ;;  %v1158_v22 = vsub.f32 %v4045_v21, %v1125_v19  ;;  %1224 = vadd.xlane.f32.xlu1 %v1223_v2  ;;  %2317 = vpow2.f32 %v1187_v49  ;;  %v1229_v44 = vadd.f32 %v2296_v4, %v2294_v47 }
 0x2c1   : > { %837 = vst.msk [vmem:[#allocation4 + $0x20] sm:$0xff] %vm832_vm3, %v820_v28  ;;  %v2300_v56 = vpop.eup %2299  ;;  %2319 = vpow2.f32 %v1189_v32  ;;  %v1215_v9 = vmul.f32 1.442695, %v1155_v24  ;;  %v1217_v8 = vmul.f32 1.442695, %v1156_v52  ;;  %v4050_v36 = vsub.f32 %v4049_v37, %v3272_v17 }
 0x2c2   : > { %v788_v23 = vpop.xlane.xlu1 %787  ;;  %v2302_v3 = vpop.eup %2301  ;;  %v1219_v46 = vmul.f32 1.442695, %v1157_v60  ;;  %1233 = vadd.xlane.f32.xlu0 %v1232_v55  ;;  %v1221_v33 = vmul.f32 1.442695, %v1158_v22  ;;  %2321 = vpow2.f32 %v1207_v25  ;;  %v1256_v41 = vadd.f32 %v2300_v56, %v2298_v14 }
 0x2c3   : > { %v822_v51 = vadd.f32 %v788_v23, %v726_v31  ;;  %v2304_v10 = vpop.eup %2303  ;;  %2323 = vpow2.f32 %v1209_v34  ;;  %v731_v34 = vld [vmem:[#allocation4 + $0x58] sm:$0xff]  ;;  %v1001_v23 = vmul.f32 1.442695, %v4050_v36  ;;  %vm1337_vm4 = vcmp.ne.s32.totalorder (!%p2101_p8), %v3442_v1, 0 }
 0x2c4   : > { %1248 = vadd.xlane.f32.xlu1 %v1247_v5  ;;  %v2306_v16 = vpop.eup %2305  ;;  %2325 = vpow2.f32 %v1219_v46 }
 0x2c5   : > { %839 = vst.msk [vmem:[#allocation4 + $0x30] sm:$0xff] %vm832_vm3, %v822_v51  ;;  %v2308_v39 = vpop.eup %2307  ;;  %2327 = vpow2.f32 %v1221_v33  ;;  %v1238_v62 = vadd.f32 %v2306_v16, %v2304_v10  ;;  %v733_v51 = vld [vmem:[#allocation4 + $0x68] sm:$0xff] }
 0x2c6   : > { %v794_v15 = vpop.xlane.xlu1 %793  ;;  %1257 = vadd.xlane.f32.xlu0 %v1256_v41  ;;  %v2310_v45 = vpop.eup %2309  ;;  %2329 = vpow2.f32 %v1183_v30  ;;  %v1253_v54 = vadd.f32 %v2308_v39, %v2302_v3  ;;  %v4051_v10 = vld [vmem:[#allocation38_spill] sm:$0xff]  ;;  %v4052_v16 = vld [vmem:[#allocation35_spill] sm:$0xff]  ;;  %v4055_v39 = vld [vmem:[#allocation44_spill] sm:$0xff] }
 0x2c7   : > { %v824_v58 = vadd.f32 %v794_v15, %v728_v48  ;;  %v2312_v0 = vpop.eup %2311  ;;  %2331 = vpow2.f32 %v1185_v13  ;;  %v735_v48 = vld [vmem:[#allocation4 + $0x78] sm:$0xff]  ;;  %v992_v30 = vsub.f32 %v4051_v10, %v3269_v27  ;;  %v968_v15 = vld [vmem:[#allocation3 + $0x8] sm:$0xff]  ;;  %v975_v10 = vld [vmem:[#allocation3 + $0x40] sm:$0xff] }
 0x2c8   : > { %1230 = vadd.xlane.f32.xlu1 %v1229_v44  ;;  %v2314_v35 = vpop.eup %2313  ;;  %2333 = vpow2.f32 %v1215_v9  ;;  %v4053_v13 = vld [vmem:[#allocation37_spill] sm:$0xff] }
 0x2c9   : > { %841 = vst.msk [vmem:[#allocation4 + $0x40] sm:$0xff] %vm832_vm3, %v824_v58  ;;  %v2316_v40 = vpop.eup %2315  ;;  %v1262_v47 = vadd.f32 %v2314_v35, %v2312_v0  ;;  %2335 = vpow2.f32 %v1217_v8  ;;  %v1017_v17 = vmul.f32 1.442695, %v992_v30  ;;  %v4054_v59 = vsub.f32 %v4052_v16, %v4053_v13  ;;  %v4058_v0 = vld [vmem:[#allocation36_spill] sm:$0xff]  ;;  %v4060_v8 = vld [vmem:[#allocation45_spill] sm:$0xff] }
 0x2ca   : > { %v800_v11 = vpop.xlane.xlu1 %799  ;;  %1239 = vadd.xlane.f32.xlu0 %v1238_v62  ;;  %v2318_v20 = vpop.eup %2317  ;;  %v1235_v25 = vadd.f32 %v2316_v40, %v2310_v45  ;;  %2337 = vpow2.f32 %v1001_v23  ;;  %v4056_v58 = vsub.f32 %v4055_v39, %v3303_v50  ;;  %v4063_v40 = vld [vmem:[#allocation42_spill] sm:$0xff]  ;;  %v970_v23 = vld [vmem:[#allocation3 + $0x18] sm:$0xff] }
 0x2cb   : > { %v826_v43 = vadd.f32 %v800_v11, %v730_v12  ;;  %v2320_v49 = vpop.eup %2319  ;;  %v999_v52 = vmul.f32 1.442695, %v4054_v59  ;;  %2339 = vpow2.f32 %v1017_v17  ;;  %v4057_v12 = vld [vmem:[#allocation34_spill] sm:$0xff]  ;;  %v4061_v11 = vsub.f32 %v4060_v8, %v3315_v38  ;;  %v734_v38 = vld [vmem:[#allocation4 + $0x70] sm:$0xff]  ;;  %v4083_v8 = vld [vmem:[#allocation53_spill] sm:$0xff] }
 0x2cc   : > { %1254 = vadd.xlane.f32.xlu1 %v1253_v54  ;;  %v2322_v2 = vpop.eup %2321  ;;  %v1244_v31 = vadd.f32 %v2320_v49, %v2318_v20  ;;  %v1005_v44 = vmul.f32 1.442695, %v4056_v58  ;;  %v4059_v27 = vsub.f32 %v4057_v12, %v4058_v0  ;;  %v4062_v54 = vld [vmem:[#allocation40_spill] sm:$0xff]  ;;  %v4065_v20 = vld [vmem:[#allocation49_spill] sm:$0xff] }
 0x2cd   : > { %843 = vst.msk [vmem:[#allocation4 + $0x50] sm:$0xff] %vm832_vm3, %v826_v43  ;;  %v2324_v32 = vpop.eup %2323  ;;  %2341 = vpow2.f32 %v999_v52  ;;  %v1021_v43 = vmul.f32 1.442695, %v4061_v11  ;;  %v4064_v50 = vsub.f32 %v4062_v54, %v4063_v40  ;;  %v4077_v17 = vld [vmem:[#allocation48_spill] sm:$0xff]  ;;  %v4080_v58 = vld [vmem:[#allocation57_spill] sm:$0xff]  ;;  %v972_v40 = vld [vmem:[#allocation3 + $0x28] sm:$0xff] }
 0x2ce   : > { %v806_v28 = vpop.xlane.xlu1 %805  ;;  %1263 = vadd.xlane.f32.xlu0 %v1262_v47  ;;  %v2326_v19 = vpop.eup %2325  ;;  %v1259_v57 = vadd.f32 %v2324_v32, %v2322_v2  ;;  %v1015_v9 = vmul.f32 1.442695, %v4059_v27  ;;  %2343 = vpow2.f32 %v1005_v44  ;;  %v4066_v47 = vsub.f32 %v4065_v20, %v3337_v42  ;;  %v4067_v2 = vld [vmem:[#allocation41_spill] sm:$0xff]  ;;  %v969_v0 = vld [vmem:[#allocation3 + $0x10] sm:$0xff] }
 0x2cf   : > { %v828_v4 = vadd.f32 %v806_v28, %v732_v7  ;;  %v2328_v14 = vpop.eup %2327  ;;  %v1003_v7 = vmul.f32 1.442695, %v4064_v50  ;;  %v978_v52 = vld [vmem:[#allocation3 + $0x58] sm:$0xff]  ;;  %v4081_v44 = vsub.f32 %v4080_v58, %v3396_v6 }
 0x2d0   : > { %1236 = vadd.xlane.f32.xlu1 %v1235_v25  ;;  %v2330_v18 = vpop.eup %2329  ;;  %v1268_v60 = vadd.f32 %v2328_v14, %v2326_v19  ;;  %2345 = vpow2.f32 %v1015_v9  ;;  %v1009_v49 = vmul.f32 1.442695, %v4066_v47  ;;  %v976_v19 = vld [vmem:[#allocation3 + $0x48] sm:$0xff]  ;;  %v977_v47 = vld [vmem:[#allocation3 + $0x50] sm:$0xff] }
 0x2d1   : > { %845 = vst.msk [vmem:[#allocation4 + $0x60] sm:$0xff] %vm832_vm3, %v828_v4  ;;  %v2332_v63 = vpop.eup %2331  ;;  %2347 = vpow2.f32 %v1021_v43  ;;  %v4068_v4 = vld [vmem:[#allocation43_spill] sm:$0xff] }
 0x2d2   : > { %1245 = vadd.xlane.f32.xlu0 %v1244_v31  ;;  %v2334_v21 = vpop.eup %2333  ;;  %v1241_v22 = vadd.f32 %v2332_v63, %v2330_v18  ;;  %2349 = vpow2.f32 %v1003_v7  ;;  %v4069_v25 = vsub.f32 %v4067_v2, %v4068_v4  ;;  %v4070_v14 = vld [vmem:[#allocation51_spill] sm:$0xff]  ;;  %v4085_v4 = vld [vmem:[#allocation54_spill] sm:$0xff] }
 0x2d3   : > { %v2336_v55 = vpop.eup %2335  ;;  %2351 = vpow2.f32 %v1009_v49  ;;  %v4071_v18 = vsub.f32 %v4070_v14, %v3353_v26  ;;  %v4075_v26 = vld [vmem:[#allocation55_spill] sm:$0xff] }
 0x2d4   : > { %1260 = vadd.xlane.f32.xlu1 %v1259_v57  ;;  %v1265_v56 = vadd.f32 %v2336_v55, %v2334_v21  ;;  %v2338_v41 = vpop.eup %2337  ;;  %v1019_v32 = vmul.f32 1.442695, %v4069_v25  ;;  %v4072_v55 = vld [vmem:[#allocation46_spill] sm:$0xff]  ;;  %v4086_v25 = vld [vmem:[#allocation56_spill] sm:$0xff] }
 0x2d5   : > { %v1032_v45 = vmul.f32 %v2338_v41, %v968_v15  ;;  %v2340_v28 = vpop.eup %2339  ;;  %v1025_v57 = vmul.f32 1.442695, %v4071_v18  ;;  %v4078_v41 = vld [vmem:[#allocation50_spill] sm:$0xff] }
 0x2d6   : > { %1269 = vadd.xlane.f32.xlu0 %v1268_v60  ;;  %v967_v60 = vld [vmem:[#allocation3] sm:$0xff]  ;;  %2353 = vpow2.f32 %v1019_v32  ;;  %v4079_v16 = vsub.f32 %v4077_v17, %v4078_v41  ;;  %v4087_v32 = vsub.f32 %v4085_v4, %v4086_v25 }
 0x2d7   : > { %v2342_v31 = vpop.eup %2341  ;;  %2355 = vpow2.f32 %v1025_v57 }
 0x2d8   : > { %1242 = vadd.xlane.f32.xlu1 %v1241_v22  ;;  %v1040_v22 = vmul.f32 %v2340_v28, %v976_v19  ;;  %v2344_v42 = vpop.eup %2343  ;;  %v1023_v13 = vmul.f32 1.442695, %v4079_v16 }
 0x2dc   : > { %1266 = vadd.xlane.f32.xlu1 %v1265_v56  ;;  %v4073_v56 = vld [vmem:[#allocation47_spill] sm:$0xff] }
 0x32d   : > { %v803_v3 = vpop.xlane.xlu0 %802 }
 0x32e   : > { %v827_v46 = vadd.f32 %v803_v3, %v731_v34  ;;  %v4074_v34 = vsub.f32 %v4072_v55, %v4073_v56  ;;  %v974_v56 = vld [vmem:[#allocation3 + $0x38] sm:$0xff] }
 0x330   : > { %844 = vst.msk [vmem:[#allocation4 + $0x58] sm:$0xff] %vm832_vm3, %v827_v46  ;;  %v1007_v37 = vmul.f32 1.442695, %v4074_v34  ;;  %v1031_v46 = vmul.f32 %v2342_v31, %v967_v60  ;;  %v980_v31 = vld [vmem:[#allocation3 + $0x68] sm:$0xff]  ;;  %v971_v60 = vld [vmem:[#allocation3 + $0x20] sm:$0xff] }
 0x331   : > { %v809_v5 = vpop.xlane.xlu0 %808 }
 0x332   : > { %v829_v33 = vadd.f32 %v809_v5, %v733_v51  ;;  %v2346_v51 = vpop.eup %2345  ;;  %v4076_v5 = vsub.f32 %v4075_v26, %v3375_v29  ;;  %2357 = vpow2.f32 %v1007_v37 }
 0x333   : > { %v1039_v39 = vmul.f32 %v2346_v51, %v975_v10 }
 0x334   : > { %846 = vst.msk [vmem:[#allocation4 + $0x68] sm:$0xff] %vm832_vm3, %v829_v33  ;;  %v1013_v33 = vmul.f32 1.442695, %v4076_v5 }
 0x335   : > { %v815_v53 = vpop.xlane.xlu0 %814 }
 0x336   : > { %v831_v24 = vadd.f32 %v815_v53, %v735_v48  ;;  %v1034_v53 = vmul.f32 %v2344_v42, %v970_v23  ;;  %2359 = vpow2.f32 %v1013_v33  ;;  %v982_v33 = vld [vmem:[#allocation3 + $0x78] sm:$0xff] }
 0x337   : > { %2361 = vpow2.f32 %v1023_v13 }
 0x338   : > { %848 = vst.msk [vmem:[#allocation4 + $0x78] sm:$0xff] %vm832_vm3, %v831_v24  ;;  %v2348_v24 = vpop.eup %2347 }
 0x339   : > { %v2350_v29 = vpop.eup %2349  ;;  %v1042_v9 = vmul.f32 %v2348_v24, %v978_v52  ;;  %v973_v24 = vld [vmem:[#allocation3 + $0x30] sm:$0xff] }
 0x33a   : > { %v1033_v7 = vmul.f32 %v2350_v29, %v969_v0  ;;  %v4089_v0 = vld [vmem:[#allocation16_spill] sm:$0xff] (!%p2101_p8) }
 0x33b   : > { %vm1324_vm6 = vcmp.ne.s32.totalorder (!%p2101_p8), %v4089_v0, 0  ;;  %v1375_v0 = vld [vmem:[#allocation4 + $0x20] sm:$0xff] (!%p2101_p8) }
 0x33f   : > { %v1228_v62 = vpop.xlane.xlu0 %1227 }
 0x340   : > { %v1272_v35 = vadd.f32 %v1228_v62, %v1032_v45  ;;  %v1029_v45 = vmul.f32 1.442695, %v4081_v44  ;;  %v2352_v62 = vpop.eup %2351 }
 0x341   : > { %v2354_v6 = vpop.eup %2353  ;;  %v1036_v28 = vmul.f32 %v2352_v62, %v972_v40  ;;  %v4091_v40 = vld [vmem:[#allocation17_spill] sm:$0xff] (!%p2101_p8) }
 0x342   : > { %1288 = vst.msk [vmem:[#allocation3 + $0x8] sm:$0xff] %vm832_vm3, %v1272_v35  ;;  %v4082_v35 = vld [vmem:[#allocation52_spill] sm:$0xff]  ;;  %2363 = vpow2.f32 %v1029_v45  ;;  %v2356_v2 = vpop.eup %2355  ;;  %v1041_v18 = vmul.f32 %v2354_v6, %v977_v47  ;;  %v4092_v6 = vld [vmem:[#allocation18_spill] sm:$0xff] (!%p2101_p8) }
 0x343   : > { %v4084_v11 = vsub.f32 %v4082_v35, %v4083_v8  ;;  %v2358_v57 = vpop.eup %2357  ;;  %vm1327_vm8 = vcmp.ne.s32.totalorder (!%p2101_p8), %v4092_v6, 0 }
 0x344   : > { %v2360_v42 = vpop.eup %2359  ;;  %v1035_v37 = vmul.f32 %v2358_v57, %v971_v60 }
 0x345   : > { %v1011_v43 = vmul.f32 1.442695, %v4084_v11  ;;  %v1038_v51 = vmul.f32 %v2360_v42, %v974_v56  ;;  %v4090_v11 = vld [vmem:[#allocation15_spill] sm:$0xff] (!%p2101_p8) }
 0x346   : > { %vm1325_vm7 = vcmp.ne.s32.totalorder (!%p2101_p8), %v4090_v11, 0 }
 0x347   : > { %2365 = vpow2.f32 %v1011_v43 }
 0x349   : > { %v812_v63 = vpop.xlane.xlu1 %811  ;;  %v1404_v43 = vld [vmem:[#allocation3 + $0x8] sm:$0xff] (!%p2101_p8) }
 0x34a   : > { %v830_v21 = vadd.f32 %v812_v63, %v734_v38  ;;  %v1027_v38 = vmul.f32 1.442695, %v4087_v32  ;;  %v4094_v32 = vld [vmem:[#allocation20_spill] sm:$0xff] (!%p2101_p8) }
 0x34b   : > { %v1252_v36 = vpop.xlane.xlu0 %1251  ;;  %vm1329_vm10 = vcmp.ne.s32.totalorder (!%p2101_p8), %v4094_v32, 0  ;;  %v1395_v32 = vld [vmem:[#allocation2 + $0x40] sm:$0xff] (!%p2101_p8) }
 0x34c   : > { %847 = vst.msk [vmem:[#allocation4 + $0x70] sm:$0xff] %vm832_vm3, %v830_v21  ;;  %v1280_v3 = vadd.f32 %v1252_v36, %v1040_v22  ;;  %v1044_v22 = vmul.f32 %v2356_v2, %v980_v31  ;;  %2367 = vpow2.f32 %v1027_v38  ;;  %v2362_v36 = vpop.eup %2361  ;;  %v4095_v38 = vld [vmem:[#allocation21_spill] sm:$0xff] (!%p2101_p8) }
 0x34d   : > { %v1225_v48 = vpop.xlane.xlu1 %1224  ;;  %v2364_v26 = vpop.eup %2363  ;;  %vm1330_vm11 = vcmp.ne.s32.totalorder (!%p2101_p8), %v4095_v38, 0 }
 0x34e   : > { %1296 = vst.msk [vmem:[#allocation3 + $0x48] sm:$0xff] %vm832_vm3, %v1280_v3  ;;  %v1271_v30 = vadd.f32 %v1225_v48, %v1031_v46  ;;  %v979_v3 = vld [vmem:[#allocation3 + $0x60] sm:$0xff]  ;;  %v1046_v41 = vmul.f32 %v2364_v26, %v982_v33 }
 0x34f   : > { %v1234_v59 = vpop.xlane.xlu0 %1233  ;;  %v1043_v10 = vmul.f32 %v2362_v36, %v979_v3  ;;  %v1387_v26 = vld [vmem:[#allocation2] sm:$0xff] (!%p2101_p8) }
 0x350   : > { %1287 = vst.msk [vmem:[#allocation3] sm:$0xff] %vm832_vm3, %v1271_v30  ;;  %v1274_v15 = vadd.f32 %v1234_v59, %v1034_v53 }
 0x351   : > { %v1249_v12 = vpop.xlane.xlu1 %1248  ;;  %v2366_v30 = vpop.eup %2365 }
 0x352   : > { %1290 = vst.msk [vmem:[#allocation3 + $0x18] sm:$0xff] %vm832_vm3, %v1274_v15  ;;  %v1279_v27 = vadd.f32 %v1249_v12, %v1039_v39  ;;  %v1037_v59 = vmul.f32 %v2366_v30, %v973_v24  ;;  %v981_v39 = vld [vmem:[#allocation3 + $0x70] sm:$0xff]  ;;  %v4088_v12 = vld [vmem:[#allocation14_spill] sm:$0xff] (!%p2101_p8) }
 0x353   : > { %v1258_v54 = vpop.xlane.xlu0 %1257  ;;  %vm1323_vm5 = vcmp.ne.s32.totalorder (!%p2101_p8), %v4088_v12, 0 }
 0x354   : > { %1295 = vst.msk [vmem:[#allocation3 + $0x40] sm:$0xff] %vm832_vm3, %v1279_v27  ;;  %v1282_v50 = vadd.f32 %v1258_v54, %v1042_v9  ;;  %v2628_v27 = vmov (!%p2101_p8), 0   ;;  %v2629_v9 = vmov (!%p2101_p8), 0.0  }
 0x355   : > { %v1231_v20 = vpop.xlane.xlu1 %1230  ;;  %2369 = vset.pattern.permute.xlu1 (!%p2101_p8), %v2628_v27  ;;  %v3601_v62 = vsel (!%p2101_p8), %vm1323_vm5, 1.0, %v2629_v9  ;;  %v3604_v35 = vsel (!%p2101_p8), %vm1324_vm6, 1.0, %v2629_v9  ;;  %2380 = vset.pattern.permute.xlu0 (!%p2101_p8), %v2628_v27  ;;  %v3634_v31 = vsel (!%p2101_p8), %vm1330_vm11, 1.0, %v2629_v9  ;;  %v1412_v42 = vld [vmem:[#allocation3 + $0x48] sm:$0xff] (!%p2101_p8)  ;;  %v3668_v24 = vsel (!%p2101_p8), %vm1336_vm1, 1.0, %v2629_v9 }
 0x356   : > { %1298 = vst.msk [vmem:[#allocation3 + $0x58] sm:$0xff] %vm832_vm3, %v1282_v50  ;;  %v1273_v49 = vadd.f32 %v1231_v20, %v1033_v7  ;;  %v2368_v52 = vpop.eup %2367  ;;  %v2370_v54 = vpack.i.bf16 (!%p2101_p8), %v3604_v35, %v3601_v62  ;;  %v3611_v50 = vsel (!%p2101_p8), %vm1325_vm7, 1.0, %v2629_v9  ;;  %v4093_v20 = vld [vmem:[#allocation19_spill] sm:$0xff] (!%p2101_p8) }
 0x357   : > { %v1240_v19 = vpop.xlane.xlu0 %1239  ;;  %v1045_v58 = vmul.f32 %v2368_v52, %v981_v39  ;;  %v1403_v8 = vld [vmem:[#allocation3] sm:$0xff] (!%p2101_p8)  ;;  %vm1328_vm9 = vcmp.ne.s32.totalorder (!%p2101_p8), %v4093_v20, 0  ;;  %v1372_v39 = vld [vmem:[#allocation4 + $0x8] sm:$0xff] (!%p2101_p8) }
 0x358   : > { %1289 = vst.msk [vmem:[#allocation3 + $0x10] sm:$0xff] %vm832_vm3, %v1273_v49  ;;  %v1276_v14 = vadd.f32 %v1240_v19, %v1036_v28  ;;  %2411 = vlog2.f32 (!%p2101_p8), %v1403_v8  ;;  %2371 = vperm.xlu1 (!%p2101_p8), %2369, %v2370_v54   ;;  %v3621_v28 = vsel (!%p2101_p8), %vm1327_vm8, 1.0, %v2629_v9  ;;  %v3624_v2 = vsel (!%p2101_p8), %vm1328_vm9, 1.0, %v2629_v9  ;;  %v1376_v54 = vld [vmem:[#allocation4 + $0x28] sm:$0xff] (!%p2101_p8) }
 0x359   : > { %v1255_v63 = vpop.xlane.xlu1 %1254  ;;  %2413 = vlog2.f32 (!%p2101_p8), %v1404_v43  ;;  %v2381_v25 = vpack.i.bf16 (!%p2101_p8), %v3624_v2, %v3621_v28  ;;  %v3631_v19 = vsel (!%p2101_p8), %vm1329_vm10, 1.0, %v2629_v9 }
 0x35a   : > { %1292 = vst.msk [vmem:[#allocation3 + $0x28] sm:$0xff] %vm832_vm3, %v1276_v14  ;;  %v1281_v21 = vadd.f32 %v1255_v63, %v1041_v18  ;;  %v4096_v14 = vld [vmem:[#allocation22_spill] sm:$0xff] (!%p2101_p8)  ;;  %v4097_v18 = vld [vmem:[#allocation31_spill] sm:$0xff] (!%p2101_p8)  ;;  %v4098_v63 = vld [vmem:[#allocation32_spill] sm:$0xff] (!%p2101_p8) }
 0x35b   : > { %v1264_v55 = vpop.xlane.xlu0 %1263  ;;  %vm1331_vm12 = vcmp.ne.s32.totalorder (!%p2101_p8), %v4096_v14, 0  ;;  %vm1332_vm13 = vcmp.ne.s32.totalorder (!%p2101_p8), %v4097_v18, 0  ;;  %v1411_v57 = vld [vmem:[#allocation3 + $0x40] sm:$0xff] (!%p2101_p8)  ;;  %2382 = vperm.xlu0 (!%p2101_p8), %2380, %v2381_v25   ;;  %vm1333_vm14 = vcmp.ne.s32.totalorder (!%p2101_p8), %v4098_v63, 0  ;;  %v1389_v63 = vld [vmem:[#allocation2 + $0x10] sm:$0xff] (!%p2101_p8) }
 0x35c   : > { %1297 = vst.msk [vmem:[#allocation3 + $0x50] sm:$0xff] %vm832_vm3, %v1281_v21  ;;  %v1284_v34 = vadd.f32 %v1264_v55, %v1044_v22  ;;  %v2386_v21 = vpack.i.bf16 (!%p2101_p8), %v3634_v31, %v3631_v19  ;;  %v3643_v22 = vsel (!%p2101_p8), %vm1333_vm14, 1.0, %v2629_v9  ;;  %v3646_v55 = vsel (!%p2101_p8), %vm1331_vm12, 1.0, %v2629_v9 }
 0x35d   : > { %v1237_v23 = vpop.xlane.xlu1 %1236  ;;  %v3649_v56 = vsel (!%p2101_p8), %vm1332_vm13, 1.0, %v2629_v9  ;;  %v1414_v3 = vld [vmem:[#allocation3 + $0x58] sm:$0xff] (!%p2101_p8) }
 0x35e   : > { %1300 = vst.msk [vmem:[#allocation3 + $0x68] sm:$0xff] %vm832_vm3, %v1284_v34  ;;  %v1275_v46 = vadd.f32 %v1237_v23, %v1035_v37  ;;  %v3652_v34 = vsel (!%p2101_p8), %vm1334_vm15, 1.0, %v2629_v9  ;;  %v1406_v37 = vld [vmem:[#allocation3 + $0x18] sm:$0xff] (!%p2101_p8)  ;;  %vm1726_vm15 = vcmask (!%p2101_p8), 64512  }
 0x35f   : > { %v1246_v5 = vpop.xlane.xlu0 %1245  ;;  %v1405_v60 = vld [vmem:[#allocation3 + $0x10] sm:$0xff] (!%p2101_p8)  ;;  %v2396_v36 = vpack.i.bf16 (!%p2101_p8), %v3652_v34, %v3643_v22  ;;  %v4099_v23 = vld [vmem:[#allocation33_spill] sm:$0xff] (!%p2101_p8) }
 0x360   : > { %1291 = vst.msk [vmem:[#allocation3 + $0x20] sm:$0xff] %vm832_vm3, %v1275_v46  ;;  %v1278_v48 = vadd.f32 %v1246_v5, %v1038_v51  ;;  %vm1335_vm0 = vcmp.ne.s32.totalorder (!%p2101_p8), %v4099_v23, 0  ;;  %v2391_v5 = vpack.i.bf16 (!%p2101_p8), %v3649_v56, %v3646_v55 }
 0x361   : > { %v1261_v53 = vpop.xlane.xlu1 %1260  ;;  %v1408_v4 = vld [vmem:[#allocation3 + $0x28] sm:$0xff] (!%p2101_p8)  ;;  %2397 = vperm.xlu0 (!%p2101_p8), %2380, %v2396_v36  }
 0x362   : > { %1294 = vst.msk [vmem:[#allocation3 + $0x38] sm:$0xff] %vm832_vm3, %v1278_v48  ;;  %v1283_v17 = vadd.f32 %v1261_v53, %v1043_v10  ;;  %v2412_v51 = vpop.eup (!%p2101_p8), %2411  ;;  %v1388_v10 = vld [vmem:[#allocation2 + $0x8] sm:$0xff] (!%p2101_p8)  ;;  %v3663_v53 = vsel (!%p2101_p8), %vm1335_vm0, 1.0, %v2629_v9 }
 0x363   : > { %v1270_v16 = vpop.xlane.xlu0 %1269  ;;  %v2414_v48 = vpop.eup (!%p2101_p8), %2413  ;;  %v1420_v30 = vmul.f32 (!%p2101_p8), 0.6931472, %v2412_v51  ;;  %v2401_v8 = vpack.i.bf16 (!%p2101_p8), %v3668_v24, %v3663_v53  ;;  %v1396_v36 = vld [vmem:[#allocation2 + $0x48] sm:$0xff] (!%p2101_p8) }
 0x364   : > { %1299 = vst.msk [vmem:[#allocation3 + $0x60] sm:$0xff] %vm832_vm3, %v1283_v17  ;;  %v1286_v13 = vadd.f32 %v1270_v16, %v1046_v41  ;;  %v1371_v16 = vld [vmem:[#allocation4] sm:$0xff] (!%p2101_p8) }
 0x365   : > { %v1243_v15 = vpop.xlane.xlu1 %1242  ;;  %v1416_v33 = vld [vmem:[#allocation3 + $0x68] sm:$0xff] (!%p2101_p8) }
 0x366   : > { %1302 = vst.msk [vmem:[#allocation3 + $0x78] sm:$0xff] %vm832_vm3, %v1286_v13  ;;  %v1277_v29 = vadd.f32 %v1243_v15, %v1037_v59  ;;  %1322 = sbr.rel (%p2101_p8) target bundleno = 1087 (0x43f), region = 44  ;;  %v1422_v13 = vmul.f32 (!%p2101_p8), 0.6931472, %v2414_v48  ;;  %v1391_v59 = vld [vmem:[#allocation2 + $0x20] sm:$0xff] (!%p2101_p8)  ;;  %v1380_v48 = vld [vmem:[#allocation4 + $0x48] sm:$0xff] (!%p2101_p8) }
 0x367   : > { %v1407_v47 = vld [vmem:[#allocation3 + $0x20] sm:$0xff] (!%p2101_p8) }
 0x368   : > { %1293 = vst.msk [vmem:[#allocation3 + $0x30] sm:$0xff] %vm832_vm3, %v1277_v29  ;;  %2415 = vlog2.f32 (!%p2101_p8), %v1407_v47  ;;  %v1451_v29 = vadd.f32 (!%p2101_p8), %v1420_v30, %v1387_v26  ;;  %v1452_v12 = vadd.f32 (!%p2101_p8), %v1422_v13, %v1388_v10  ;;  %v1390_v26 = vld [vmem:[#allocation2 + $0x18] sm:$0xff] (!%p2101_p8) }
 0x369   : > { %v1267_v44 = vpop.xlane.xlu1 %1266  ;;  %2417 = vlog2.f32 (!%p2101_p8), %v1408_v4  ;;  %v1410_v17 = vld [vmem:[#allocation3 + $0x38] sm:$0xff] (!%p2101_p8) }
 0x36a   : > { %v1285_v45 = vadd.f32 %v1267_v44, %v1045_v58  ;;  %2419 = vlog2.f32 (!%p2101_p8), %v1411_v57  ;;  %v1392_v58 = vld [vmem:[#allocation2 + $0x28] sm:$0xff] (!%p2101_p8)  ;;  %v1467_v43 = vsub.f32 (!%p2101_p8), %v1371_v16, %v1451_v29  ;;  %v1468_v20 = vsub.f32 (!%p2101_p8), %v1372_v39, %v1452_v12  ;;  %v1398_v30 = vld [vmem:[#allocation2 + $0x58] sm:$0xff] (!%p2101_p8) }
 0x36b   : > { %2421 = vlog2.f32 (!%p2101_p8), %v1405_v60  ;;  %v1415_v11 = vld [vmem:[#allocation3 + $0x60] sm:$0xff] (!%p2101_p8)  ;;  %v1374_v13 = vld [vmem:[#allocation4 + $0x18] sm:$0xff] (!%p2101_p8) }
 0x36c   : > { %1301 = vst.msk [vmem:[#allocation3 + $0x70] sm:$0xff] %vm832_vm3, %v1285_v45  ;;  %vm1326_vm3 = vcmp.ne.s32.totalorder (!%p2101_p8), %v4091_v40, 0  ;;  %2423 = vlog2.f32 (!%p2101_p8), %v1412_v42  ;;  %v1413_v45 = vld [vmem:[#allocation3 + $0x50] sm:$0xff] (!%p2101_p8)  ;;  %v1483_v4 = vmul.f32 (!%p2101_p8), 1.442695, %v1467_v43  ;;  %v1379_v42 = vld [vmem:[#allocation4 + $0x40] sm:$0xff] (!%p2101_p8) }
 0x36d   : > { %v3614_v7 = vsel %vm1326_vm3, 1.0, %v2629_v9  ;;  %2425 = vlog2.f32 %v1406_v37  ;;  %v1418_v52 = vld [vmem:[#allocation3 + $0x78] sm:$0xff]  ;;  %v1485_v14 = vmul.f32 1.442695, %v1468_v20 }
 0x36e   : > { %v2375_v49 = vpack.i.bf16 %v3614_v7, %v3611_v50  ;;  %2427 = vlog2.f32 %v1414_v3 }
 0x36f   : > { %v1409_v46 = vld [vmem:[#allocation3 + $0x30] sm:$0xff] }
 0x370   : > { %2376 = vperm.xlu1 %2369, %v2375_v49   ;;  %2429 = vlog2.f32 %v1409_v46  ;;  %v1373_v46 = vld [vmem:[#allocation4 + $0x10] sm:$0xff] }
 0x371   : > { %2431 = vlog2.f32 %v1416_v33 }
 0x372   : > { %v2416_v41 = vpop.eup %2415  ;;  %2433 = vlog2.f32 %v1410_v17 }
 0x373   : > { %v2418_v15 = vpop.eup %2417  ;;  %v1428_v44 = vmul.f32 0.6931472, %v2416_v41  ;;  %2435 = vlog2.f32 %v1418_v52  ;;  %v1417_v6 = vld [vmem:[#allocation3 + $0x70] sm:$0xff] }
 0x374   : > { %2387 = vperm.xlu1 %2369, %v2386_v21   ;;  %v1430_v27 = vmul.f32 0.6931472, %v2418_v15  ;;  %2437 = vlog2.f32 %v1413_v45  ;;  %v2420_v49 = vpop.eup %2419  ;;  %v1393_v52 = vld [vmem:[#allocation2 + $0x30] sm:$0xff]  ;;  %v1400_v45 = vld [vmem:[#allocation2 + $0x68] sm:$0xff] }
 0x375   : > { %v1455_v40 = vadd.f32 %v1428_v44, %v1391_v59  ;;  %2439 = vlog2.f32 %v1415_v11  ;;  %v2422_v38 = vpop.eup %2421  ;;  %v1436_v57 = vmul.f32 0.6931472, %v2420_v49  ;;  %v1377_v11 = vld [vmem:[#allocation4 + $0x30] sm:$0xff]  ;;  %v1384_v49 = vld [vmem:[#allocation4 + $0x68] sm:$0xff] }
 0x376   : > { %v1456_v47 = vadd.f32 %v1430_v27, %v1392_v58  ;;  %2441 = vlog2.f32 %v1417_v6  ;;  %v2424_v60 = vpop.eup %2423  ;;  %v1424_v37 = vmul.f32 0.6931472, %v2422_v38  ;;  %v1382_v58 = vld [vmem:[#allocation4 + $0x58] sm:$0xff] }
 0x377   : > { %v1471_v25 = vsub.f32 %v1375_v0, %v1455_v40  ;;  %2443 = vpow2.f32 %v1483_v4  ;;  %v2426_v23 = vpop.eup %2425  ;;  %v1459_v3 = vadd.f32 %v1436_v57, %v1395_v32  ;;  %v1438_v51 = vmul.f32 0.6931472, %v2424_v60 }
 0x378   : > { %2392 = vperm.xlu1 %2369, %v2391_v5   ;;  %v1472_v18 = vsub.f32 %v1376_v54, %v1456_v47  ;;  %2445 = vpow2.f32 %v1485_v14  ;;  %v2428_v5 = vpop.eup %2427  ;;  %v1453_v33 = vadd.f32 %v1424_v37, %v1389_v63  ;;  %v1426_v10 = vmul.f32 0.6931472, %v2426_v23  ;;  %v1394_v54 = vld [vmem:[#allocation2 + $0x38] sm:$0xff] }
 0x379   : > { %v1491_v21 = vmul.f32 1.442695, %v1471_v25  ;;  %v1475_v41 = vsub.f32 %v1379_v42, %v1459_v3  ;;  %v1460_v16 = vadd.f32 %v1438_v51, %v1396_v36  ;;  %v1442_v59 = vmul.f32 0.6931472, %v2428_v5  ;;  %v1402_v42 = vld [vmem:[#allocation2 + $0x78] sm:$0xff]  ;;  %v1397_v3 = vld [vmem:[#allocation2 + $0x50] sm:$0xff] }
 0x37a   : > { %v1493_v61 = vmul.f32 1.442695, %v1472_v18  ;;  %v2430_v17 = vpop.eup %2429  ;;  %v1469_v39 = vsub.f32 %v1373_v46, %v1453_v33  ;;  %v1454_v29 = vadd.f32 %v1426_v10, %v1390_v26  ;;  %v1378_v18 = vld [vmem:[#allocation4 + $0x38] sm:$0xff] }
 0x37b   : > { %2447 = vpow2.f32 %v1491_v21  ;;  %v2432_v15 = vpop.eup %2431  ;;  %v1432_v44 = vmul.f32 0.6931472, %v2430_v17  ;;  %v1499_v0 = vmul.f32 1.442695, %v1475_v41  ;;  %v1476_v27 = vsub.f32 %v1380_v48, %v1460_v16  ;;  %v1386_v10 = vld [vmem:[#allocation4 + $0x78] sm:$0xff] }
 0x37c   : > { %2402 = vperm.xlu1 %2369, %v2401_v8   ;;  %2449 = vpow2.f32 %v1493_v61  ;;  %v2434_v12 = vpop.eup %2433  ;;  %v1462_v8 = vadd.f32 %v1442_v59, %v1398_v30  ;;  %v1446_v43 = vmul.f32 0.6931472, %v2432_v15  ;;  %v1487_v6 = vmul.f32 1.442695, %v1469_v39  ;;  %v1381_v15 = vld [vmem:[#allocation4 + $0x50] sm:$0xff]  ;;  %v1399_v39 = vld [vmem:[#allocation2 + $0x60] sm:$0xff] }
 0x37d   : > { %v2436_v40 = vpop.eup %2435  ;;  %v1470_v20 = vsub.f32 %v1374_v13, %v1454_v29  ;;  %v1457_v47 = vadd.f32 %v1432_v44, %v1393_v52  ;;  %v1434_v4 = vmul.f32 0.6931472, %v2434_v12  ;;  %2451 = vpow2.f32 %v1499_v0 }
 0x37e   : > { %v2438_v25 = vpop.eup %2437  ;;  %v1501_v32 = vmul.f32 1.442695, %v1476_v27  ;;  %v1478_v38 = vsub.f32 %v1382_v58, %v1462_v8  ;;  %v1464_v14 = vadd.f32 %v1446_v43, %v1400_v45  ;;  %2453 = vpow2.f32 %v1487_v6  ;;  %v1383_v8 = vld [vmem:[#allocation4 + $0x60] sm:$0xff] }
 0x37f   : > { %v2440_v57 = vpop.eup %2439  ;;  %v1489_v63 = vmul.f32 1.442695, %v1470_v20  ;;  %v1473_v60 = vsub.f32 %v1377_v11, %v1457_v47  ;;  %v1458_v21 = vadd.f32 %v1434_v4, %v1394_v54  ;;  %v1450_v61 = vmul.f32 0.6931472, %v2436_v40  ;;  %v1385_v4 = vld [vmem:[#allocation4 + $0x70] sm:$0xff] }
 0x380   : > { %v2442_v37 = vpop.eup %2441  ;;  %2455 = vpow2.f32 %v1501_v32  ;;  %v1505_v36 = vmul.f32 1.442695, %v1478_v38  ;;  %v1480_v23 = vsub.f32 %v1384_v49, %v1464_v14  ;;  %v1440_v5 = vmul.f32 0.6931472, %v2438_v25 }
 0x381   : > { %v2444_v46 = vpop.eup %2443  ;;  %2457 = vpow2.f32 %v1489_v63  ;;  %v1495_v51 = vmul.f32 1.442695, %v1473_v60  ;;  %v1474_v26 = vsub.f32 %v1378_v18, %v1458_v21  ;;  %v1466_v30 = vadd.f32 %v1450_v61, %v1402_v42  ;;  %v4101_v63 = vld [vmem:[#allocation59_spill] sm:$0xff] }
 0x382   : > { %v2446_v33 = vpop.eup %2445  ;;  %v1515_v48 = vmul.f32 %v2444_v46, %v3601_v62  ;;  %v1461_v16 = vadd.f32 %v1440_v5, %v1397_v3  ;;  %v1444_v29 = vmul.f32 0.6931472, %v2440_v57  ;;  %v1509_v58 = vmul.f32 1.442695, %v1480_v23 }
 0x383   : > { %2459 = vpow2.f32 %v1495_v51  ;;  %v1497_v41 = vmul.f32 1.442695, %v1474_v26  ;;  %v1516_v59 = vmul.f32 %v2446_v33, %v3604_v35  ;;  %v1482_v44 = vsub.f32 %v1386_v10, %v1466_v30  ;;  %v1401_v35 = vld [vmem:[#allocation2 + $0x70] sm:$0xff] }
 0x384   : > { %1632 = vperm.xlu0 %2380, %v1515_v48   ;;  %2461 = vpow2.f32 %v1505_v36  ;;  %v1477_v45 = vsub.f32 %v1381_v15, %v1461_v16  ;;  %v1463_v12 = vadd.f32 %v1444_v29, %v1399_v39  ;;  %v1448_v0 = vmul.f32 0.6931472, %v2442_v37 }
 0x385   : > { %v2448_v17 = vpop.eup %2447  ;;  %2463 = vpow2.f32 %v1497_v41  ;;  %vm1338_vm2 = vcmp.ne.s32.totalorder %v4101_v63, 0  ;;  %v2116_v42 = vsel %vm1337_vm4, 1.0, %v2629_v9  ;;  %v4103_v26 = vlaneseq }
 0x386   : > { %v2450_v13 = vpop.eup %2449  ;;  %v1519_v52 = vmul.f32 %v2448_v17, %v3621_v28  ;;  %2465 = vpow2.f32 %v1509_v58  ;;  %v1513_v28 = vmul.f32 1.442695, %v1482_v44  ;;  %v1479_v20 = vsub.f32 %v1383_v8, %v1463_v12 }
 0x387   : > { %v1520_v62 = vmul.f32 %v2450_v13, %v3624_v2  ;;  %v2452_v27 = vpop.eup %2451  ;;  %v1503_v2 = vmul.f32 1.442695, %v1477_v45  ;;  %v1465_v47 = vadd.f32 %v1448_v0, %v1401_v35  ;;  %v2117_v21 = vsel %vm1338_vm2, 1.0, %v2629_v9 }
 0x388   : > { %1652 = vperm.xlu1 %2369, %v1519_v52   ;;  %1637 = vperm.xlu0 %2380, %v1516_v59   ;;  %v2454_v11 = vpop.eup %2453  ;;  %v1523_v54 = vmul.f32 %v2452_v27, %v3646_v55  ;;  %2467 = vpow2.f32 %v1513_v28  ;;  %v1507_v14 = vmul.f32 1.442695, %v1479_v20  ;;  %v3694_v5 = vshrl.u32 %v4103_v26, 7 }
 0x389   : > { %v1517_v40 = vmul.f32 %v2454_v11, %v3611_v50  ;;  %2469 = vpow2.f32 %v1503_v2  ;;  %v1481_v18 = vsub.f32 %v1385_v4, %v1465_v47 }
 0x38a   : > { %v2456_v43 = vpop.eup %2455  ;;  %2471 = vpow2.f32 %v1507_v14  ;;  %v1535_v48 = vadd.s32 24, %v3694_v5  ;;  %v1536_v13 = vadd.s32 32, %v3694_v5  ;;  %v1537_v58 = vadd.s32 40, %v3694_v5 }
 0x38b   : > { %v2458_v6 = vpop.eup %2457  ;;  %v1524_v32 = vmul.f32 %v2456_v43, %v3649_v56  ;;  %v1511_v60 = vmul.f32 1.442695, %v1481_v18  ;;  %v1538_v35 = vadd.s32 48, %v3694_v5 }
 0x38c   : > { %1657 = vperm.xlu1 %2369, %v1520_v62   ;;  %1642 = vperm.xlu0 %2380, %v1517_v40   ;;  %v1518_v49 = vmul.f32 %v2458_v6, %v3614_v7  ;;  %v1539_v6 = vadd.s32 56, %v3694_v5 }
 0x38d   : > { %v2460_v25 = vpop.eup %2459  ;;  %2473 = vpow2.f32 %v1511_v60 }
 0x38e   : > { %v2462_v38 = vpop.eup %2461  ;;  %v1521_v50 = vmul.f32 %v2460_v25, %v3631_v19  ;;  %v1540_v25 = vadd.s32 64, %v3694_v5 }
 0x38f   : > { %v2464_v55 = vpop.eup %2463  ;;  %v1526_v57 = vmul.f32 %v2462_v38, %v3652_v34  ;;  %v2406_v34 = vpack.i.bf16 %v2117_v21, %v2116_v42 }
 0x390   : > { %1672 = vperm.xlu1 %2369, %v1523_v54   ;;  %1647 = vperm.xlu0 %2380, %v1518_v49   ;;  %v2466_v7 = vpop.eup %2465  ;;  %v1522_v56 = vmul.f32 %v2464_v55, %v3634_v31 }
 0x391   : > { %v1528_v19 = vmul.f32 %v2466_v7, %v3668_v24  ;;  %v4102_v24 = vld [vmem:[#allocation23_spill] sm:$0xff] }
 0x392   : > { %v2468_v37 = vpop.eup %2467  ;;  %v3691_v51 = vmul.u32 16, %v4102_v24 }
 0x393   : > { %v2470_v36 = vpop.eup %2469  ;;  %v1530_v1 = vmul.f32 %v2468_v37, %v2117_v21 }
 0x394   : > { %1677 = vperm.xlu1 %2369, %v1524_v32   ;;  %1662 = vperm.xlu0 %2380, %v1521_v50   ;;  %v1525_v23 = vmul.f32 %v2470_v36, %v3643_v22  ;;  %v2472_v61 = vpop.eup %2471  ;;  %v3697_v33 = vadd.s32 16, %v3691_v51  ;;  %v1533_v22 = vadd.s32 8, %v3694_v5  ;;  %vm1549_vm5 = vcmp.ge.s32.totalorder %v3694_v5, %v3691_v51 }
 0x395   : > { %v1527_v31 = vmul.f32 %v2472_v61, %v3663_v53  ;;  %v1534_v53 = vadd.s32 16, %v3694_v5  ;;  %vm1552_vm13 = vcmp.ge.s32.totalorder %v1535_v48, %v3691_v51  ;;  %vm1553_vm1 = vcmp.ge.s32.totalorder %v1536_v13, %v3691_v51 }
 0x396   : > { %vm1566_vm6 = vcmp.lt.s32.totalorder %v3694_v5, %v3697_v33  ;;  %vm1550_vm7 = vcmp.ge.s32.totalorder %v1533_v22, %v3691_v51  ;;  %vm1567_vm3 = vcmp.lt.s32.totalorder %v1533_v22, %v3697_v33  ;;  %vm1569_vm14 = vcmp.lt.s32.totalorder %v1535_v48, %v3697_v33 }
 0x397   : > { %v2474_v3 = vpop.eup %2473  ;;  %vm1582_vm8 = vmand %vm1549_vm5, %vm1566_vm6  ;;  %vm1551_vm10 = vcmp.ge.s32.totalorder %v1534_v53, %v3691_v51  ;;  %vm1568_vm11 = vcmp.lt.s32.totalorder %v1534_v53, %v3697_v33  ;;  %vm1570_vm2 = vcmp.lt.s32.totalorder %v1536_v13, %v3697_v33  ;;  %vm1554_vm5 = vcmp.ge.s32.totalorder %v1537_v58, %v3691_v51 }
 0x398   : > { %1687 = vperm.xlu1 %2369, %v1526_v57   ;;  %1667 = vperm.xlu0 %2380, %v1522_v56   ;;  %v1529_v46 = vmul.f32 %v2474_v3, %v2116_v42  ;;  %vm1583_vm9 = vmand %vm1550_vm7, %vm1567_vm3  ;;  %v3711_v30 = vsel %vm1582_vm8, 1.0, %v2629_v9  ;;  %vm1571_vm6 = vcmp.lt.s32.totalorder %v1537_v58, %v3697_v33  ;;  %vm1555_vm3 = vcmp.ge.s32.totalorder %v1538_v35, %v3691_v51 }
 0x399   : > { %v3714_v17 = vsel %vm1583_vm9, 1.0, %v2629_v9  ;;  %vm1584_vm12 = vmand %vm1551_vm10, %vm1568_vm11  ;;  %vm1572_vm8 = vcmp.lt.s32.totalorder %v1538_v35, %v3697_v33  ;;  %vm1556_vm10 = vcmp.ge.s32.totalorder %v1539_v6, %v3691_v51  ;;  %vm1573_vm11 = vcmp.lt.s32.totalorder %v1539_v6, %v3697_v33 }
 0x39a   : > { %v3722_v39 = vsel %vm1584_vm12, 1.0, %v2629_v9  ;;  %vm1585_vm0 = vmand %vm1552_vm13, %vm1569_vm14  ;;  %vm1557_vm13 = vcmp.ge.s32.totalorder %v1540_v25, %v3691_v51  ;;  %vm1574_vm14 = vcmp.lt.s32.totalorder %v1540_v25, %v3697_v33  ;;  %v1541_v57 = vadd.s32 72, %v3694_v5 }
 0x39b   : > { %v3731_v27 = vsel %vm1585_vm0, 1.0, %v2629_v9  ;;  %vm1586_vm4 = vmand %vm1553_vm1, %vm1570_vm2  ;;  %v1543_v42 = vadd.s32 88, %v3694_v5  ;;  %v1542_v36 = vadd.s32 80, %v3694_v5 }
 0x39c   : > { %1697 = vperm.xlu1 %2369, %v1528_v19   ;;  %2407 = vperm.xlu0 %2380, %v2406_v34   ;;  %v3739_v54 = vsel %vm1586_vm4, 1.0, %v2629_v9  ;;  %vm1587_vm7 = vmand %vm1554_vm5, %vm1571_vm6  ;;  %vm1558_vm1 = vcmp.ge.s32.totalorder %v1541_v57, %v3691_v51  ;;  %vm1575_vm2 = vcmp.lt.s32.totalorder %v1541_v57, %v3697_v33 }
 0x39d   : > { %v3747_v4 = vsel %vm1587_vm7, 1.0, %v2629_v9  ;;  %vm1588_vm9 = vmand %vm1555_vm3, %vm1572_vm8  ;;  %vm1560_vm5 = vcmp.ge.s32.totalorder %v1543_v42, %v3691_v51  ;;  %vm1559_vm6 = vcmp.ge.s32.totalorder %v1542_v36, %v3691_v51  ;;  %vm1576_vm7 = vcmp.lt.s32.totalorder %v1542_v36, %v3697_v33 }
 0x39e   : > { %v3755_v50 = vsel %vm1588_vm9, 1.0, %v2629_v9  ;;  %vm1589_vm12 = vmand %vm1556_vm10, %vm1573_vm11  ;;  %vm1577_vm3 = vcmp.lt.s32.totalorder %v1543_v42, %v3697_v33 }
 0x39f   : > { %v3763_v21 = vsel %vm1589_vm12, 1.0, %v2629_v9  ;;  %vm1590_vm0 = vmand %vm1557_vm13, %vm1574_vm14 }
 0x3a0   : > { %1707 = vperm.xlu1 %2369, %v1530_v1   ;;  %1682 = vperm.xlu0 %2380, %v1525_v23   ;;  %vm1591_vm4 = vmand %vm1558_vm1, %vm1575_vm2 }
 0x3a1   : > { %v3783_v48 = vsel %vm1591_vm4, 1.0, %v2629_v9  ;;  %vm1592_vm8 = vmand %vm1559_vm6, %vm1576_vm7 }
 0x3a2   : > { %vm1593_vm9 = vmand %vm1560_vm5, %vm1577_vm3  ;;  %v3790_v58 = vsel %vm1592_vm8, 1.0, %v2629_v9  ;;  %vm1900_vm3 = vcmask 57344  }
 0x3a4   : > { %1692 = vperm.xlu0 %2380, %v1527_v31   ;;  %v3774_v31 = vsel %vm1590_vm0, 1.0, %v2629_v9 }
 0x3a8   : > { %1702 = vperm.xlu0 %2380, %v1529_v46  }
 0x3d7   : > { %v2372_v10 = vpop.permute.xlu1 %2371 }
 0x3d8   : > { %v2374_v41 = vunpack.i.h.bf16 %v2372_v10  ;;  %v2373_v16 = vunpack.i.l.bf16 %v2372_v10 }
 0x3da   : > { %v1844_v59 = vmul.f32 %v2373_v16, %v3711_v30  ;;  %v1845_v52 = vmul.f32 %v2374_v41, %v3714_v17  ;;  %v2383_v0 = vpop.permute.xlu0 %2382  ;;  %v1544_v16 = vadd.s32 96, %v3694_v5 }
 0x3db   : > { %v2384_v11 = vunpack.i.l.bf16 %v2383_v0  ;;  %v2385_v2 = vunpack.i.h.bf16 %v2383_v0 }
 0x3dc   : > { %v1860_v62 = vsel %vm1726_vm15, %v1844_v59, 0.0  ;;  %v1861_v45 = vsel %vm1726_vm15, %v1845_v52, 0.0  ;;  %vm1561_vm10 = vcmp.ge.s32.totalorder %v1544_v16, %v3691_v51  ;;  %vm1578_vm11 = vcmp.lt.s32.totalorder %v1544_v16, %v3697_v33 }
 0x3dd   : > { %v1862_v8 = vadd.f32 %v1861_v45, %v1860_v62  ;;  %v1848_v20 = vmul.f32 %v2384_v11, %v3739_v54  ;;  %v1849_v18 = vmul.f32 %v2385_v2, %v3747_v4  ;;  %v3794_v62 = vsel %vm1593_vm9, 1.0, %v2629_v9  ;;  %vm1594_vm13 = vmand %vm1561_vm10, %vm1578_vm11 }
 0x3de   : > { %v1545_v45 = vadd.s32 104, %v3694_v5 }
 0x3df   : > { %v1867_v14 = vsel %vm1726_vm15, %v1848_v20, 0.0  ;;  %v1869_v60 = vsel %vm1726_vm15, %v1849_v18, 0.0  ;;  %v1546_v18 = vadd.s32 112, %v3694_v5 }
 0x3e0   : > { %v2398_v19 = vpop.permute.xlu0 %2397  ;;  %vm1562_vm12 = vcmp.ge.s32.totalorder %v1545_v45, %v3691_v51  ;;  %vm1579_vm14 = vcmp.lt.s32.totalorder %v1545_v45, %v3697_v33 }
 0x3e1   : > { %v2399_v13 = vunpack.i.l.bf16 %v2398_v19  ;;  %vm1595_vm0 = vmand %vm1562_vm12, %vm1579_vm14  ;;  %vm1563_vm1 = vcmp.ge.s32.totalorder %v1546_v18, %v3691_v51  ;;  %vm1580_vm2 = vcmp.lt.s32.totalorder %v1546_v18, %v3697_v33 }
 0x3e2   : > { %vm1596_vm6 = vmand %vm1563_vm1, %vm1580_vm2 }
 0x3ef   : > { %v2377_v15 = vpop.permute.xlu1 %2376 }
 0x3f0   : > { %v2378_v29 = vunpack.i.l.bf16 %v2377_v15  ;;  %v2379_v44 = vunpack.i.h.bf16 %v2377_v15 }
 0x3f2   : > { %v1846_v12 = vmul.f32 %v2378_v29, %v3722_v39  ;;  %v1847_v43 = vmul.f32 %v2379_v44, %v3731_v27 }
 0x3f3   : > { %v2388_v49 = vpop.permute.xlu1 %2387 }
 0x3f4   : > { %v1863_v28 = vsel %vm1726_vm15, %v1846_v12, 0.0  ;;  %v1865_v47 = vsel %vm1726_vm15, %v1847_v43, 0.0  ;;  %v2389_v38 = vunpack.i.l.bf16 %v2388_v49  ;;  %v2390_v7 = vunpack.i.h.bf16 %v2388_v49 }
 0x3f5   : > { %v1864_v40 = vadd.f32 %v1863_v28, %v1862_v8  ;;  %v2400_v12 = vunpack.i.h.bf16 %v2398_v19 }
 0x3f6   : > { %v1850_v56 = vmul.f32 %v2389_v38, %v3755_v50  ;;  %v1851_v61 = vmul.f32 %v2390_v7, %v3763_v21 }
 0x3f7   : > { %v1866_v32 = vadd.f32 %v1865_v47, %v1864_v40  ;;  %v2393_v55 = vpop.permute.xlu1 %2392  ;;  %v1855_v20 = vmul.f32 %v2400_v12, %v3794_v62 }
 0x3f8   : > { %v2394_v1 = vunpack.i.l.bf16 %v2393_v55  ;;  %v1871_v23 = vsel %vm1726_vm15, %v1850_v56, 0.0  ;;  %v2395_v24 = vunpack.i.h.bf16 %v2393_v55  ;;  %v1873_v22 = vsel %vm1726_vm15, %v1851_v61, 0.0 }
 0x3f9   : > { %v1868_v63 = vadd.f32 %v1867_v14, %v1866_v32  ;;  %v3813_v14 = vsel %vm1594_vm13, 1.0, %v2629_v9  ;;  %v1881_v42 = vsel %vm1726_vm15, %v1855_v20, 0.0 }
 0x3fa   : > { %v1852_v26 = vmul.f32 %v2394_v1, %v3774_v31  ;;  %v1853_v15 = vmul.f32 %v2395_v24, %v3783_v48 }
 0x3fb   : > { %v3766_v37 = vpop.permute.xlu1 %2402  ;;  %v1870_v34 = vadd.f32 %v1869_v60, %v1868_v63 }
 0x3fc   : > { %v1875_v52 = vsel %vm1726_vm15, %v1852_v26, 0.0  ;;  %v1877_v11 = vsel %vm1726_vm15, %v1853_v15, 0.0  ;;  %v2405_v36 = vunpack.i.h.bf16 %v3766_v37 }
 0x3fd   : > { %v1872_v46 = vadd.f32 %v1871_v23, %v1870_v34 }
 0x3ff   : > { %v1874_v41 = vadd.f32 %v1873_v22, %v1872_v46 }
 0x401   : > { %v1876_v8 = vadd.f32 %v1875_v52, %v1874_v41 }
 0x403   : > { %v1633_v3 = vpop.permute.xlu0 %1632  ;;  %v1878_v47 = vadd.f32 %v1877_v11, %v1876_v8 }
 0x404   : > { %v1710_v44 = vmul.f32 %v3711_v30, %v1633_v3  ;;  %v1854_v30 = vmul.f32 %v2399_v13, %v3790_v58 }
 0x406   : > { %v1727_v43 = vsel %vm1726_vm15, %v1710_v44, 0.0  ;;  %v1879_v32 = vsel %vm1726_vm15, %v1854_v30, 0.0 }
 0x407   : > { %v1653_v53 = vpop.permute.xlu1 %1652  ;;  %v1638_v10 = vpop.permute.xlu0 %1637 }
 0x408   : > { %v1711_v59 = vmul.f32 %v3714_v17, %v1638_v10  ;;  %v1714_v49 = vmul.f32 %v3739_v54, %v1653_v53  ;;  %v1880_v54 = vadd.f32 %v1879_v32, %v1878_v47 }
 0x40a   : > { %v1728_v17 = vsel %vm1726_vm15, %v1711_v59, 0.0  ;;  %v1734_v56 = vsel %vm1726_vm15, %v1714_v49, 0.0 }
 0x40b   : > { %v1658_v29 = vpop.permute.xlu1 %1657  ;;  %v1643_v0 = vpop.permute.xlu0 %1642  ;;  %v1729_v6 = vadd.f32 %v1728_v17, %v1727_v43 }
 0x40c   : > { %v1712_v35 = vmul.f32 %v3722_v39, %v1643_v0  ;;  %v2404_v39 = vunpack.i.l.bf16 %v3766_v37  ;;  %v1715_v55 = vmul.f32 %v3747_v4, %v1658_v29 }
 0x40e   : > { %v1730_v40 = vsel %vm1726_vm15, %v1712_v35, 0.0  ;;  %v1856_v34 = vmul.f32 %v2404_v39, %v3813_v14  ;;  %v1736_v1 = vsel %vm1726_vm15, %v1715_v55, 0.0 }
 0x40f   : > { %v1673_v28 = vpop.permute.xlu1 %1672  ;;  %v1648_v2 = vpop.permute.xlu0 %1647  ;;  %v1731_v38 = vadd.f32 %v1730_v40, %v1729_v6 }
 0x410   : > { %v1713_v25 = vmul.f32 %v3731_v27, %v1648_v2  ;;  %v1547_v27 = vadd.s32 120, %v3694_v5  ;;  %v2131_v5 = vsel %vm1595_vm0, 1.0, %v2629_v9  ;;  %v1718_v3 = vmul.f32 %v3774_v31, %v1673_v28 }
 0x411   : > { %v1883_v26 = vsel %vm1726_vm15, %v1856_v34, 0.0  ;;  %v1857_v53 = vmul.f32 %v2405_v36, %v2131_v5 }
 0x412   : > { %v1732_v57 = vsel %vm1726_vm15, %v1713_v25, 0.0  ;;  %vm1564_vm4 = vcmp.ge.s32.totalorder %v1547_v27, %v3691_v51  ;;  %vm1581_vm5 = vcmp.lt.s32.totalorder %v1547_v27, %v3697_v33  ;;  %v2132_v33 = vsel %vm1596_vm6, 1.0, %v2629_v9 }
 0x413   : > { %v1678_v63 = vpop.permute.xlu1 %1677  ;;  %v1733_v7 = vadd.f32 %v1732_v57, %v1731_v38  ;;  %v1663_v60 = vpop.permute.xlu0 %1662  ;;  %vm1597_vm7 = vmand %vm1564_vm4, %vm1581_vm5  ;;  %v1742_v31 = vsel %vm1726_vm15, %v1718_v3, 0.0  ;;  %v1885_v29 = vsel %vm1726_vm15, %v1857_v53, 0.0 }
 0x414   : > { %v1716_v19 = vmul.f32 %v3755_v50, %v1663_v60  ;;  %v1882_v50 = vadd.f32 %v1881_v42, %v1880_v54  ;;  %v1719_v13 = vmul.f32 %v3783_v48, %v1678_v63  ;;  %v2133_v15 = vsel %vm1597_vm7, 1.0, %v2629_v9 }
 0x415   : > { %v1735_v4 = vadd.f32 %v1734_v56, %v1733_v7 }
 0x416   : > { %v1738_v46 = vsel %vm1726_vm15, %v1716_v19, 0.0  ;;  %v1884_v16 = vadd.f32 %v1883_v26, %v1882_v50  ;;  %v1744_v17 = vsel %vm1726_vm15, %v1719_v13, 0.0 }
 0x417   : > { %v1737_v23 = vadd.f32 %v1736_v1, %v1735_v4  ;;  %v1668_v61 = vpop.permute.xlu0 %1667  ;;  %v1688_v37 = vpop.permute.xlu1 %1687 }
 0x418   : > { %v1717_v24 = vmul.f32 %v3763_v21, %v1668_v61  ;;  %v1886_v8 = vadd.f32 %v1885_v29, %v1884_v16  ;;  %v1721_v35 = vmul.f32 %v3794_v62, %v1688_v37 }
 0x419   : > { %v1739_v22 = vadd.f32 %v1738_v46, %v1737_v23 }
 0x41a   : > { %v1740_v10 = vsel %vm1726_vm15, %v1717_v24, 0.0  ;;  %v1748_v20 = vsel %vm1726_vm15, %v1721_v35, 0.0 }
 0x41b   : > { %v1741_v41 = vadd.f32 %v1740_v10, %v1739_v22  ;;  %v2408_v51 = vpop.permute.xlu0 %2407  ;;  %v1698_v12 = vpop.permute.xlu1 %1697 }
 0x41c   : > { %v2410_v59 = vunpack.i.h.bf16 %v2408_v51  ;;  %v2409_v21 = vunpack.i.l.bf16 %v2408_v51  ;;  %v1723_v47 = vmul.f32 %v2131_v5, %v1698_v12 }
 0x41d   : > { %v1743_v52 = vadd.f32 %v1742_v31, %v1741_v41 }
 0x41e   : > { %v1859_v44 = vmul.f32 %v2410_v59, %v2133_v15  ;;  %v1858_v45 = vmul.f32 %v2409_v21, %v2132_v33  ;;  %v1752_v55 = vsel %vm1726_vm15, %v1723_v47, 0.0 }
 0x41f   : > { %v1683_v0 = vpop.permute.xlu0 %1682  ;;  %v1745_v30 = vadd.f32 %v1744_v17, %v1743_v52  ;;  %v1708_v49 = vpop.permute.xlu1 %1707 }
 0x420   : > { %v1720_v11 = vmul.f32 %v3790_v58, %v1683_v0  ;;  %v1887_v48 = vsel %vm1726_vm15, %v1858_v45, 0.0  ;;  %v1889_v43 = vsel %vm1726_vm15, %v1859_v44, 0.0  ;;  %v1725_v57 = vmul.f32 %v2133_v15, %v1708_v49 }
 0x421   : > { %v1888_v28 = vadd.f32 %v1887_v48, %v1886_v8 }
 0x422   : > { %v1746_v9 = vsel %vm1726_vm15, %v1720_v11, 0.0 }
 0x423   : > { %v1747_v40 = vadd.f32 %v1746_v9, %v1745_v30  ;;  %v1693_v6 = vpop.permute.xlu0 %1692  ;;  %v1890_v2 = vadd.f32 %v1889_v43, %v1888_v28 }
 0x424   : > { %v1722_v39 = vmul.f32 %v3813_v14, %v1693_v6  ;;  %v1756_v14 = vsel %vm1726_vm15, %v1725_v57, 0.0 }
 0x425   : > { %v1749_v62 = vadd.f32 %v1748_v20, %v1747_v40  ;;  %v1891_v25 = vrot.slane %v1890_v2, 4 }
 0x426   : > { %v1750_v58 = vsel %vm1726_vm15, %v1722_v39, 0.0 }
 0x427   : > { %v1751_v32 = vadd.f32 %v1750_v58, %v1749_v62  ;;  %v1703_v38 = vpop.permute.xlu0 %1702  ;;  %v1892_v18 = vadd.f32 %v1891_v25, %v1890_v2 }
 0x428   : > { %v1724_v63 = vmul.f32 %v2132_v33, %v1703_v38 }
 0x429   : > { %v1753_v7 = vadd.f32 %v1752_v55, %v1751_v32  ;;  %v1893_v60 = vrot.slane %v1892_v18, 2 }
 0x42a   : > { %v1754_v27 = vsel %vm1726_vm15, %v1724_v63, 0.0 }
 0x42b   : > { %v1755_v54 = vadd.f32 %v1754_v27, %v1753_v7  ;;  %v1894_v56 = vadd.f32 %v1893_v60, %v1892_v18 }
 0x42d   : > { %v1757_v42 = vadd.f32 %v1756_v14, %v1755_v54  ;;  %v1895_v19 = vrot.slane %v1894_v56, 1 }
 0x42f   : > { %v1758_v34 = vrot.slane %v1757_v42, 4  ;;  %v1896_v4 = vadd.f32 %v1895_v19, %v1894_v56 }
 0x431   : > { %v1759_v36 = vadd.f32 %v1758_v34, %v1757_v42  ;;  %2475 = vrcp.f32 %v1896_v4 }
 0x433   : > { %v1760_v1 = vrot.slane %v1759_v36, 2 }
 0x435   : > { %v1761_v5 = vadd.f32 %v1760_v1, %v1759_v36 }
 0x437   : > { %v1762_v23 = vrot.slane %v1761_v5, 1 }
 0x439   : > { %v1763_v61 = vadd.f32 %v1762_v23, %v1761_v5 }
 0x43b   : > { %v2476_v50 = vpop.eup %2475 }
 0x43c   : > { %v1899_v3 = vmul.f32 %v2476_v50, %v1763_v61 }
 0x43e   : > { %1901 = vst.msk [vmem:[#allocation9] sm:$0x1] %vm1900_vm3, %v1899_v3 }
 0x43f PF: > { %s3859_s14 = scalar_lea.hbm %s3936_s3, %s2100_s26  ;;  %s1919_s21 = sshll.u32 %s2787_s13, 4  ;;  %s3862_s21 = int_to_ptr.vmem [resolvable:$true] %s1919_s21 }
 0x440   : > { %s1903_s9 = scalar_lea.sflag [#allocation7], %s2776_s25  ;;  %s2507_s10 = scalar_lea.vmem %s3862_s21, 1024 }
 0x441   : > { %p2508_p9 = scmp.ne.s32.totalorder %s3862_s21, %s2507_s10  ;;  %p4104_p0 = scmp.ne.s32.totalorder %s3993_s29, 0 }
 0x442   : > { %s2630_s18 = smov [#allocation8]  }
 0x443   : > { %p2509_p5 = pnand %p2508_p9, %p4104_p0  ;;  %s2511_s12 = sshll.u32 %s2630_s18, 4  ;;  %s2512_s12 = int_to_ptr.vmem [resolvable:$false] %s2511_s12 }
 0x444   : > { %s2513_s6 = scalar_lea.vmem %s2512_s12, 2048  ;;  %p2514_p1 = scmp.lt.s32.totalorder %s3862_s21, %s2512_s12 }
 0x445   : > { %p2510_p13 = pneg %p2509_p5  ;;  %p2515_p3 = scmp.lt.s32.totalorder %s2513_s6, %s2507_s10 }
 0x447   : > { %p2516_p4 = por %p2515_p3, %p2514_p1 }
 0x449   : > { %p2517_p7 = pnand %p2516_p4, %p2510_p13 }
 0x44b   : > { %2520 = shalt.err (!%p2517_p7)
}
 0x44c   : > { %s2521_s13 = scalar_lea.hbm %s3859_s14, 1024  ;;  %s2525_s24 = scalar_lea.hbm %s3936_s3, 2048 }
 0x44d   : > { %p2522_p10 = scmp.ne.s32.totalorder %s3859_s14, %s2521_s13  ;;  %p2526_p2 = scmp.lt.u32.totalorder %s3859_s14, %s3936_s3 }
 0x44e   : > { %p2527_p6 = scmp.lt.u32.totalorder %s2525_s24, %s2521_s13  ;;  %p2529_p9 = scmp.lt.u32.totalorder %s2521_s13, %s3859_s14 }
 0x44f   : > { %p2523_p11 = pnand %p2522_p10, %p4104_p0 }
 0x450   : > { %p2528_p8 = por %p2527_p6, %p2526_p2 }
 0x451   : > { %p2524_p12 = pneg %p2523_p11 }
 0x452   : > { %p2530_p5 = por %p2529_p9, %p2528_p8 }
 0x454   : > { %p2531_p13 = pnand %p2530_p5, %p2524_p12 }
 0x456   : > { %2534 = shalt.err (!%p2531_p13)
}
 0x457   : > { %s2631_s11 = smov 256   ;;  %s2632_s28 = smov 512  }
 0x458   : > { %s2633_s10 = smov 16   ;;  %s2634_s18 = smov [#allocation9]  }
 0x459   : > { %2161 = dma.vmem_to_hbm [thread:$0]  (%p4104_p0), %s3862_s21, 1024, %s3859_s14, %s1903_s9, %s2631_s11, %s2632_s28, %s2633_s10  }
 0x45a   : > { %s1935_s12 = sshll.u32 %s2634_s18, 4  ;;  %p4105_p3 = scmp.ne.s32.totalorder %s3991_s27, 0  ;;  %s1936_s12 = int_to_ptr.vmem [resolvable:$true] %s1935_s12 }
 0x45b   : > { %s2535_s6 = scalar_lea.vmem %s1936_s12, 16  ;;  %s2541_s13 = scalar_lea.vmem %s1936_s12, 32 }
 0x45c   : > { %p2536_p1 = scmp.ne.s32.totalorder %s1936_s12, %s2535_s6  ;;  %p2542_p10 = scmp.lt.s32.totalorder %s1936_s12, %s1936_s12 }
 0x45d   : > { %p2543_p11 = scmp.lt.s32.totalorder %s2541_s13, %s2535_s6 }
 0x45e   : > { %p2537_p4 = pnand %p2536_p1, %p4105_p3 }
 0x45f   : > { %p2544_p12 = por %p2543_p11, %p2542_p10 }
 0x460   : > { %p2538_p7 = pneg %p2537_p4 }
 0x462   : > { %p2545_p2 = pnand %p2544_p12, %p2538_p7 }
 0x464   : > { %2548 = shalt.err (!%p2545_p2)
}
 0x465   : > { %s2549_s29 = scalar_lea.hbm %s3937_s4, 16 }
 0x466   : > { %p2550_p0 = scmp.ne.s32.totalorder %s3937_s4, %s2549_s29  ;;  %p2555_p9 = scmp.lt.u32.totalorder %s2549_s29, %s3937_s4 }
 0x468   : > { %p2551_p6 = pnand %p2550_p0, %p4105_p3 }
 0x46a   : > { %p2552_p8 = pneg %p2551_p6 }
 0x46c   : > { %p2557_p5 = pnand %p2555_p9, %p2552_p8 }
 0x46e   : > { %2560 = shalt.err (!%p2557_p5)
}
 0x46f   : > { %2163 = dma.vmem_to_hbm [thread:$0]  (%p4105_p3), %s1936_s12, 16, %s3937_s4, [#allocation10]  }
 0x470   : > { %2590 = dma.done.wait (%p4105_p3), [#allocation10], 16  }
 0x471   : > { %2592 = vsyncadd (%p4105_p3), [#allocation10], 4294967280 }
 0x472 PF: > { %s1951_s8 = sand.u32 1, %s2599_s15   ;;  %p4106_p13 = scmp.ne.s32.totalorder %s3994_s5, 0 }
 0x473   : > { %p4107_p1 = scmp.ge.s32.totalorder %s2619_s20, 2  ;;  %s1952_s11 = scalar_lea.sflag [#allocation7], %s1951_s8 }
 0x475   : > { %p2172_p4 = pnand %p4107_p1, %p4106_p13 }
 0x477   : > { %2594 = dma.done.wait (!%p2172_p4), %s1952_s11, 1024  }
 0x478   : > { %2596 = vsyncadd (!%p2172_p4), %s1952_s11, 4294966272  ;;  %s22_s20 = sadd.s32 1, %s2619_s20   ;;  %s4108_s15 = smov %s2603_s16 }
 0x479   : > { %p19_p7 = scmp.ge.s32.totalorder %s22_s20, 4   ;;  %s4109_s16 = smov %s2607_s17 }
 0x47a   : > { %s4110_s17 = smov %s2722_s30  ;;  %s4111_s18 = smov %s2615_s19 }
 0x47b   : > { %s4112_s19 = smov %s4114_s23  ;;  %21 = sbr.rel (!%p19_p7) target bundleno = 7 (0x7), region = 101 }
 0x482   :  { %1957 = vsyncpa [#allocation6], 1 }
 0x483   :  { %1959 = vsyncpa [#allocation6 + $0x1], 1 }
 0x484   :  { %1960 = vsyncpa [#allocation7], 1 }
 0x485   :  { %1962 = vsyncpa [#allocation7 + $0x1], 1 }
 0x486   :  { %1963 = vsyncpa [#allocation10], 1 }

// kernel: tpu_custom_call.1
= control target key start
LH: loop header
LB: loop body
LE: loop exit
PB: predicated region body
PF: predicated region fallthrough
CT: control target
= control target key end

     0   :  { %10 = vsyncpa [#allocation6], 0  ;;  %s3933_s0 = inlined_call_operand.vmem [shape: s32[128,1], index: 0, kind: input, shape index: {}]   ;;  %s3934_s1 = inlined_call_operand.vmem [shape: bf16[128,128], index: 1, kind: input, shape index: {}]   ;;  %s3935_s2 = inlined_call_operand.hbm [shape: bf16[128,512], index: 2, kind: input, shape index: {}]   ;;  %s3936_s3 = inlined_call_operand.hbm [shape: f32[2,16,512], index: 3, kind: output, shape index: {0}]   ;;  %s3937_s4 = inlined_call_operand.hbm [shape: f32[1,8], index: 4, kind: output, shape index: {1}]  }
   0x1   :  { %12 = vsyncpa [#allocation6 + $0x1], 0 }
   0x2   :  { %13 = vsyncpa [#allocation7], 0 }
   0x3   :  { %15 = vsyncpa [#allocation7 + $0x1], 0 }
   0x4   :  { %16 = vsyncpa [#allocation10], 0  ;;  %s2660_s15 = smov 0   ;;  %s2662_s16 = smov 0  }
   0x5   :  { %s2664_s17 = smov 0   ;;  %s2666_s18 = smov 0  }
   0x6   :  { %s2668_s19 = smov 0   ;;  %s2670_s20 = smov 0  }
   0x7 LB: > { %s2059_s21 = sadd.s32 4294967295, %s2619_s20   ;;  %s2060_s22 = sadd.s32 4294967294, %s2619_s20   ;;  %s2619_s20 = sphi %s2670_s20, %s22_s20   ;;  %s2615_s19 = sphi %s2668_s19, %s4112_s19   ;;  %s2611_s18 = sphi %s2666_s18, %s4111_s18   ;;  %s2607_s17 = sphi %s2664_s17, %s4110_s17   ;;  %s2603_s16 = sphi %s2662_s16, %s4109_s16   ;;  %s2599_s15 = sphi %s2660_s15, %s4108_s15  }
   0x8   : > { %s31_s23 = sadd.s32 1, %s2615_s19  ;;  %s93_s24 = sadd.s32 1, %s2607_s17 }
   0x9   : > { %p32_p0 = scmp.ge.s32.totalorder %s31_s23, 2  ;;  %p100_p1 = scmp.ne.s32.totalorder %s2607_s17, %s2603_s16 }
   0xa   : > { %p101_p2 = scmp.eq.s32.totalorder %s2619_s20, 0  ;;  %p106_p3 = scmp.ne.s32.totalorder %s2603_s16, %s2599_s15 }
   0xb   : > { %s4114_s23 = smov (%p32_p0, %s31_s23), 0  ;;  %p107_p5 = scmp.eq.s32.totalorder %s2059_s21, 0 }
   0xc   : > { %p2701_p4 = por %p101_p2, %p100_p1  ;;  %s90_s26 = ssub.s32 %s2615_s19, %s4114_s23 }
   0xd   : > { %p2707_p6 = scmp.eq.s32.totalorder %s2059_s21, 1  ;;  %p91_p7 = scmp.eq.s32.totalorder %s90_s26, 0 }
   0xe   : > { %p2711_p8 = por %p107_p5, %p106_p3  ;;  %p138_p10 = scmp.eq.s32.totalorder %s2060_s22, 1 }
   0xf   : > { %s3991_s27 = scalar_select %p2707_p6, 1, 0 }
  0x10   : > { %p2717_p9 = por %p2707_p6, %p100_p1  ;;  %p2724_p11 = por %p138_p10, %p106_p3 }
  0x11   : > { %s2722_s30 = scalar_select %p91_p7, %s2607_s17, %s93_s24  }
  0x12   : > { %s3993_s29 = scalar_select %p2717_p9, 1, 0 }
  0x13   : > { %s3994_s5 = scalar_select %p2724_p11, 1, 0 }
  0x14   : > { %p2175_p13 = scmp.lt.s32.totalorder %s2619_s20, 2  ;;  %s202_s6 = sand.u32 1, %s2607_s17  }
  0x15   : > { %s2065_s7 = sshll.u32 %s202_s6, 7  ;;  %s2141_s8 = sshll.u32 %s2615_s19, 7 }
  0x16   : > { %s2735_s11 = scalar_lea.hbm %s3935_s2, %s2141_s8  ;;  %s206_s12 = scalar_lea.vmem [#allocation5], %s2065_s7 }
  0x17   : > { %s213_s13 = sshll.u32 %s206_s12, 4  ;;  %p2741_p0 = pnand %p2175_p13, %p2701_p4  ;;  %s2737_s13 = int_to_ptr.vmem [resolvable:$true] %s213_s13 }
  0x18   : > { %s2745_s21 = scalar_lea.sflag [#allocation6], %s202_s6  ;;  %s2477_s22 = scalar_lea.hbm %s2735_s11, 2048 }
  0x19   : > { %p2478_p1 = scmp.ne.s32.totalorder %s2735_s11, %s2477_s22  ;;  %p2479_p2 = pneg %p2741_p0 }
  0x1a   : > { %s2482_s25 = scalar_lea.hbm %s3935_s2, 4096  ;;  %p2483_p4 = scmp.lt.u32.totalorder %s2735_s11, %s3935_s2 }
  0x1b   : > { %p2480_p3 = pnand %p2479_p2, %p2478_p1  ;;  %p2484_p7 = scmp.lt.u32.totalorder %s2482_s25, %s2477_s22 }
  0x1c   : > { %p2486_p13 = scmp.lt.u32.totalorder %s2477_s22, %s2735_s11 }
  0x1d   : > { %p2481_p5 = pneg %p2480_p3  ;;  %p2485_p10 = por %p2484_p7, %p2483_p4 }
  0x1f   : > { %p2487_p12 = por %p2486_p13, %p2485_p10 }
  0x21   : > { %p2488_p11 = pnand %p2487_p12, %p2481_p5 }
  0x23   : > { %2491 = shalt.err (!%p2488_p11)
}
  0x24   : > { %s2492_s6 = scalar_lea.vmem %s2737_s13, 2048  ;;  %s2621_s9 = smov [#allocation5]  }
  0x25   : > { %p2493_p1 = scmp.ne.s32.totalorder %s2737_s13, %s2492_s6  ;;  %s2497_s10 = sshll.u32 %s2621_s9, 4  ;;  %s2498_s10 = int_to_ptr.vmem [resolvable:$false] %s2497_s10 }
  0x26   : > { %s2499_s12 = scalar_lea.vmem %s2498_s10, 4096  ;;  %p2500_p9 = scmp.lt.s32.totalorder %s2737_s13, %s2498_s10 }
  0x27   : > { %p2495_p3 = pnand %p2493_p1, %p2479_p2  ;;  %p2501_p4 = scmp.lt.s32.totalorder %s2499_s12, %s2492_s6 }
  0x29   : > { %p2496_p6 = pneg %p2495_p3  ;;  %p2502_p7 = por %p2501_p4, %p2500_p9 }
  0x2b   : > { %p2503_p10 = pnand %p2502_p7, %p2496_p6 }
  0x2d   : > { %2506 = shalt.err (!%p2503_p10)
}
  0x2e   : > { %s2622_s22 = smov 256   ;;  %s2623_s24 = smov 128  }
  0x2f   : > { %s2624_s26 = smov 8   ;;  %p2068_p11 = scmp.ge.s32.totalorder %s2619_s20, 1 }
  0x30   : > { %2170 = dma.hbm_to_vmem [thread:$0]  (!%p2741_p0), %s2735_s11, 2048, %s2737_s13, %s2745_s21, %s2622_s22, %s2623_s24, %s2624_s26  }
  0x31   : > { %p221_p12 = scmp.lt.s32.totalorder %s2619_s20, 3 }
  0x33   : > { %p222_p2 = pnand %p2068_p11, %p221_p12 }
  0x35   : > { %225 = sbr.rel (%p222_p2) target bundleno = 1138 (0x472), region = 32 }
  0x3c   : > { %s2776_s25 = sand.u32 1, %s2603_s16  }
  0x3d   : > { %s2069_s7 = sshll.u32 %s2776_s25, 7  ;;  %s228_s8 = scalar_lea.sflag [#allocation6], %s2776_s25 }
  0x3e   : > { %s2780_s6 = scalar_lea.vmem [#allocation5], %s2069_s7 }
  0x3f   : > { %2586 = dma.done.wait (%p2711_p8), %s228_s8, 2048  }
  0x40   : > { %2588 = vsyncadd (%p2711_p8), %s228_s8, 4294965248  ;;  %s2070_s11 = sshll.u32 %s2776_s25, 6  ;;  %p2071_p6 = scmp.ne.s32.totalorder %s2611_s18, 0 }
  0x41   : > { %s2787_s13 = scalar_lea.vmem [#allocation8], %s2070_s11  ;;  %vm286_vm0 = vcmask (!%p2071_p6), 7168   ;;  %v2625_v0 = vmov (!%p2071_p6), -inf   ;;  %v2626_v1 = vmov (!%p2071_p6), 0.0  }
  0x42   : > { %285 = sbr.rel (%p2071_p6) target bundleno = 90 (0x5a), region = 40  ;;  %287 = vst.msk [vmem:[#allocation2] sm:$0xff] (!%p2071_p6), %vm286_vm0, %v2625_v0  ;;  %288 = vst.msk [vmem:[#allocation2 + $0x8] sm:$0xff] (!%p2071_p6), %vm286_vm0, %v2625_v0 }
  0x43   : > { %289 = vst.msk [vmem:[#allocation2 + $0x10] sm:$0xff] (!%p2071_p6), %vm286_vm0, %v2625_v0  ;;  %290 = vst.msk [vmem:[#allocation2 + $0x18] sm:$0xff] (!%p2071_p6), %vm286_vm0, %v2625_v0 }
  0x44   : > { %291 = vst.msk [vmem:[#allocation2 + $0x20] sm:$0xff] (!%p2071_p6), %vm286_vm0, %v2625_v0  ;;  %292 = vst.msk [vmem:[#allocation2 + $0x28] sm:$0xff] (!%p2071_p6), %vm286_vm0, %v2625_v0 }
  0x45   : > { %293 = vst.msk [vmem:[#allocation2 + $0x30] sm:$0xff] (!%p2071_p6), %vm286_vm0, %v2625_v0  ;;  %294 = vst.msk [vmem:[#allocation2 + $0x38] sm:$0xff] (!%p2071_p6), %vm286_vm0, %v2625_v0 }
  0x46   : > { %295 = vst.msk [vmem:[#allocation2 + $0x40] sm:$0xff] (!%p2071_p6), %vm286_vm0, %v2625_v0  ;;  %296 = vst.msk [vmem:[#allocation2 + $0x48] sm:$0xff] (!%p2071_p6), %vm286_vm0, %v2625_v0 }
  0x47   : > { %297 = vst.msk [vmem:[#allocation2 + $0x50] sm:$0xff] (!%p2071_p6), %vm286_vm0, %v2625_v0  ;;  %298 = vst.msk [vmem:[#allocation2 + $0x58] sm:$0xff] (!%p2071_p6), %vm286_vm0, %v2625_v0 }
  0x48   : > { %299 = vst.msk [vmem:[#allocation2 + $0x60] sm:$0xff] (!%p2071_p6), %vm286_vm0, %v2625_v0  ;;  %300 = vst.msk [vmem:[#allocation2 + $0x68] sm:$0xff] (!%p2071_p6), %vm286_vm0, %v2625_v0 }
  0x49   : > { %301 = vst.msk [vmem:[#allocation2 + $0x70] sm:$0xff] %vm286_vm0, %v2625_v0  ;;  %302 = vst.msk [vmem:[#allocation2 + $0x78] sm:$0xff] %vm286_vm0, %v2625_v0 }
  0x4a   : > { %303 = vst.msk [vmem:[#allocation3] sm:$0xff] %vm286_vm0, %v2626_v1  ;;  %304 = vst.msk [vmem:[#allocation3 + $0x8] sm:$0xff] %vm286_vm0, %v2626_v1 }
  0x4b   : > { %305 = vst.msk [vmem:[#allocation3 + $0x10] sm:$0xff] %vm286_vm0, %v2626_v1  ;;  %306 = vst.msk [vmem:[#allocation3 + $0x18] sm:$0xff] %vm286_vm0, %v2626_v1 }
  0x4c   : > { %307 = vst.msk [vmem:[#allocation3 + $0x20] sm:$0xff] %vm286_vm0, %v2626_v1  ;;  %308 = vst.msk [vmem:[#allocation3 + $0x28] sm:$0xff] %vm286_vm0, %v2626_v1 }
  0x4d   : > { %309 = vst.msk [vmem:[#allocation3 + $0x30] sm:$0xff] %vm286_vm0, %v2626_v1  ;;  %310 = vst.msk [vmem:[#allocation3 + $0x38] sm:$0xff] %vm286_vm0, %v2626_v1 }
  0x4e   : > { %311 = vst.msk [vmem:[#allocation3 + $0x40] sm:$0xff] %vm286_vm0, %v2626_v1  ;;  %312 = vst.msk [vmem:[#allocation3 + $0x48] sm:$0xff] %vm286_vm0, %v2626_v1 }
  0x4f   : > { %313 = vst.msk [vmem:[#allocation3 + $0x50] sm:$0xff] %vm286_vm0, %v2626_v1  ;;  %314 = vst.msk [vmem:[#allocation3 + $0x58] sm:$0xff] %vm286_vm0, %v2626_v1 }
  0x50   : > { %315 = vst.msk [vmem:[#allocation3 + $0x60] sm:$0xff] %vm286_vm0, %v2626_v1  ;;  %316 = vst.msk [vmem:[#allocation3 + $0x68] sm:$0xff] %vm286_vm0, %v2626_v1 }
  0x51   : > { %317 = vst.msk [vmem:[#allocation3 + $0x70] sm:$0xff] %vm286_vm0, %v2626_v1  ;;  %318 = vst.msk [vmem:[#allocation3 + $0x78] sm:$0xff] %vm286_vm0, %v2626_v1 }
  0x52   : > { %319 = vst.msk [vmem:[#allocation4] sm:$0xff] %vm286_vm0, %v2626_v1  ;;  %320 = vst.msk [vmem:[#allocation4 + $0x8] sm:$0xff] %vm286_vm0, %v2626_v1 }
  0x53   : > { %321 = vst.msk [vmem:[#allocation4 + $0x10] sm:$0xff] %vm286_vm0, %v2626_v1  ;;  %322 = vst.msk [vmem:[#allocation4 + $0x18] sm:$0xff] %vm286_vm0, %v2626_v1 }
  0x54   : > { %323 = vst.msk [vmem:[#allocation4 + $0x20] sm:$0xff] %vm286_vm0, %v2626_v1  ;;  %324 = vst.msk [vmem:[#allocation4 + $0x28] sm:$0xff] %vm286_vm0, %v2626_v1 }
  0x55   : > { %325 = vst.msk [vmem:[#allocation4 + $0x30] sm:$0xff] %vm286_vm0, %v2626_v1  ;;  %326 = vst.msk [vmem:[#allocation4 + $0x38] sm:$0xff] %vm286_vm0, %v2626_v1 }
  0x56   : > { %327 = vst.msk [vmem:[#allocation4 + $0x40] sm:$0xff] %vm286_vm0, %v2626_v1  ;;  %328 = vst.msk [vmem:[#allocation4 + $0x48] sm:$0xff] %vm286_vm0, %v2626_v1 }
  0x57   : > { %329 = vst.msk [vmem:[#allocation4 + $0x50] sm:$0xff] %vm286_vm0, %v2626_v1  ;;  %330 = vst.msk [vmem:[#allocation4 + $0x58] sm:$0xff] %vm286_vm0, %v2626_v1 }
  0x58   : > { %331 = vst.msk [vmem:[#allocation4 + $0x60] sm:$0xff] %vm286_vm0, %v2626_v1  ;;  %332 = vst.msk [vmem:[#allocation4 + $0x68] sm:$0xff] %vm286_vm0, %v2626_v1 }
  0x59   : > { %333 = vst.msk [vmem:[#allocation4 + $0x70] sm:$0xff] %vm286_vm0, %v2626_v1  ;;  %334 = vst.msk [vmem:[#allocation4 + $0x78] sm:$0xff] %vm286_vm0, %v2626_v1 }
  0x5a PF: > { %v2241_v2 = vld [vmem:[%s2780_s6 + $0x4] ss:$8 sps:$4 sm:$0xff]   ;;  %v2243_v3 = vld [vmem:[%s2780_s6] ss:$8 sps:$4 sm:$0xff]   ;;  %v2627_v4 = vmov 0   ;;  %v2863_v17 = vld [vmem:[%s3933_s0 + $0x10] sm:$0xff]  ;;  %v3941_v38 = vlaneseq }
  0x5b   : > { %527 = vmatprep.mubr.bf16.mxu0 %v2627_v4  ;;  %567 = vmatprep.mubr.bf16.mxu1 %v2627_v4  ;;  %v2244_v5 = vld [vmem:[%s2780_s6 + $0x14] ss:$8 sps:$4 sm:$0xff]   ;;  %v2246_v6 = vld [vmem:[%s2780_s6 + $0x10] ss:$8 sps:$4 sm:$0xff]   ;;  %v2247_v7 = vld [vmem:[%s2780_s6 + $0x24] ss:$8 sps:$4 sm:$0xff]  }
  0x5c   : > { %495 = vmatprep.subr.bf16.mxu0 %v2241_v2  ;;  %2143 = vmatprep.subr.bf16.mxu1 %v2241_v2  ;;  %v2249_v8 = vld [vmem:[%s2780_s6 + $0x20] ss:$8 sps:$4 sm:$0xff]   ;;  %v2250_v9 = vld [vmem:[%s2780_s6 + $0x34] ss:$8 sps:$4 sm:$0xff]   ;;  %v2252_v10 = vld [vmem:[%s2780_s6 + $0x30] ss:$8 sps:$4 sm:$0xff]  }
  0x5d   : > { %496 = vmatpush1.bf16.msra.mxu0 %v2243_v3  ;;  %2151 = vmatpush1.bf16.msra.mxu1 %v2243_v3  ;;  %v2253_v11 = vld [vmem:[%s2780_s6 + $0x44] ss:$8 sps:$4 sm:$0xff]   ;;  %v2255_v12 = vld [vmem:[%s2780_s6 + $0x40] ss:$8 sps:$4 sm:$0xff]   ;;  %v2256_v13 = vld [vmem:[%s2780_s6 + $0x54] ss:$8 sps:$4 sm:$0xff]  }
  0x5e   : > { %497 = vmatprep.subr.bf16.mxu0 %v2244_v5  ;;  %2144 = vmatprep.subr.bf16.mxu1 %v2244_v5  ;;  %v2856_v14 = vld [vmem:[%s3933_s0] sm:$0xff]  ;;  %v2258_v15 = vld [vmem:[%s2780_s6 + $0x50] ss:$8 sps:$4 sm:$0xff]   ;;  %3997 = vst [vmem:[#allocation15_spill] sm:$0xff] %v2863_v17  ;;  %v2870_v18 = vld [vmem:[%s3933_s0 + $0x8] sm:$0xff]  ;;  %v2945_v40 = vand.u32 127, %v3941_v38 }
  0x5f   : > { %2239 = vset.pattern.permute.xlu0 %v2627_v4  ;;  %2240 = vset.pattern.permute.xlu1 %v2627_v4  ;;  %3996 = vst [vmem:[#allocation14_spill] sm:$0xff] %v2856_v14  ;;  %v2259_v16 = vld [vmem:[%s2780_s6 + $0x64] ss:$8 sps:$4 sm:$0xff]   ;;  %3998 = vst [vmem:[#allocation16_spill] sm:$0xff] %v2870_v18  ;;  %v2875_v19 = vld [vmem:[%s3933_s0 + $0x18] sm:$0xff]  ;;  %s2100_s26 = sshll.u32 %s2611_s18, 8 }
  0x60   : > { %641 = vperm.xlu0 %2239, %v2856_v14   ;;  %647 = vperm.xlu1 %2240, %v2863_v17   ;;  %3999 = vst [vmem:[#allocation17_spill] sm:$0xff] %v2875_v19  ;;  %v2261_v20 = vld [vmem:[%s2780_s6 + $0x60] ss:$8 sps:$4 sm:$0xff]   ;;  %v2262_v21 = vld [vmem:[%s2780_s6 + $0x74] ss:$8 sps:$4 sm:$0xff]   ;;  %4005 = vst [vmem:[#allocation23_spill] sm:$0xff] %v2945_v40  ;;  %v637_v43 = vstv %s2100_s26 }
  0x61   : > { %498 = vmatpush1.bf16.msra.mxu0 %v2246_v6  ;;  %2152 = vmatpush1.bf16.msra.mxu1 %v2246_v6  ;;  %v2884_v22 = vld [vmem:[%s3933_s0 + $0x20] sm:$0xff]  ;;  %v2889_v23 = vld [vmem:[%s3933_s0 + $0x28] sm:$0xff]  ;;  %v2264_v24 = vld [vmem:[%s2780_s6 + $0x70] ss:$8 sps:$4 sm:$0xff]   ;;  %v635_v42 = vadd.s32 128, %v2945_v40  ;;  %v2954_v44 = vadd.s32 %v637_v43, %v2945_v40  ;;  %p2101_p8 = scmp.ne.s32.totalorder %s2611_s18, 1 }
  0x62   : > { %499 = vmatprep.subr.bf16.mxu0 %v2247_v7  ;;  %2145 = vmatprep.subr.bf16.mxu1 %v2247_v7  ;;  %4000 = vst [vmem:[#allocation18_spill] sm:$0xff] %v2884_v22  ;;  %4001 = vst [vmem:[#allocation19_spill] sm:$0xff] %v2889_v23  ;;  %v2265_v25 = vld [vmem:[%s3934_s1] sm:$0xff]   ;;  %v2903_v27 = vld [vmem:[%s3933_s0 + $0x30] sm:$0xff] }
  0x63   : > { %v2266_v26 = vld [vmem:[%s3934_s1 + $0x20] sm:$0xff]   ;;  %4002 = vst [vmem:[#allocation20_spill] sm:$0xff] %v2903_v27  ;;  %v2908_v28 = vld [vmem:[%s3933_s0 + $0x38] sm:$0xff]  ;;  %v2267_v30 = vld [vmem:[%s3934_s1 + $0x8] sm:$0xff]   ;;  %v2956_v45 = vadd.s32 %v637_v43, %v635_v42  ;;  %vm849_vm3 = vcmp.lt.s32.totalorder %v2954_v44, 500 }
  0x64   : > { %644 = vperm.xlu0 %2239, %v2870_v18   ;;  %650 = vperm.xlu1 %2240, %v2875_v19   ;;  %4003 = vst [vmem:[#allocation21_spill] sm:$0xff] %v2908_v28  ;;  %v2915_v29 = vld [vmem:[%s3933_s0 + $0x40] sm:$0xff]  ;;  %v2268_v31 = vld [vmem:[%s3934_s1 + $0x28] sm:$0xff]   ;;  %v2269_v32 = vld [vmem:[%s3934_s1 + $0x10] sm:$0xff]  }
  0x65   : > { %500 = vmatpush1.bf16.msra.mxu0 %v2249_v8  ;;  %2153 = vmatpush1.bf16.msra.mxu1 %v2249_v8  ;;  %4004 = vst [vmem:[#allocation22_spill] sm:$0xff] %v2915_v29  ;;  %v2270_v33 = vld [vmem:[%s3934_s1 + $0x30] sm:$0xff]   ;;  %v2271_v34 = vld [vmem:[%s3934_s1 + $0x18] sm:$0xff]   ;;  %vm850_vm6 = vcmp.lt.s32.totalorder %v2956_v45, 500 }
  0x66   : > { %501 = vmatprep.subr.bf16.mxu0 %v2250_v9  ;;  %2146 = vmatprep.subr.bf16.mxu1 %v2250_v9  ;;  %v2272_v35 = vld [vmem:[%s3934_s1 + $0x38] sm:$0xff]  }
  0x68   : > { %653 = vperm.xlu0 %2239, %v2884_v22   ;;  %656 = vperm.xlu1 %2240, %v2889_v23  }
  0x69   : > { %502 = vmatpush1.bf16.msra.mxu0 %v2252_v10  ;;  %2154 = vmatpush1.bf16.msra.mxu1 %v2252_v10 }
  0x6a   : > { %503 = vmatprep.subr.bf16.mxu0 %v2253_v11  ;;  %2147 = vmatprep.subr.bf16.mxu1 %v2253_v11 }
  0x6c   : > { %659 = vperm.xlu0 %2239, %v2903_v27   ;;  %662 = vperm.xlu1 %2240, %v2908_v28  }
  0x6d   : > { %504 = vmatpush1.bf16.msra.mxu0 %v2255_v12  ;;  %2155 = vmatpush1.bf16.msra.mxu1 %v2255_v12 }
  0x6e   : > { %505 = vmatprep.subr.bf16.mxu0 %v2256_v13  ;;  %2148 = vmatprep.subr.bf16.mxu1 %v2256_v13 }
  0x70   : > { %665 = vperm.xlu0 %2239, %v2915_v29  }
  0x71   : > { %506 = vmatpush1.bf16.msra.mxu0 %v2258_v15  ;;  %2156 = vmatpush1.bf16.msra.mxu1 %v2258_v15 }
  0x72   : > { %507 = vmatprep.subr.bf16.mxu0 %v2259_v16  ;;  %2149 = vmatprep.subr.bf16.mxu1 %v2259_v16 }
  0x75   : > { %508 = vmatpush1.bf16.msra.mxu0 %v2261_v20  ;;  %2157 = vmatpush1.bf16.msra.mxu1 %v2261_v20 }
  0x76   : > { %509 = vmatprep.subr.bf16.mxu0 %v2262_v21  ;;  %2150 = vmatprep.subr.bf16.mxu1 %v2262_v21 }
  0x79   : > { %510 = vmatpush1.bf16.msra.mxu0 %v2264_v24  ;;  %2158 = vmatpush1.bf16.msra.mxu1 %v2264_v24 }
  0x7c   : > { %528 = vmatmul.mubr.bf16.vlgmr.msra.gmra.mrb[0].mxu0 %v2265_v25  ;;  %568 = vmatmul.mubr.bf16.vlgmr.msra.gmra.mrb[0].mxu1 %v2266_v26 }
  0x7d   : > { %537 = vmatprep.mubr.bf16.mxu0 %v2627_v4  ;;  %577 = vmatprep.mubr.bf16.mxu1 %v2627_v4 }
  0x84   : > { %538 = vmatmul.mubr.bf16.gmra.mrb[4].mxu0 %v2267_v30  ;;  %578 = vmatmul.mubr.bf16.gmra.mrb[4].mxu1 %v2268_v31 }
  0x85   : > { %547 = vmatprep.mubr.bf16.mxu0 %v2627_v4  ;;  %587 = vmatprep.mubr.bf16.mxu1 %v2627_v4 }
  0x8c   : > { %548 = vmatmul.mubr.bf16.gmra.mrb[8].mxu0 %v2269_v32  ;;  %588 = vmatmul.mubr.bf16.gmra.mrb[8].mxu1 %v2270_v33 }
  0x8d   : > { %557 = vmatprep.mubr.bf16.mxu0 %v2627_v4  ;;  %597 = vmatprep.mubr.bf16.mxu1 %v2627_v4 }
  0x94   : > { %558 = vmatmul.mubr.bf16.gmra.mrb[12].mxu0 %v2271_v34  ;;  %598 = vmatmul.mubr.bf16.gmra.mrb[12].mxu1 %v2272_v35 }
  0xdf   : > { %v642_v36 = vpop.permute.xlu0 %641  ;;  %v648_v47 = vpop.permute.xlu1 %647 }
  0xe0   : > { %vm688_vm1 = vcmp.eq.s32.totalorder %v2954_v44, %v642_v36  ;;  %vm689_vm4 = vcmp.eq.s32.totalorder %v2956_v45, %v642_v36  ;;  %vm692_vm9 = vcmp.eq.s32.totalorder %v2954_v44, %v648_v47  ;;  %vm693_vm10 = vcmp.eq.s32.totalorder %v2956_v45, %v648_v47 }
  0xe3   : > { %v645_v37 = vpop.permute.xlu0 %644  ;;  %v651_v8 = vpop.permute.xlu1 %650 }
  0xe4   : > { %vm690_vm7 = vcmp.eq.s32.totalorder %v2954_v44, %v645_v37  ;;  %vm691_vm8 = vcmp.eq.s32.totalorder %v2956_v45, %v645_v37  ;;  %vm694_vm11 = vcmp.eq.s32.totalorder %v2954_v44, %v651_v8  ;;  %vm695_vm12 = vcmp.eq.s32.totalorder %v2956_v45, %v651_v8 }
  0xe7   : > { %v2942_v39 = vpop.permute.xlu0 %653 }
  0xe8   : > { %vm696_vm13 = vcmp.eq.s32.totalorder %v2954_v44, %v2942_v39  ;;  %vm697_vm14 = vcmp.eq.s32.totalorder %v2956_v45, %v2942_v39 }
  0xeb   : > { %v2948_v41 = vpop.permute.xlu0 %659 }
  0xef   : > { %v666_v46 = vpop.permute.xlu0 %665 }
  0xf0   : > { %vm704_vm2 = vcmp.eq.s32.totalorder %v2954_v44, %v666_v46  ;;  %vm705_vm5 = vcmp.eq.s32.totalorder %v2956_v45, %v666_v46 }
 0x14f   : > { %v529_v48 = vpop.f32.mrb[0].mxu0  ;;  %v569_v49 = vpop.f32.mrb[0].mxu1 }
 0x150   : > { %608 = vst [vmem:[%s2787_s13] sm:$0xff] %v529_v48  ;;  %2096 = vst [vmem:[%s2787_s13 + $0x20] sm:$0xff] %v569_v49  ;;  %v531_v50 = vpop.f32.mrb[1].mxu0  ;;  %v571_v51 = vpop.f32.mrb[1].mxu1  ;;  %v2970_v52 = vsel %vm849_vm3, %v569_v49, -inf  ;;  %v2974_v53 = vsel %vm849_vm3, %v529_v48, -inf  ;;  %v736_v54 = vsel %vm688_vm1, %v529_v48, 0.0  ;;  %vm700_vm1 = vcmp.eq.s32.totalorder %v2954_v44, %v2948_v41 }
 0x151   : > { %v752_v55 = vsel %vm704_vm2, %v569_v49, 0.0  ;;  %609 = vst [vmem:[%s2787_s13 + $0x8] sm:$0xff] %v531_v50  ;;  %2097 = vst [vmem:[%s2787_s13 + $0x28] sm:$0xff] %v571_v51  ;;  %v533_v56 = vpop.f32.mrb[2].mxu0  ;;  %v2982_v57 = vpop.f32.mrb[2].mxu1  ;;  %v2986_v58 = vsel %vm850_vm6, %v571_v51, -inf  ;;  %vm701_vm2 = vcmp.eq.s32.totalorder %v2956_v45, %v2948_v41 }
 0x152   : > { %v2990_v59 = vsel %vm850_vm6, %v531_v50, -inf  ;;  %v737_v60 = vsel %vm689_vm4, %v531_v50, 0.0  ;;  %v753_v61 = vsel %vm705_vm5, %v571_v51, 0.0  ;;  %610 = vst [vmem:[%s2787_s13 + $0x10] sm:$0xff] %v533_v56  ;;  %v535_v62 = vpop.f32.mrb[3].mxu0  ;;  %2098 = vst [vmem:[%s2787_s13 + $0x30] sm:$0xff] %v2982_v57  ;;  %v927_v0 = vmax.f32 %v2970_v52, %v2986_v58  ;;  %v657_v49 = vpop.permute.xlu1 %656 }
 0x153   : > { %v2999_v63 = vpop.f32.mrb[3].mxu1  ;;  %v903_v1 = vmax.f32 %v2974_v53, %v2990_v59  ;;  %v3008_v2 = vsel %vm849_vm3, %v2982_v57, -inf  ;;  %v3012_v3 = vsel %vm849_vm3, %v533_v56, -inf  ;;  %611 = vst [vmem:[%s2787_s13 + $0x18] sm:$0xff] %v535_v62  ;;  %v3024_v5 = vsel %vm850_vm6, %v535_v62, -inf }
 0x154   : > { %2099 = vst [vmem:[%s2787_s13 + $0x38] sm:$0xff] %v2999_v63  ;;  %v3020_v4 = vsel %vm850_vm6, %v2999_v63, -inf  ;;  %v3026_v6 = vadd.f32 %v737_v60, %v736_v54  ;;  %v738_v7 = vsel %vm690_vm7, %v533_v56, 0.0  ;;  %928 = vmax.xlane.f32.xlu1 %v927_v0  ;;  %v739_v10 = vsel %vm691_vm8, %v535_v62, 0.0 }
 0x155   : > { %904 = vmax.xlane.f32.xlu0 %v903_v1  ;;  %v930_v9 = vmax.f32 %v3008_v2, %v3020_v4  ;;  %v3034_v11 = vadd.f32 %v753_v61, %v752_v55  ;;  %v3036_v12 = vadd.f32 %v739_v10, %v738_v7  ;;  %v906_v13 = vmax.f32 %v3012_v3, %v3024_v5 }
 0x156   : > { %vm698_vm15 = vcmp.eq.s32.totalorder %v2954_v44, %v657_v49  ;;  %vm699_vm0 = vcmp.eq.s32.totalorder %v2956_v45, %v657_v49 }
 0x157   : > { %v539_v15 = vpop.f32.mrb[4].mxu0  ;;  %v3043_v16 = vpop.f32.mrb[4].mxu1 }
 0x158   : > { %v3047_v20 = vsel %vm849_vm3, %v539_v15, -inf  ;;  %v3053_v21 = vsel %vm849_vm3, %v3043_v16, -inf  ;;  %907 = vmax.xlane.f32.xlu1 %v906_v13  ;;  %v541_v24 = vpop.f32.mrb[5].mxu0  ;;  %v3055_v25 = vpop.f32.mrb[5].mxu1  ;;  %v740_v26 = vsel %vm692_vm9, %v539_v15, 0.0 }
 0x159   : > { %931 = vmax.xlane.f32.xlu0 %v930_v9  ;;  %v741_v30 = vsel %vm693_vm10, %v541_v24, 0.0  ;;  %v3059_v31 = vsel %vm850_vm6, %v541_v24, -inf  ;;  %v543_v32 = vpop.f32.mrb[6].mxu0  ;;  %v3064_v33 = vsel %vm850_vm6, %v3055_v25, -inf  ;;  %v3066_v34 = vpop.f32.mrb[6].mxu1 }
 0x15a   : > { %v742_v35 = vsel %vm694_vm11, %v543_v32, 0.0  ;;  %v545_v36 = vpop.f32.mrb[7].mxu0  ;;  %v3068_v37 = vpop.f32.mrb[7].mxu1  ;;  %v909_v42 = vmax.f32 %v3047_v20, %v3059_v31  ;;  %v3074_v43 = vsel %vm849_vm3, %v543_v32, -inf  ;;  %v933_v48 = vmax.f32 %v3053_v21, %v3064_v33 }
 0x15b   : > { %v743_v46 = vsel %vm695_vm12, %v545_v36, 0.0  ;;  %v3080_v47 = vsel %vm850_vm6, %v545_v36, -inf  ;;  %v3084_v50 = vadd.f32 %v741_v30, %v740_v26  ;;  %v3097_v55 = vsel %vm849_vm3, %v3066_v34, -inf }
 0x15c   : > { %v3086_v51 = vadd.f32 %v743_v46, %v742_v35  ;;  %934 = vmax.xlane.f32.xlu1 %v933_v48  ;;  %v912_v54 = vmax.f32 %v3074_v43, %v3080_v47  ;;  %v3102_v56 = vsel %vm850_vm6, %v3068_v37, -inf  ;;  %v663_v48 = vpop.permute.xlu1 %662 }
 0x15d   : > { %910 = vmax.xlane.f32.xlu0 %v909_v42  ;;  %v936_v32 = vmax.f32 %v3097_v55, %v3102_v56  ;;  %vm702_vm4 = vcmp.eq.s32.totalorder %v2954_v44, %v663_v48  ;;  %vm703_vm5 = vcmp.eq.s32.totalorder %v2956_v45, %v663_v48 }
 0x15f   : > { %v549_v60 = vpop.f32.mrb[8].mxu0  ;;  %v3105_v61 = vpop.f32.mrb[8].mxu1 }
 0x160   : > { %v744_v62 = vsel %vm696_vm13, %v549_v60, 0.0  ;;  %v3109_v39 = vsel %vm849_vm3, %v549_v60, -inf  ;;  %v551_v0 = vpop.f32.mrb[9].mxu0  ;;  %v3112_v1 = vpop.f32.mrb[9].mxu1  ;;  %v3117_v7 = vsel %vm849_vm3, %v3105_v61, -inf }
 0x161   : > { %913 = vmax.xlane.f32.xlu0 %v912_v54  ;;  %v745_v8 = vsel %vm697_vm14, %v551_v0, 0.0  ;;  %v3121_v9 = vsel %vm850_vm6, %v551_v0, -inf  ;;  %v553_v10 = vpop.f32.mrb[10].mxu0  ;;  %v3126_v13 = vsel %vm850_vm6, %v3112_v1, -inf  ;;  %v3128_v15 = vpop.f32.mrb[10].mxu1 }
 0x162   : > { %4006 = vst [vmem:[#allocation24_spill] sm:$0xff] %v3126_v13  ;;  %v746_v24 = vsel %vm698_vm15, %v553_v10, 0.0  ;;  %v555_v26 = vpop.f32.mrb[11].mxu0  ;;  %v3130_v30 = vpop.f32.mrb[11].mxu1  ;;  %v915_v35 = vmax.f32 %v3109_v39, %v3121_v9  ;;  %v3138_v36 = vsel %vm849_vm3, %v553_v10, -inf  ;;  %v939_v54 = vmax.f32 %v3117_v7, %v3126_v13 }
 0x163   : > { %v747_v42 = vsel %vm699_vm0, %v555_v26, 0.0  ;;  %v3144_v46 = vsel %vm850_vm6, %v555_v26, -inf  ;;  %v3150_v0 = vadd.f32 %v745_v8, %v744_v62  ;;  %v3159_v10 = vsel %vm849_vm3, %v3128_v15, -inf }
 0x164   : > { %916 = vmax.xlane.f32.xlu1 %v915_v35  ;;  %v783_v60 = vadd.f32 %v747_v42, %v746_v24  ;;  %v918_v49 = vmax.f32 %v3138_v36, %v3144_v46  ;;  %v3164_v24 = vsel %vm850_vm6, %v3130_v30, -inf }
 0x165   : > { %937 = vmax.xlane.f32.xlu0 %v936_v32  ;;  %v942_v27 = vmax.f32 %v3159_v10, %v3164_v24 }
 0x167   : > { %v559_v26 = vpop.f32.mrb[12].mxu0  ;;  %v3167_v62 = vpop.f32.mrb[12].mxu1 }
 0x168   : > { %v748_v8 = vsel %vm700_vm1, %v559_v26, 0.0  ;;  %v3171_v41 = vsel %vm849_vm3, %v559_v26, -inf  ;;  %940 = vmax.xlane.f32.xlu1 %v939_v54  ;;  %v561_v32 = vpop.f32.mrb[13].mxu0  ;;  %v3173_v35 = vpop.f32.mrb[13].mxu1  ;;  %v3179_v42 = vsel %vm849_vm3, %v3167_v62, -inf }
 0x169   : > { %4007 = vst [vmem:[#allocation25_spill] sm:$0xff] %v3171_v41  ;;  %919 = vmax.xlane.f32.xlu0 %v918_v49  ;;  %4008 = vst [vmem:[#allocation26_spill] sm:$0xff] %v3179_v42  ;;  %v749_v38 = vsel %vm701_vm2, %v561_v32, 0.0  ;;  %v3183_v40 = vsel %vm850_vm6, %v561_v32, -inf  ;;  %v563_v29 = vpop.f32.mrb[14].mxu0  ;;  %v3188_v54 = vsel %vm850_vm6, %v3173_v35, -inf }
 0x16a   : > { %4009 = vst [vmem:[#allocation27_spill] sm:$0xff] %v3183_v40  ;;  %4010 = vst [vmem:[#allocation28_spill] sm:$0xff] %v3188_v54  ;;  %v3190_v49 = vpop.f32.mrb[14].mxu1  ;;  %v750_v26 = vsel %vm702_vm4, %v563_v29, 0.0  ;;  %v565_v48 = vpop.f32.mrb[15].mxu0  ;;  %v921_v23 = vmax.f32 %v3171_v41, %v3183_v40  ;;  %v3200_v32 = vsel %vm849_vm3, %v563_v29, -inf  ;;  %v945_v17 = vmax.f32 %v3179_v42, %v3188_v54 }
 0x16b   : > { %v3192_v28 = vpop.f32.mrb[15].mxu1  ;;  %v751_v22 = vsel %vm703_vm5, %v565_v48, 0.0  ;;  %v3204_v19 = vsel %vm850_vm6, %v565_v48, -inf  ;;  %v3208_v14 = vadd.f32 %v749_v38, %v748_v8  ;;  %v3215_v29 = vsel %vm849_vm3, %v3190_v49, -inf  ;;  %v3245_v38 = vld [vmem:[#allocation2 + $0x40] sm:$0xff]  ;;  %v3255_v8 = vld [vmem:[#allocation2 + $0x48] sm:$0xff] }
 0x16c   : > { %922 = vmax.xlane.f32.xlu1 %v921_v23  ;;  %v789_v18 = vadd.f32 %v751_v22, %v750_v26  ;;  %v924_v40 = vmax.f32 %v3200_v32, %v3204_v19  ;;  %4011 = vst [vmem:[#allocation29_spill] sm:$0xff] %v3215_v29  ;;  %v3220_v48 = vsel %vm850_vm6, %v3192_v28, -inf  ;;  %v3229_v23 = vld [vmem:[%s3933_s0 + $0x48] sm:$0xff]  ;;  %4016 = vst [vmem:[#allocation34_spill] sm:$0xff] %v3245_v38  ;;  %vm832_vm3 = vcmask 7168  }
 0x16d   : > { %943 = vmax.xlane.f32.xlu0 %v942_v27  ;;  %4012 = vst [vmem:[#allocation30_spill] sm:$0xff] %v3220_v48  ;;  %v948_v22 = vmax.f32 %v3215_v29, %v3220_v48  ;;  %4013 = vst [vmem:[#allocation31_spill] sm:$0xff] %v3229_v23  ;;  %v3242_v27 = vld [vmem:[%s3933_s0 + $0x60] sm:$0xff]  ;;  %v3257_v26 = vld [vmem:[#allocation2 + $0x8] sm:$0xff] }
 0x16e   : > { %4015 = vst [vmem:[#allocation33_spill] sm:$0xff] %v3242_v27  ;;  %4020 = vst [vmem:[#allocation38_spill] sm:$0xff] %v3255_v8  ;;  %v3322_v54 = vld [vmem:[#allocation2 + $0x28] sm:$0xff] }
 0x16f   : > { %4021 = vst [vmem:[#allocation39_spill] sm:$0xff] %v3257_v26  ;;  %4031 = vst [vmem:[#allocation49_spill] sm:$0xff] %v3322_v54 }
 0x170   : > { %946 = vmax.xlane.f32.xlu1 %v945_v17  ;;  %v3236_v17 = vld [vmem:[%s3933_s0 + $0x50] sm:$0xff] }
 0x171   : > { %925 = vmax.xlane.f32.xlu0 %v924_v40  ;;  %4014 = vst [vmem:[#allocation32_spill] sm:$0xff] %v3236_v17  ;;  %v3247_v40 = vld [vmem:[#allocation2] sm:$0xff] }
 0x172   : > { %4017 = vst [vmem:[#allocation35_spill] sm:$0xff] %v3247_v40 }
 0x175   : > { %949 = vmax.xlane.f32.xlu0 %v948_v22  ;;  %v3339_v22 = vld [vmem:[#allocation2 + $0x68] sm:$0xff] }
 0x176   : > { %4033 = vst [vmem:[#allocation51_spill] sm:$0xff] %v3339_v22 }
 0x179   : > { %769 = vadd.xlane.f32.xlu0 %v3026_v6 }
 0x17d   : > { %775 = vadd.xlane.f32.xlu0 %v3084_v50 }
 0x181   : > { %778 = vadd.xlane.f32.xlu0 %v3086_v51  ;;  %668 = vperm.xlu1 %2240, %v3229_v23   ;;  %v3283_v23 = vld [vmem:[#allocation2 + $0x50] sm:$0xff] }
 0x182   : > { %4023 = vst [vmem:[#allocation41_spill] sm:$0xff] %v3283_v23 }
 0x185   : > { %784 = vadd.xlane.f32.xlu0 %v783_v60  ;;  %671 = vperm.xlu1 %2240, %v3236_v17  }
 0x189   : > { %790 = vadd.xlane.f32.xlu0 %v789_v18  ;;  %677 = vperm.xlu1 %2240, %v3242_v27   ;;  %v3274_v18 = vld [vmem:[#allocation2 + $0x10] sm:$0xff] }
 0x18a   : > { %4022 = vst [vmem:[#allocation40_spill] sm:$0xff] %v3274_v18 }
 0x1e1   : > { %v929_v6 = vpop.xlane.xlu1 %928 }
 0x1e2   : > { %v905_v50 = vpop.xlane.xlu0 %904  ;;  %v3250_v51 = vmax.f32 %v3245_v38, %v929_v6 }
 0x1e3   : > { %v3253_v60 = vmax.f32 %v3247_v40, %v905_v50  ;;  %v3291_v40 = vld [vmem:[#allocation2 + $0x18] sm:$0xff] }
 0x1e4   : > { %4018 = vst [vmem:[#allocation36_spill] sm:$0xff] %v3250_v51  ;;  %1311 = vst.msk [vmem:[#allocation2 + $0x40] sm:$0xff] %vm832_vm3, %v3250_v51 }
 0x1e5   : > { %4019 = vst [vmem:[#allocation37_spill] sm:$0xff] %v3253_v60  ;;  %1303 = vst.msk [vmem:[#allocation2] sm:$0xff] %vm832_vm3, %v3253_v60  ;;  %1049 = vperm.xlu1 %2240, %v3253_v60   ;;  %v908_v50 = vpop.xlane.xlu1 %907 }
 0x1e6   : > { %v932_v6 = vpop.xlane.xlu0 %931  ;;  %v3272_v17 = vmax.f32 %v3257_v26, %v908_v50  ;;  %4026 = vst [vmem:[#allocation44_spill] sm:$0xff] %v3291_v40  ;;  %v3307_v26 = vld [vmem:[#allocation2 + $0x20] sm:$0xff] }
 0x1e7   : > { %v3269_v27 = vmax.f32 %v3255_v8, %v932_v6  ;;  %v3305_v8 = vld [vmem:[#allocation2 + $0x58] sm:$0xff]  ;;  %4028 = vst [vmem:[#allocation46_spill] sm:$0xff] %v3307_v26 }
 0x1e8   : > { %1304 = vst.msk [vmem:[#allocation2 + $0x8] sm:$0xff] %vm832_vm3, %v3272_v17  ;;  %4027 = vst [vmem:[#allocation45_spill] sm:$0xff] %v3305_v8 }
 0x1e9   : > { %1312 = vst.msk [vmem:[#allocation2 + $0x48] sm:$0xff] %vm832_vm3, %v3269_v27  ;;  %1089 = vperm.xlu1 %2240, %v3250_v51   ;;  %v935_v50 = vpop.xlane.xlu1 %934 }
 0x1ea   : > { %v911_v6 = vpop.xlane.xlu0 %910  ;;  %v3289_v60 = vmax.f32 %v3283_v23, %v935_v50 }
 0x1eb   : > { %v3286_v38 = vmax.f32 %v3274_v18, %v911_v6  ;;  %v3320_v18 = vld [vmem:[#allocation2 + $0x60] sm:$0xff] }
 0x1ec   : > { %4025 = vst [vmem:[#allocation43_spill] sm:$0xff] %v3289_v60  ;;  %1313 = vst.msk [vmem:[#allocation2 + $0x50] sm:$0xff] %vm832_vm3, %v3289_v60 }
 0x1ed   : > { %4024 = vst [vmem:[#allocation42_spill] sm:$0xff] %v3286_v38  ;;  %1305 = vst.msk [vmem:[#allocation2 + $0x10] sm:$0xff] %vm832_vm3, %v3286_v38  ;;  %1059 = vperm.xlu1 %2240, %v3286_v38  }
 0x1ee   : > { %v914_v6 = vpop.xlane.xlu0 %913  ;;  %4030 = vst [vmem:[#allocation48_spill] sm:$0xff] %v3320_v18 }
 0x1ef   : > { %v3303_v50 = vmax.f32 %v3291_v40, %v914_v6 }
 0x1f1   : > { %1306 = vst.msk [vmem:[#allocation2 + $0x18] sm:$0xff] %vm832_vm3, %v3303_v50  ;;  %1099 = vperm.xlu1 %2240, %v3289_v60   ;;  %v917_v23 = vpop.xlane.xlu1 %916  ;;  %v3358_v60 = vld [vmem:[#allocation2 + $0x70] sm:$0xff] }
 0x1f2   : > { %v938_v51 = vpop.xlane.xlu0 %937  ;;  %v3318_v6 = vmax.f32 %v3307_v26, %v917_v23  ;;  %4036 = vst [vmem:[#allocation54_spill] sm:$0xff] %v3358_v60 }
 0x1f3   : > { %v3315_v38 = vmax.f32 %v3305_v8, %v938_v51  ;;  %v3341_v8 = vld [vmem:[#allocation2 + $0x30] sm:$0xff] }
 0x1f4   : > { %4029 = vst [vmem:[#allocation47_spill] sm:$0xff] %v3318_v6  ;;  %1307 = vst.msk [vmem:[#allocation2 + $0x20] sm:$0xff] %vm832_vm3, %v3318_v6 }
 0x1f5   : > { %1314 = vst.msk [vmem:[#allocation2 + $0x58] sm:$0xff] %vm832_vm3, %v3315_v38  ;;  %1069 = vperm.xlu1 %2240, %v3318_v6   ;;  %v941_v23 = vpop.xlane.xlu1 %940  ;;  %4034 = vst [vmem:[#allocation52_spill] sm:$0xff] %v3341_v8 }
 0x1f6   : > { %v920_v51 = vpop.xlane.xlu0 %919  ;;  %v3334_v40 = vmax.f32 %v3320_v18, %v941_v23  ;;  %v3360_v18 = vld [vmem:[#allocation2 + $0x38] sm:$0xff] }
 0x1f7   : > { %v3337_v42 = vmax.f32 %v3322_v54, %v920_v51  ;;  %4037 = vst [vmem:[#allocation55_spill] sm:$0xff] %v3360_v18 }
 0x1f8   : > { %4032 = vst [vmem:[#allocation50_spill] sm:$0xff] %v3334_v40  ;;  %1315 = vst.msk [vmem:[#allocation2 + $0x60] sm:$0xff] %vm832_vm3, %v3334_v40 }
 0x1f9   : > { %1308 = vst.msk [vmem:[#allocation2 + $0x28] sm:$0xff] %vm832_vm3, %v3337_v42  ;;  %1109 = vperm.xlu1 %2240, %v3334_v40   ;;  %v923_v51 = vpop.xlane.xlu1 %922  ;;  %v720_v40 = vld [vmem:[#allocation4] sm:$0xff] }
 0x1fa   : > { %v944_v23 = vpop.xlane.xlu0 %943  ;;  %v3356_v48 = vmax.f32 %v3341_v8, %v923_v51 }
 0x1fb   : > { %v3353_v26 = vmax.f32 %v3339_v22, %v944_v23 }
 0x1fc   : > { %4035 = vst [vmem:[#allocation53_spill] sm:$0xff] %v3356_v48  ;;  %1309 = vst.msk [vmem:[#allocation2 + $0x30] sm:$0xff] %vm832_vm3, %v3356_v48 }
 0x1fd   : > { %1316 = vst.msk [vmem:[#allocation2 + $0x68] sm:$0xff] %vm832_vm3, %v3353_v26  ;;  %1079 = vperm.xlu1 %2240, %v3356_v48   ;;  %v947_v23 = vpop.xlane.xlu1 %946  ;;  %v3386_v48 = vld [vmem:[#allocation2 + $0x78] sm:$0xff] }
 0x1fe   : > { %v926_v51 = vpop.xlane.xlu0 %925  ;;  %v3372_v54 = vmax.f32 %v3358_v60, %v947_v23  ;;  %4039 = vst [vmem:[#allocation57_spill] sm:$0xff] %v3386_v48 }
 0x1ff   : > { %v3375_v29 = vmax.f32 %v3360_v18, %v926_v51  ;;  %v3391_v51 = vld [vmem:[%s3933_s0 + $0x68] sm:$0xff] }
 0x200   : > { %4038 = vst [vmem:[#allocation56_spill] sm:$0xff] %v3372_v54  ;;  %1317 = vst.msk [vmem:[#allocation2 + $0x70] sm:$0xff] %vm832_vm3, %v3372_v54 }
 0x201   : > { %1310 = vst.msk [vmem:[#allocation2 + $0x38] sm:$0xff] %vm832_vm3, %v3375_v29  ;;  %1119 = vperm.xlu1 %2240, %v3372_v54   ;;  %v669_v23 = vpop.permute.xlu1 %668  ;;  %4040 = vst [vmem:[#allocation58_spill] sm:$0xff] %v3391_v51 }
 0x202   : > { %v950_v8 = vpop.xlane.xlu0 %949  ;;  %vm706_vm6 = vcmp.eq.s32.totalorder %v2954_v44, %v669_v23  ;;  %vm707_vm7 = vcmp.eq.s32.totalorder %v2956_v45, %v669_v23 }
 0x203   : > { %v3396_v6 = vmax.f32 %v3386_v48, %v950_v8  ;;  %v754_v60 = vsel %vm706_vm6, %v2982_v57, 0.0  ;;  %v755_v54 = vsel %vm707_vm7, %v2999_v63, 0.0  ;;  %v3408_v8 = vld [vmem:[%s3933_s0 + $0x78] sm:$0xff]  ;;  %v722_v63 = vld [vmem:[#allocation4 + $0x10] sm:$0xff] }
 0x204   : > { %v795_v18 = vadd.f32 %v755_v54, %v754_v60  ;;  %4041 = vst [vmem:[#allocation59_spill] sm:$0xff] %v3408_v8 }
 0x205   : > { %680 = vperm.xlu1 %2240, %v3391_v51   ;;  %1318 = vst.msk [vmem:[#allocation2 + $0x78] sm:$0xff] %vm832_vm3, %v3396_v6  ;;  %v672_v41 = vpop.permute.xlu1 %671 }
 0x206   : > { %v770_v13 = vpop.xlane.xlu0 %769  ;;  %vm708_vm8 = vcmp.eq.s32.totalorder %v2954_v44, %v672_v41  ;;  %vm709_vm9 = vcmp.eq.s32.totalorder %v2956_v45, %v672_v41  ;;  %796 = vadd.xlane.f32.xlu0 %v795_v18  ;;  %v723_v41 = vld [vmem:[#allocation4 + $0x18] sm:$0xff] }
 0x207   : > { %v816_v57 = vadd.f32 %v770_v13, %v720_v40  ;;  %v756_v54 = vsel %vm708_vm8, %v3043_v16, 0.0  ;;  %v757_v60 = vsel %vm709_vm9, %v3055_v25, 0.0 }
 0x208   : > { %v798_v23 = vadd.f32 %v757_v60, %v756_v54 }
 0x209   : > { %833 = vst.msk [vmem:[#allocation4] sm:$0xff] %vm832_vm3, %v816_v57  ;;  %686 = vperm.xlu1 %2240, %v3408_v8   ;;  %v678_v22 = vpop.permute.xlu1 %677  ;;  %v725_v57 = vld [vmem:[#allocation4 + $0x28] sm:$0xff]  ;;  %v727_v8 = vld [vmem:[#allocation4 + $0x38] sm:$0xff] }
 0x20a   : > { %v776_v51 = vpop.xlane.xlu0 %775  ;;  %vm712_vm10 = vcmp.eq.s32.totalorder %v2954_v44, %v678_v22  ;;  %vm713_vm11 = vcmp.eq.s32.totalorder %v2956_v45, %v678_v22 }
 0x20b   : > { %v818_v48 = vadd.f32 %v776_v51, %v722_v63  ;;  %v760_v13 = vsel %vm712_vm10, %v3105_v61, 0.0  ;;  %v761_v40 = vsel %vm713_vm11, %v3112_v1, 0.0  ;;  %v3427_v61 = vld [vmem:[%s3933_s0 + $0x58] sm:$0xff]  ;;  %v3442_v1 = vld [vmem:[%s3933_s0 + $0x70] sm:$0xff] }
 0x20c   : > { %v804_v16 = vadd.f32 %v761_v40, %v760_v13 }
 0x20d   : > { %835 = vst.msk [vmem:[#allocation4 + $0x10] sm:$0xff] %vm832_vm3, %v818_v48 }
 0x20e   : > { %v779_v25 = vpop.xlane.xlu0 %778 }
 0x20f   : > { %v819_v18 = vadd.f32 %v779_v25, %v723_v41 }
 0x211   : > { %836 = vst.msk [vmem:[#allocation4 + $0x18] sm:$0xff] %vm832_vm3, %v819_v18 }
 0x212   : > { %v785_v54 = vpop.xlane.xlu0 %784 }
 0x213   : > { %v821_v60 = vadd.f32 %v785_v54, %v725_v57 }
 0x215   : > { %838 = vst.msk [vmem:[#allocation4 + $0x28] sm:$0xff] %vm832_vm3, %v821_v60  ;;  %v729_v60 = vld [vmem:[#allocation4 + $0x48] sm:$0xff] }
 0x216   : > { %v791_v22 = vpop.xlane.xlu0 %790 }
 0x217   : > { %v823_v51 = vadd.f32 %v791_v22, %v727_v8 }
 0x219   : > { %840 = vst.msk [vmem:[#allocation4 + $0x38] sm:$0xff] %vm832_vm3, %v823_v51 }
 0x21c   : > { %674 = vperm.xlu0 %2239, %v3427_v61  }
 0x220   : > { %1054 = vperm.xlu0 %2239, %v3272_v17  }
 0x224   : > { %1064 = vperm.xlu0 %2239, %v3303_v50  }
 0x228   : > { %1074 = vperm.xlu0 %2239, %v3337_v42  }
 0x22c   : > { %1094 = vperm.xlu0 %2239, %v3269_v27  }
 0x22d   : > { %772 = vadd.xlane.f32.xlu1 %v3036_v12 }
 0x230   : > { %1104 = vperm.xlu0 %2239, %v3315_v38  }
 0x231   : > { %781 = vadd.xlane.f32.xlu1 %v3150_v0 }
 0x234   : > { %1114 = vperm.xlu0 %2239, %v3353_v26  }
 0x235   : > { %787 = vadd.xlane.f32.xlu1 %v3208_v14 }
 0x238   : > { %683 = vperm.xlu0 %2239, %v3442_v1  }
 0x239   : > { %793 = vadd.xlane.f32.xlu1 %v3034_v11 }
 0x23c   : > { %1084 = vperm.xlu0 %2239, %v3375_v29  }
 0x23d   : > { %799 = vadd.xlane.f32.xlu1 %v798_v23 }
 0x240   : > { %1124 = vperm.xlu0 %2239, %v3396_v6  }
 0x241   : > { %805 = vadd.xlane.f32.xlu1 %v804_v16 }
 0x264   : > { %v1050_v12 = vpop.permute.xlu1 %1049 }
 0x268   : > { %v1090_v0 = vpop.permute.xlu1 %1089 }
 0x26c   : > { %v3448_v14 = vpop.permute.xlu1 %1059 }
 0x270   : > { %v3450_v48 = vpop.permute.xlu1 %1099 }
 0x274   : > { %v3452_v8 = vpop.permute.xlu1 %1069 }
 0x278   : > { %v3454_v63 = vpop.permute.xlu1 %1109 }
 0x27c   : > { %v3456_v41 = vpop.permute.xlu1 %1079 }
 0x280   : > { %v3458_v11 = vpop.permute.xlu1 %1119 }
 0x284   : > { %v681_v23 = vpop.permute.xlu1 %680 }
 0x285   : > { %vm714_vm12 = vcmp.eq.s32.totalorder %v2954_v44, %v681_v23  ;;  %vm715_vm13 = vcmp.eq.s32.totalorder %v2956_v45, %v681_v23 }
 0x286   : > { %v762_v13 = vsel %vm714_vm12, %v3128_v15, 0.0  ;;  %v763_v40 = vsel %vm715_vm13, %v3130_v30, 0.0 }
 0x287   : > { %v807_v16 = vadd.f32 %v763_v40, %v762_v13 }
 0x288   : > { %v687_v25 = vpop.permute.xlu1 %686 }
 0x289   : > { %vm718_vm14 = vcmp.eq.s32.totalorder %v2954_v44, %v687_v25  ;;  %vm719_vm15 = vcmp.eq.s32.totalorder %v2956_v45, %v687_v25 }
 0x28a   : > { %v766_v18 = vsel %vm718_vm14, %v3190_v49, 0.0  ;;  %v767_v57 = vsel %vm719_vm15, %v3192_v28, 0.0  ;;  %vm1334_vm15 = vcmp.ne.s32.totalorder (!%p2101_p8), %v3427_v61, 0  ;;  %v4100_v61 = vld [vmem:[#allocation58_spill] sm:$0xff] (!%p2101_p8) }
 0x28b   : > { %v813_v54 = vadd.f32 %v767_v57, %v766_v18 }
 0x293   : > { %v797_v22 = vpop.xlane.xlu0 %796 }
 0x294   : > { %v825_v51 = vadd.f32 %v797_v22, %v729_v60  ;;  %v1127_v60 = vsub.f32 %v2974_v53, %v1050_v12  ;;  %v1128_v22 = vsub.f32 %v2990_v59, %v1050_v12  ;;  %v1131_v53 = vsub.f32 %v3047_v20, %v3448_v14 }
 0x296   : > { %842 = vst.msk [vmem:[#allocation4 + $0x48] sm:$0xff] %vm832_vm3, %v825_v51  ;;  %v1167_v20 = vmul.f32 1.442695, %v1131_v53 }
 0x29b   : > { %v675_v23 = vpop.permute.xlu0 %674 }
 0x29c   : > { %vm710_vm0 = vcmp.eq.s32.totalorder %v2954_v44, %v675_v23  ;;  %vm711_vm1 = vcmp.eq.s32.totalorder %v2956_v45, %v675_v23  ;;  %v1159_v23 = vmul.f32 1.442695, %v1127_v60 }
 0x29d   : > { %v758_v15 = vsel %vm710_vm0, %v3066_v34, 0.0  ;;  %v759_v30 = vsel %vm711_vm1, %v3068_v37, 0.0  ;;  %v1143_v34 = vsub.f32 %v2970_v52, %v1090_v0  ;;  %v1144_v37 = vsub.f32 %v2986_v58, %v1090_v0 }
 0x29e   : > { %v801_v13 = vadd.f32 %v759_v30, %v758_v15  ;;  %v1132_v58 = vsub.f32 %v3059_v31, %v3448_v14  ;;  %vm1336_vm1 = vcmp.ne.s32.totalorder (!%p2101_p8), %v4100_v61, 0 }
 0x29f   : > { %v1055_v40 = vpop.permute.xlu0 %1054  ;;  %v1193_v30 = vmul.f32 1.442695, %v1144_v37 }
 0x2a0   : > { %v1129_v49 = vsub.f32 %v3012_v3, %v1055_v40  ;;  %v1130_v28 = vsub.f32 %v3024_v5, %v1055_v40  ;;  %802 = vadd.xlane.f32.xlu0 %v801_v13  ;;  %v1161_v3 = vmul.f32 1.442695, %v1128_v22  ;;  %v1191_v5 = vmul.f32 1.442695, %v1143_v34 }
 0x2a1   : > { %v1169_v31 = vmul.f32 1.442695, %v1132_v58  ;;  %v1148_v22 = vsub.f32 %v3064_v33, %v3450_v48 }
 0x2a2   : > { %v1163_v25 = vmul.f32 1.442695, %v1129_v49  ;;  %v1165_v18 = vmul.f32 1.442695, %v1130_v28 }
 0x2a3   : > { %v1065_v57 = vpop.permute.xlu0 %1064  ;;  %v1201_v33 = vmul.f32 1.442695, %v1148_v22 }
 0x2a4   : > { %2273 = vpow2.f32 %v1163_v25  ;;  %808 = vadd.xlane.f32.xlu0 %v807_v16  ;;  %v1133_v15 = vsub.f32 %v3074_v43, %v1065_v57  ;;  %v1134_v16 = vsub.f32 %v3080_v47, %v1065_v57  ;;  %v1147_v47 = vsub.f32 %v3053_v21, %v3450_v48 }
 0x2a5   : > { %2275 = vpow2.f32 %v1165_v18  ;;  %v1136_v48 = vsub.f32 %v3121_v9, %v3452_v8 }
 0x2a6   : > { %2277 = vpow2.f32 %v1159_v23  ;;  %v1171_v0 = vmul.f32 1.442695, %v1133_v15  ;;  %v1173_v49 = vmul.f32 1.442695, %v1134_v16 }
 0x2a7   : > { %v1075_v51 = vpop.permute.xlu0 %1074  ;;  %2279 = vpow2.f32 %v1161_v3 }
 0x2a8   : > { %814 = vadd.xlane.f32.xlu0 %v813_v54  ;;  %2281 = vpow2.f32 %v1191_v5  ;;  %v1137_v14 = vsub.f32 %v3138_v36, %v1075_v51  ;;  %v1138_v57 = vsub.f32 %v3144_v46, %v1075_v51  ;;  %v721_v5 = vld [vmem:[#allocation4 + $0x8] sm:$0xff] }
 0x2a9   : > { %2283 = vpow2.f32 %v1193_v30 }
 0x2aa   : > { %v1179_v37 = vmul.f32 1.442695, %v1137_v14  ;;  %v1181_v3 = vmul.f32 1.442695, %v1138_v57 }
 0x2ab   : > { %v1095_v13 = vpop.permute.xlu0 %1094 }
 0x2ac   : > { %v1145_v59 = vsub.f32 %v3008_v2, %v1095_v13  ;;  %v1146_v52 = vsub.f32 %v3020_v4, %v1095_v13 }
 0x2ae   : > { %v2274_v12 = vpop.eup %2273  ;;  %v1195_v43 = vmul.f32 1.442695, %v1145_v59  ;;  %v1197_v54 = vmul.f32 1.442695, %v1146_v52 }
 0x2af   : > { %v2276_v40 = vpop.eup %2275  ;;  %v1105_v28 = vpop.permute.xlu0 %1104 }
 0x2b0   : > { %2285 = vpow2.f32 %v1195_v43  ;;  %v1149_v2 = vsub.f32 %v3097_v55, %v1105_v28  ;;  %v1150_v4 = vsub.f32 %v3102_v56, %v1105_v28  ;;  %v1226_v25 = vadd.f32 %v2276_v40, %v2274_v12  ;;  %v2278_v34 = vpop.eup %2277  ;;  %v4042_v40 = vld [vmem:[#allocation24_spill] sm:$0xff] }
 0x2b1   : > { %2287 = vpow2.f32 %v1197_v54  ;;  %v1199_v55 = vmul.f32 1.442695, %v1147_v47  ;;  %v1135_v56 = vsub.f32 %v3109_v39, %v3452_v8  ;;  %v2280_v23 = vpop.eup %2279  ;;  %v1177_v54 = vmul.f32 1.442695, %v1136_v48  ;;  %v728_v48 = vld [vmem:[#allocation4 + $0x40] sm:$0xff] }
 0x2b2   : > { %2289 = vpow2.f32 %v1171_v0  ;;  %v1203_v18 = vmul.f32 1.442695, %v1149_v2  ;;  %1227 = vadd.xlane.f32.xlu0 %v1226_v25  ;;  %v1205_v60 = vmul.f32 1.442695, %v1150_v4  ;;  %v3499_v15 = vpop.eup %2281  ;;  %v724_v0 = vld [vmem:[#allocation4 + $0x20] sm:$0xff]  ;;  %v1223_v2 = vadd.f32 %v2280_v23, %v2278_v34 }
 0x2b3   : > { %2291 = vpow2.f32 %v1173_v49  ;;  %v1115_v21 = vpop.permute.xlu0 %1114  ;;  %v2284_v39 = vpop.eup %2283 }
 0x2b4   : > { %2293 = vpow2.f32 %v1167_v20  ;;  %v1153_v36 = vsub.f32 %v3159_v10, %v1115_v21  ;;  %v1154_v46 = vsub.f32 %v3164_v24, %v1115_v21  ;;  %v1175_v10 = vmul.f32 1.442695, %v1135_v56  ;;  %v4045_v21 = vld [vmem:[#allocation30_spill] sm:$0xff] }
 0x2b5   : > { %2295 = vpow2.f32 %v1169_v31  ;;  %v726_v31 = vld [vmem:[#allocation4 + $0x30] sm:$0xff] }
 0x2b6   : > { %2297 = vpow2.f32 %v1203_v18  ;;  %v1211_v13 = vmul.f32 1.442695, %v1153_v36  ;;  %v4043_v18 = vld [vmem:[#allocation25_spill] sm:$0xff] }
 0x2b7   : > { %2299 = vpow2.f32 %v1205_v60  ;;  %v684_v51 = vpop.permute.xlu0 %683  ;;  %v1139_v57 = vsub.f32 %v4043_v18, %v3456_v41 }
 0x2b8   : > { %2301 = vpow2.f32 %v1199_v55  ;;  %vm716_vm2 = vcmp.eq.s32.totalorder %v2954_v44, %v684_v51  ;;  %vm717_vm4 = vcmp.eq.s32.totalorder %v2956_v45, %v684_v51  ;;  %v1151_v44 = vsub.f32 %v3117_v7, %v3454_v63 }
 0x2b9   : > { %v764_v53 = vsel %vm716_vm2, %v3167_v62, 0.0  ;;  %v765_v24 = vsel %vm717_vm4, %v3173_v35, 0.0  ;;  %2303 = vpow2.f32 %v1179_v37  ;;  %v1213_v45 = vmul.f32 1.442695, %v1154_v46  ;;  %v4046_v37 = vld [vmem:[#allocation27_spill] sm:$0xff] }
 0x2ba   : > { %v773_v30 = vpop.xlane.xlu1 %772  ;;  %v2286_v16 = vpop.eup %2285  ;;  %v810_v52 = vadd.f32 %v765_v24, %v764_v53  ;;  %2305 = vpow2.f32 %v1181_v3  ;;  %v1152_v7 = vsub.f32 %v4042_v40, %v3454_v63  ;;  %v1207_v25 = vmul.f32 1.442695, %v1151_v44  ;;  %v4044_v63 = vld [vmem:[#allocation29_spill] sm:$0xff]  ;;  %v4047_v53 = vld [vmem:[#allocation26_spill] sm:$0xff] }
 0x2bb   : > { %v817_v59 = vadd.f32 %v773_v30, %v721_v5  ;;  %v2288_v58 = vpop.eup %2287  ;;  %v1085_v12 = vpop.permute.xlu0 %1084  ;;  %2307 = vpow2.f32 %v1201_v33  ;;  %v1140_v36 = vsub.f32 %v4046_v37, %v3456_v41  ;;  %v1247_v5 = vadd.f32 %v2284_v39, %v3499_v15  ;;  %v4049_v37 = vld [vmem:[#allocation39_spill] sm:$0xff] }
 0x2bc   : > { %v2290_v9 = vpop.eup %2289  ;;  %v1141_v62 = vsub.f32 %v3200_v32, %v1085_v12  ;;  %v1142_v35 = vsub.f32 %v3204_v19, %v1085_v12  ;;  %811 = vadd.xlane.f32.xlu1 %v810_v52  ;;  %v1250_v8 = vadd.f32 %v2288_v58, %v2286_v16  ;;  %2309 = vpow2.f32 %v1175_v10  ;;  %v730_v12 = vld [vmem:[#allocation4 + $0x50] sm:$0xff] }
 0x2bd   : > { %834 = vst.msk [vmem:[#allocation4 + $0x8] sm:$0xff] %vm832_vm3, %v817_v59  ;;  %v2292_v43 = vpop.eup %2291  ;;  %2311 = vpow2.f32 %v1211_v13  ;;  %v1209_v34 = vmul.f32 1.442695, %v1152_v7  ;;  %v1183_v30 = vmul.f32 1.442695, %v1139_v57  ;;  %v1155_v24 = vsub.f32 %v4047_v53, %v3458_v11  ;;  %v4048_v59 = vld [vmem:[#allocation28_spill] sm:$0xff] }
 0x2be   : > { %v782_v20 = vpop.xlane.xlu1 %781  ;;  %v2294_v47 = vpop.eup %2293  ;;  %v1187_v49 = vmul.f32 1.442695, %v1141_v62  ;;  %1251 = vadd.xlane.f32.xlu0 %v1250_v8  ;;  %2313 = vpow2.f32 %v1213_v45  ;;  %v1189_v32 = vmul.f32 1.442695, %v1142_v35  ;;  %v1232_v55 = vadd.f32 %v2292_v43, %v2290_v9  ;;  %v732_v7 = vld [vmem:[#allocation4 + $0x60] sm:$0xff] }
 0x2bf   : > { %v820_v28 = vadd.f32 %v782_v20, %v724_v0  ;;  %v2296_v4 = vpop.eup %2295  ;;  %v1125_v19 = vpop.permute.xlu0 %1124  ;;  %2315 = vpow2.f32 %v1177_v54  ;;  %v1185_v13 = vmul.f32 1.442695, %v1140_v36  ;;  %v1156_v52 = vsub.f32 %v4048_v59, %v3458_v11 }
 0x2c0   : > { %v2298_v14 = vpop.eup %2297  ;;  %v1157_v60 = vsub.f32 %v4044_v63, %v1125_v19  ;;  %v1158_v22 = vsub.f32 %v4045_v21, %v1125_v19  ;;  %1224 = vadd.xlane.f32.xlu1 %v1223_v2  ;;  %2317 = vpow2.f32 %v1187_v49  ;;  %v1229_v44 = vadd.f32 %v2296_v4, %v2294_v47 }
 0x2c1   : > { %837 = vst.msk [vmem:[#allocation4 + $0x20] sm:$0xff] %vm832_vm3, %v820_v28  ;;  %v2300_v56 = vpop.eup %2299  ;;  %2319 = vpow2.f32 %v1189_v32  ;;  %v1215_v9 = vmul.f32 1.442695, %v1155_v24  ;;  %v1217_v8 = vmul.f32 1.442695, %v1156_v52  ;;  %v4050_v36 = vsub.f32 %v4049_v37, %v3272_v17 }
 0x2c2   : > { %v788_v23 = vpop.xlane.xlu1 %787  ;;  %v2302_v3 = vpop.eup %2301  ;;  %v1219_v46 = vmul.f32 1.442695, %v1157_v60  ;;  %1233 = vadd.xlane.f32.xlu0 %v1232_v55  ;;  %v1221_v33 = vmul.f32 1.442695, %v1158_v22  ;;  %2321 = vpow2.f32 %v1207_v25  ;;  %v1256_v41 = vadd.f32 %v2300_v56, %v2298_v14 }
 0x2c3   : > { %v822_v51 = vadd.f32 %v788_v23, %v726_v31  ;;  %v2304_v10 = vpop.eup %2303  ;;  %2323 = vpow2.f32 %v1209_v34  ;;  %v731_v34 = vld [vmem:[#allocation4 + $0x58] sm:$0xff]  ;;  %v1001_v23 = vmul.f32 1.442695, %v4050_v36  ;;  %vm1337_vm4 = vcmp.ne.s32.totalorder (!%p2101_p8), %v3442_v1, 0 }
 0x2c4   : > { %1248 = vadd.xlane.f32.xlu1 %v1247_v5  ;;  %v2306_v16 = vpop.eup %2305  ;;  %2325 = vpow2.f32 %v1219_v46 }
 0x2c5   : > { %839 = vst.msk [vmem:[#allocation4 + $0x30] sm:$0xff] %vm832_vm3, %v822_v51  ;;  %v2308_v39 = vpop.eup %2307  ;;  %2327 = vpow2.f32 %v1221_v33  ;;  %v1238_v62 = vadd.f32 %v2306_v16, %v2304_v10  ;;  %v733_v51 = vld [vmem:[#allocation4 + $0x68] sm:$0xff] }
 0x2c6   : > { %v794_v15 = vpop.xlane.xlu1 %793  ;;  %1257 = vadd.xlane.f32.xlu0 %v1256_v41  ;;  %v2310_v45 = vpop.eup %2309  ;;  %2329 = vpow2.f32 %v1183_v30  ;;  %v1253_v54 = vadd.f32 %v2308_v39, %v2302_v3  ;;  %v4051_v10 = vld [vmem:[#allocation38_spill] sm:$0xff]  ;;  %v4052_v16 = vld [vmem:[#allocation35_spill] sm:$0xff]  ;;  %v4055_v39 = vld [vmem:[#allocation44_spill] sm:$0xff] }
 0x2c7   : > { %v824_v58 = vadd.f32 %v794_v15, %v728_v48  ;;  %v2312_v0 = vpop.eup %2311  ;;  %2331 = vpow2.f32 %v1185_v13  ;;  %v735_v48 = vld [vmem:[#allocation4 + $0x78] sm:$0xff]  ;;  %v992_v30 = vsub.f32 %v4051_v10, %v3269_v27  ;;  %v968_v15 = vld [vmem:[#allocation3 + $0x8] sm:$0xff]  ;;  %v975_v10 = vld [vmem:[#allocation3 + $0x40] sm:$0xff] }
 0x2c8   : > { %1230 = vadd.xlane.f32.xlu1 %v1229_v44  ;;  %v2314_v35 = vpop.eup %2313  ;;  %2333 = vpow2.f32 %v1215_v9  ;;  %v4053_v13 = vld [vmem:[#allocation37_spill] sm:$0xff] }
 0x2c9   : > { %841 = vst.msk [vmem:[#allocation4 + $0x40] sm:$0xff] %vm832_vm3, %v824_v58  ;;  %v2316_v40 = vpop.eup %2315  ;;  %v1262_v47 = vadd.f32 %v2314_v35, %v2312_v0  ;;  %2335 = vpow2.f32 %v1217_v8  ;;  %v1017_v17 = vmul.f32 1.442695, %v992_v30  ;;  %v4054_v59 = vsub.f32 %v4052_v16, %v4053_v13  ;;  %v4058_v0 = vld [vmem:[#allocation36_spill] sm:$0xff]  ;;  %v4060_v8 = vld [vmem:[#allocation45_spill] sm:$0xff] }
 0x2ca   : > { %v800_v11 = vpop.xlane.xlu1 %799  ;;  %1239 = vadd.xlane.f32.xlu0 %v1238_v62  ;;  %v2318_v20 = vpop.eup %2317  ;;  %v1235_v25 = vadd.f32 %v2316_v40, %v2310_v45  ;;  %2337 = vpow2.f32 %v1001_v23  ;;  %v4056_v58 = vsub.f32 %v4055_v39, %v3303_v50  ;;  %v4063_v40 = vld [vmem:[#allocation42_spill] sm:$0xff]  ;;  %v970_v23 = vld [vmem:[#allocation3 + $0x18] sm:$0xff] }
 0x2cb   : > { %v826_v43 = vadd.f32 %v800_v11, %v730_v12  ;;  %v2320_v49 = vpop.eup %2319  ;;  %v999_v52 = vmul.f32 1.442695, %v4054_v59  ;;  %2339 = vpow2.f32 %v1017_v17  ;;  %v4057_v12 = vld [vmem:[#allocation34_spill] sm:$0xff]  ;;  %v4061_v11 = vsub.f32 %v4060_v8, %v3315_v38  ;;  %v734_v38 = vld [vmem:[#allocation4 + $0x70] sm:$0xff]  ;;  %v4083_v8 = vld [vmem:[#allocation53_spill] sm:$0xff] }
 0x2cc   : > { %1254 = vadd.xlane.f32.xlu1 %v1253_v54  ;;  %v2322_v2 = vpop.eup %2321  ;;  %v1244_v31 = vadd.f32 %v2320_v49, %v2318_v20  ;;  %v1005_v44 = vmul.f32 1.442695, %v4056_v58  ;;  %v4059_v27 = vsub.f32 %v4057_v12, %v4058_v0  ;;  %v4062_v54 = vld [vmem:[#allocation40_spill] sm:$0xff]  ;;  %v4065_v20 = vld [vmem:[#allocation49_spill] sm:$0xff] }
 0x2cd   : > { %843 = vst.msk [vmem:[#allocation4 + $0x50] sm:$0xff] %vm832_vm3, %v826_v43  ;;  %v2324_v32 = vpop.eup %2323  ;;  %2341 = vpow2.f32 %v999_v52  ;;  %v1021_v43 = vmul.f32 1.442695, %v4061_v11  ;;  %v4064_v50 = vsub.f32 %v4062_v54, %v4063_v40  ;;  %v4077_v17 = vld [vmem:[#allocation48_spill] sm:$0xff]  ;;  %v4080_v58 = vld [vmem:[#allocation57_spill] sm:$0xff]  ;;  %v972_v40 = vld [vmem:[#allocation3 + $0x28] sm:$0xff] }
 0x2ce   : > { %v806_v28 = vpop.xlane.xlu1 %805  ;;  %1263 = vadd.xlane.f32.xlu0 %v1262_v47  ;;  %v2326_v19 = vpop.eup %2325  ;;  %v1259_v57 = vadd.f32 %v2324_v32, %v2322_v2  ;;  %v1015_v9 = vmul.f32 1.442695, %v4059_v27  ;;  %2343 = vpow2.f32 %v1005_v44  ;;  %v4066_v47 = vsub.f32 %v4065_v20, %v3337_v42  ;;  %v4067_v2 = vld [vmem:[#allocation41_spill] sm:$0xff]  ;;  %v969_v0 = vld [vmem:[#allocation3 + $0x10] sm:$0xff] }
 0x2cf   : > { %v828_v4 = vadd.f32 %v806_v28, %v732_v7  ;;  %v2328_v14 = vpop.eup %2327  ;;  %v1003_v7 = vmul.f32 1.442695, %v4064_v50  ;;  %v978_v52 = vld [vmem:[#allocation3 + $0x58] sm:$0xff]  ;;  %v4081_v44 = vsub.f32 %v4080_v58, %v3396_v6 }
 0x2d0   : > { %1236 = vadd.xlane.f32.xlu1 %v1235_v25  ;;  %v2330_v18 = vpop.eup %2329  ;;  %v1268_v60 = vadd.f32 %v2328_v14, %v2326_v19  ;;  %2345 = vpow2.f32 %v1015_v9  ;;  %v1009_v49 = vmul.f32 1.442695, %v4066_v47  ;;  %v976_v19 = vld [vmem:[#allocation3 + $0x48] sm:$0xff]  ;;  %v977_v47 = vld [vmem:[#allocation3 + $0x50] sm:$0xff] }
 0x2d1   : > { %845 = vst.msk [vmem:[#allocation4 + $0x60] sm:$0xff] %vm832_vm3, %v828_v4  ;;  %v2332_v63 = vpop.eup %2331  ;;  %2347 = vpow2.f32 %v1021_v43  ;;  %v4068_v4 = vld [vmem:[#allocation43_spill] sm:$0xff] }
 0x2d2   : > { %1245 = vadd.xlane.f32.xlu0 %v1244_v31  ;;  %v2334_v21 = vpop.eup %2333  ;;  %v1241_v22 = vadd.f32 %v2332_v63, %v2330_v18  ;;  %2349 = vpow2.f32 %v1003_v7  ;;  %v4069_v25 = vsub.f32 %v4067_v2, %v4068_v4  ;;  %v4070_v14 = vld [vmem:[#allocation51_spill] sm:$0xff]  ;;  %v4085_v4 = vld [vmem:[#allocation54_spill] sm:$0xff] }
 0x2d3   : > { %v2336_v55 = vpop.eup %2335  ;;  %2351 = vpow2.f32 %v1009_v49  ;;  %v4071_v18 = vsub.f32 %v4070_v14, %v3353_v26  ;;  %v4075_v26 = vld [vmem:[#allocation55_spill] sm:$0xff] }
 0x2d4   : > { %1260 = vadd.xlane.f32.xlu1 %v1259_v57  ;;  %v1265_v56 = vadd.f32 %v2336_v55, %v2334_v21  ;;  %v2338_v41 = vpop.eup %2337  ;;  %v1019_v32 = vmul.f32 1.442695, %v4069_v25  ;;  %v4072_v55 = vld [vmem:[#allocation46_spill] sm:$0xff]  ;;  %v4086_v25 = vld [vmem:[#allocation56_spill] sm:$0xff] }
 0x2d5   : > { %v1032_v45 = vmul.f32 %v2338_v41, %v968_v15  ;;  %v2340_v28 = vpop.eup %2339  ;;  %v1025_v57 = vmul.f32 1.442695, %v4071_v18  ;;  %v4078_v41 = vld [vmem:[#allocation50_spill] sm:$0xff] }
 0x2d6   : > { %1269 = vadd.xlane.f32.xlu0 %v1268_v60  ;;  %v967_v60 = vld [vmem:[#allocation3] sm:$0xff]  ;;  %2353 = vpow2.f32 %v1019_v32  ;;  %v4079_v16 = vsub.f32 %v4077_v17, %v4078_v41  ;;  %v4087_v32 = vsub.f32 %v4085_v4, %v4086_v25 }
 0x2d7   : > { %v2342_v31 = vpop.eup %2341  ;;  %2355 = vpow2.f32 %v1025_v57 }
 0x2d8   : > { %1242 = vadd.xlane.f32.xlu1 %v1241_v22  ;;  %v1040_v22 = vmul.f32 %v2340_v28, %v976_v19  ;;  %v2344_v42 = vpop.eup %2343  ;;  %v1023_v13 = vmul.f32 1.442695, %v4079_v16 }
 0x2dc   : > { %1266 = vadd.xlane.f32.xlu1 %v1265_v56  ;;  %v4073_v56 = vld [vmem:[#allocation47_spill] sm:$0xff] }
 0x32d   : > { %v803_v3 = vpop.xlane.xlu0 %802 }
 0x32e   : > { %v827_v46 = vadd.f32 %v803_v3, %v731_v34  ;;  %v4074_v34 = vsub.f32 %v4072_v55, %v4073_v56  ;;  %v974_v56 = vld [vmem:[#allocation3 + $0x38] sm:$0xff] }
 0x330   : > { %844 = vst.msk [vmem:[#allocation4 + $0x58] sm:$0xff] %vm832_vm3, %v827_v46  ;;  %v1007_v37 = vmul.f32 1.442695, %v4074_v34  ;;  %v1031_v46 = vmul.f32 %v2342_v31, %v967_v60  ;;  %v980_v31 = vld [vmem:[#allocation3 + $0x68] sm:$0xff]  ;;  %v971_v60 = vld [vmem:[#allocation3 + $0x20] sm:$0xff] }
 0x331   : > { %v809_v5 = vpop.xlane.xlu0 %808 }
 0x332   : > { %v829_v33 = vadd.f32 %v809_v5, %v733_v51  ;;  %v2346_v51 = vpop.eup %2345  ;;  %v4076_v5 = vsub.f32 %v4075_v26, %v3375_v29  ;;  %2357 = vpow2.f32 %v1007_v37 }
 0x333   : > { %v1039_v39 = vmul.f32 %v2346_v51, %v975_v10 }
 0x334   : > { %846 = vst.msk [vmem:[#allocation4 + $0x68] sm:$0xff] %vm832_vm3, %v829_v33  ;;  %v1013_v33 = vmul.f32 1.442695, %v4076_v5 }
 0x335   : > { %v815_v53 = vpop.xlane.xlu0 %814 }
 0x336   : > { %v831_v24 = vadd.f32 %v815_v53, %v735_v48  ;;  %v1034_v53 = vmul.f32 %v2344_v42, %v970_v23  ;;  %2359 = vpow2.f32 %v1013_v33  ;;  %v982_v33 = vld [vmem:[#allocation3 + $0x78] sm:$0xff] }
 0x337   : > { %2361 = vpow2.f32 %v1023_v13 }
 0x338   : > { %848 = vst.msk [vmem:[#allocation4 + $0x78] sm:$0xff] %vm832_vm3, %v831_v24  ;;  %v2348_v24 = vpop.eup %2347 }
 0x339   : > { %v2350_v29 = vpop.eup %2349  ;;  %v1042_v9 = vmul.f32 %v2348_v24, %v978_v52  ;;  %v973_v24 = vld [vmem:[#allocation3 + $0x30] sm:$0xff] }
 0x33a   : > { %v1033_v7 = vmul.f32 %v2350_v29, %v969_v0  ;;  %v4089_v0 = vld [vmem:[#allocation16_spill] sm:$0xff] (!%p2101_p8) }
 0x33b   : > { %vm1324_vm6 = vcmp.ne.s32.totalorder (!%p2101_p8), %v4089_v0, 0  ;;  %v1375_v0 = vld [vmem:[#allocation4 + $0x20] sm:$0xff] (!%p2101_p8) }
 0x33f   : > { %v1228_v62 = vpop.xlane.xlu0 %1227 }
 0x340   : > { %v1272_v35 = vadd.f32 %v1228_v62, %v1032_v45  ;;  %v1029_v45 = vmul.f32 1.442695, %v4081_v44  ;;  %v2352_v62 = vpop.eup %2351 }
 0x341   : > { %v2354_v6 = vpop.eup %2353  ;;  %v1036_v28 = vmul.f32 %v2352_v62, %v972_v40  ;;  %v4091_v40 = vld [vmem:[#allocation17_spill] sm:$0xff] (!%p2101_p8) }
 0x342   : > { %1288 = vst.msk [vmem:[#allocation3 + $0x8] sm:$0xff] %vm832_vm3, %v1272_v35  ;;  %v4082_v35 = vld [vmem:[#allocation52_spill] sm:$0xff]  ;;  %2363 = vpow2.f32 %v1029_v45  ;;  %v2356_v2 = vpop.eup %2355  ;;  %v1041_v18 = vmul.f32 %v2354_v6, %v977_v47  ;;  %v4092_v6 = vld [vmem:[#allocation18_spill] sm:$0xff] (!%p2101_p8) }
 0x343   : > { %v4084_v11 = vsub.f32 %v4082_v35, %v4083_v8  ;;  %v2358_v57 = vpop.eup %2357  ;;  %vm1327_vm8 = vcmp.ne.s32.totalorder (!%p2101_p8), %v4092_v6, 0 }
 0x344   : > { %v2360_v42 = vpop.eup %2359  ;;  %v1035_v37 = vmul.f32 %v2358_v57, %v971_v60 }
 0x345   : > { %v1011_v43 = vmul.f32 1.442695, %v4084_v11  ;;  %v1038_v51 = vmul.f32 %v2360_v42, %v974_v56  ;;  %v4090_v11 = vld [vmem:[#allocation15_spill] sm:$0xff] (!%p2101_p8) }
 0x346   : > { %vm1325_vm7 = vcmp.ne.s32.totalorder (!%p2101_p8), %v4090_v11, 0 }
 0x347   : > { %2365 = vpow2.f32 %v1011_v43 }
 0x349   : > { %v812_v63 = vpop.xlane.xlu1 %811  ;;  %v1404_v43 = vld [vmem:[#allocation3 + $0x8] sm:$0xff] (!%p2101_p8) }
 0x34a   : > { %v830_v21 = vadd.f32 %v812_v63, %v734_v38  ;;  %v1027_v38 = vmul.f32 1.442695, %v4087_v32  ;;  %v4094_v32 = vld [vmem:[#allocation20_spill] sm:$0xff] (!%p2101_p8) }
 0x34b   : > { %v1252_v36 = vpop.xlane.xlu0 %1251  ;;  %vm1329_vm10 = vcmp.ne.s32.totalorder (!%p2101_p8), %v4094_v32, 0  ;;  %v1395_v32 = vld [vmem:[#allocation2 + $0x40] sm:$0xff] (!%p2101_p8) }
 0x34c   : > { %847 = vst.msk [vmem:[#allocation4 + $0x70] sm:$0xff] %vm832_vm3, %v830_v21  ;;  %v1280_v3 = vadd.f32 %v1252_v36, %v1040_v22  ;;  %v1044_v22 = vmul.f32 %v2356_v2, %v980_v31  ;;  %2367 = vpow2.f32 %v1027_v38  ;;  %v2362_v36 = vpop.eup %2361  ;;  %v4095_v38 = vld [vmem:[#allocation21_spill] sm:$0xff] (!%p2101_p8) }
 0x34d   : > { %v1225_v48 = vpop.xlane.xlu1 %1224  ;;  %v2364_v26 = vpop.eup %2363  ;;  %vm1330_vm11 = vcmp.ne.s32.totalorder (!%p2101_p8), %v4095_v38, 0 }
 0x34e   : > { %1296 = vst.msk [vmem:[#allocation3 + $0x48] sm:$0xff] %vm832_vm3, %v1280_v3  ;;  %v1271_v30 = vadd.f32 %v1225_v48, %v1031_v46  ;;  %v979_v3 = vld [vmem:[#allocation3 + $0x60] sm:$0xff]  ;;  %v1046_v41 = vmul.f32 %v2364_v26, %v982_v33 }
 0x34f   : > { %v1234_v59 = vpop.xlane.xlu0 %1233  ;;  %v1043_v10 = vmul.f32 %v2362_v36, %v979_v3  ;;  %v1387_v26 = vld [vmem:[#allocation2] sm:$0xff] (!%p2101_p8) }
 0x350   : > { %1287 = vst.msk [vmem:[#allocation3] sm:$0xff] %vm832_vm3, %v1271_v30  ;;  %v1274_v15 = vadd.f32 %v1234_v59, %v1034_v53 }
 0x351   : > { %v1249_v12 = vpop.xlane.xlu1 %1248  ;;  %v2366_v30 = vpop.eup %2365 }
 0x352   : > { %1290 = vst.msk [vmem:[#allocation3 + $0x18] sm:$0xff] %vm832_vm3, %v1274_v15  ;;  %v1279_v27 = vadd.f32 %v1249_v12, %v1039_v39  ;;  %v1037_v59 = vmul.f32 %v2366_v30, %v973_v24  ;;  %v981_v39 = vld [vmem:[#allocation3 + $0x70] sm:$0xff]  ;;  %v4088_v12 = vld [vmem:[#allocation14_spill] sm:$0xff] (!%p2101_p8) }
 0x353   : > { %v1258_v54 = vpop.xlane.xlu0 %1257  ;;  %vm1323_vm5 = vcmp.ne.s32.totalorder (!%p2101_p8), %v4088_v12, 0 }
 0x354   : > { %1295 = vst.msk [vmem:[#allocation3 + $0x40] sm:$0xff] %vm832_vm3, %v1279_v27  ;;  %v1282_v50 = vadd.f32 %v1258_v54, %v1042_v9  ;;  %v2628_v27 = vmov (!%p2101_p8), 0   ;;  %v2629_v9 = vmov (!%p2101_p8), 0.0  }
 0x355   : > { %v1231_v20 = vpop.xlane.xlu1 %1230  ;;  %2369 = vset.pattern.permute.xlu1 (!%p2101_p8), %v2628_v27  ;;  %v3601_v62 = vsel (!%p2101_p8), %vm1323_vm5, 1.0, %v2629_v9  ;;  %v3604_v35 = vsel (!%p2101_p8), %vm1324_vm6, 1.0, %v2629_v9  ;;  %2380 = vset.pattern.permute.xlu0 (!%p2101_p8), %v2628_v27  ;;  %v3634_v31 = vsel (!%p2101_p8), %vm1330_vm11, 1.0, %v2629_v9  ;;  %v1412_v42 = vld [vmem:[#allocation3 + $0x48] sm:$0xff] (!%p2101_p8)  ;;  %v3668_v24 = vsel (!%p2101_p8), %vm1336_vm1, 1.0, %v2629_v9 }
 0x356   : > { %1298 = vst.msk [vmem:[#allocation3 + $0x58] sm:$0xff] %vm832_vm3, %v1282_v50  ;;  %v1273_v49 = vadd.f32 %v1231_v20, %v1033_v7  ;;  %v2368_v52 = vpop.eup %2367  ;;  %v2370_v54 = vpack.i.bf16 (!%p2101_p8), %v3604_v35, %v3601_v62  ;;  %v3611_v50 = vsel (!%p2101_p8), %vm1325_vm7, 1.0, %v2629_v9  ;;  %v4093_v20 = vld [vmem:[#allocation19_spill] sm:$0xff] (!%p2101_p8) }
 0x357   : > { %v1240_v19 = vpop.xlane.xlu0 %1239  ;;  %v1045_v58 = vmul.f32 %v2368_v52, %v981_v39  ;;  %v1403_v8 = vld [vmem:[#allocation3] sm:$0xff] (!%p2101_p8)  ;;  %vm1328_vm9 = vcmp.ne.s32.totalorder (!%p2101_p8), %v4093_v20, 0  ;;  %v1372_v39 = vld [vmem:[#allocation4 + $0x8] sm:$0xff] (!%p2101_p8) }
 0x358   : > { %1289 = vst.msk [vmem:[#allocation3 + $0x10] sm:$0xff] %vm832_vm3, %v1273_v49  ;;  %v1276_v14 = vadd.f32 %v1240_v19, %v1036_v28  ;;  %2411 = vlog2.f32 (!%p2101_p8), %v1403_v8  ;;  %2371 = vperm.xlu1 (!%p2101_p8), %2369, %v2370_v54   ;;  %v3621_v28 = vsel (!%p2101_p8), %vm1327_vm8, 1.0, %v2629_v9  ;;  %v3624_v2 = vsel (!%p2101_p8), %vm1328_vm9, 1.0, %v2629_v9  ;;  %v1376_v54 = vld [vmem:[#allocation4 + $0x28] sm:$0xff] (!%p2101_p8) }
 0x359   : > { %v1255_v63 = vpop.xlane.xlu1 %1254  ;;  %2413 = vlog2.f32 (!%p2101_p8), %v1404_v43  ;;  %v2381_v25 = vpack.i.bf16 (!%p2101_p8), %v3624_v2, %v3621_v28  ;;  %v3631_v19 = vsel (!%p2101_p8), %vm1329_vm10, 1.0, %v2629_v9 }
 0x35a   : > { %1292 = vst.msk [vmem:[#allocation3 + $0x28] sm:$0xff] %vm832_vm3, %v1276_v14  ;;  %v1281_v21 = vadd.f32 %v1255_v63, %v1041_v18  ;;  %v4096_v14 = vld [vmem:[#allocation22_spill] sm:$0xff] (!%p2101_p8)  ;;  %v4097_v18 = vld [vmem:[#allocation31_spill] sm:$0xff] (!%p2101_p8)  ;;  %v4098_v63 = vld [vmem:[#allocation32_spill] sm:$0xff] (!%p2101_p8) }
 0x35b   : > { %v1264_v55 = vpop.xlane.xlu0 %1263  ;;  %vm1331_vm12 = vcmp.ne.s32.totalorder (!%p2101_p8), %v4096_v14, 0  ;;  %vm1332_vm13 = vcmp.ne.s32.totalorder (!%p2101_p8), %v4097_v18, 0  ;;  %v1411_v57 = vld [vmem:[#allocation3 + $0x40] sm:$0xff] (!%p2101_p8)  ;;  %2382 = vperm.xlu0 (!%p2101_p8), %2380, %v2381_v25   ;;  %vm1333_vm14 = vcmp.ne.s32.totalorder (!%p2101_p8), %v4098_v63, 0  ;;  %v1389_v63 = vld [vmem:[#allocation2 + $0x10] sm:$0xff] (!%p2101_p8) }
 0x35c   : > { %1297 = vst.msk [vmem:[#allocation3 + $0x50] sm:$0xff] %vm832_vm3, %v1281_v21  ;;  %v1284_v34 = vadd.f32 %v1264_v55, %v1044_v22  ;;  %v2386_v21 = vpack.i.bf16 (!%p2101_p8), %v3634_v31, %v3631_v19  ;;  %v3643_v22 = vsel (!%p2101_p8), %vm1333_vm14, 1.0, %v2629_v9  ;;  %v3646_v55 = vsel (!%p2101_p8), %vm1331_vm12, 1.0, %v2629_v9 }
 0x35d   : > { %v1237_v23 = vpop.xlane.xlu1 %1236  ;;  %v3649_v56 = vsel (!%p2101_p8), %vm1332_vm13, 1.0, %v2629_v9  ;;  %v1414_v3 = vld [vmem:[#allocation3 + $0x58] sm:$0xff] (!%p2101_p8) }
 0x35e   : > { %1300 = vst.msk [vmem:[#allocation3 + $0x68] sm:$0xff] %vm832_vm3, %v1284_v34  ;;  %v1275_v46 = vadd.f32 %v1237_v23, %v1035_v37  ;;  %v3652_v34 = vsel (!%p2101_p8), %vm1334_vm15, 1.0, %v2629_v9  ;;  %v1406_v37 = vld [vmem:[#allocation3 + $0x18] sm:$0xff] (!%p2101_p8)  ;;  %vm1726_vm15 = vcmask (!%p2101_p8), 64512  }
 0x35f   : > { %v1246_v5 = vpop.xlane.xlu0 %1245  ;;  %v1405_v60 = vld [vmem:[#allocation3 + $0x10] sm:$0xff] (!%p2101_p8)  ;;  %v2396_v36 = vpack.i.bf16 (!%p2101_p8), %v3652_v34, %v3643_v22  ;;  %v4099_v23 = vld [vmem:[#allocation33_spill] sm:$0xff] (!%p2101_p8) }
 0x360   : > { %1291 = vst.msk [vmem:[#allocation3 + $0x20] sm:$0xff] %vm832_vm3, %v1275_v46  ;;  %v1278_v48 = vadd.f32 %v1246_v5, %v1038_v51  ;;  %vm1335_vm0 = vcmp.ne.s32.totalorder (!%p2101_p8), %v4099_v23, 0  ;;  %v2391_v5 = vpack.i.bf16 (!%p2101_p8), %v3649_v56, %v3646_v55 }
 0x361   : > { %v1261_v53 = vpop.xlane.xlu1 %1260  ;;  %v1408_v4 = vld [vmem:[#allocation3 + $0x28] sm:$0xff] (!%p2101_p8)  ;;  %2397 = vperm.xlu0 (!%p2101_p8), %2380, %v2396_v36  }
 0x362   : > { %1294 = vst.msk [vmem:[#allocation3 + $0x38] sm:$0xff] %vm832_vm3, %v1278_v48  ;;  %v1283_v17 = vadd.f32 %v1261_v53, %v1043_v10  ;;  %v2412_v51 = vpop.eup (!%p2101_p8), %2411  ;;  %v1388_v10 = vld [vmem:[#allocation2 + $0x8] sm:$0xff] (!%p2101_p8)  ;;  %v3663_v53 = vsel (!%p2101_p8), %vm1335_vm0, 1.0, %v2629_v9 }
 0x363   : > { %v1270_v16 = vpop.xlane.xlu0 %1269  ;;  %v2414_v48 = vpop.eup (!%p2101_p8), %2413  ;;  %v1420_v30 = vmul.f32 (!%p2101_p8), 0.6931472, %v2412_v51  ;;  %v2401_v8 = vpack.i.bf16 (!%p2101_p8), %v3668_v24, %v3663_v53  ;;  %v1396_v36 = vld [vmem:[#allocation2 + $0x48] sm:$0xff] (!%p2101_p8) }
 0x364   : > { %1299 = vst.msk [vmem:[#allocation3 + $0x60] sm:$0xff] %vm832_vm3, %v1283_v17  ;;  %v1286_v13 = vadd.f32 %v1270_v16, %v1046_v41  ;;  %v1371_v16 = vld [vmem:[#allocation4] sm:$0xff] (!%p2101_p8) }
 0x365   : > { %v1243_v15 = vpop.xlane.xlu1 %1242  ;;  %v1416_v33 = vld [vmem:[#allocation3 + $0x68] sm:$0xff] (!%p2101_p8) }
 0x366   : > { %1302 = vst.msk [vmem:[#allocation3 + $0x78] sm:$0xff] %vm832_vm3, %v1286_v13  ;;  %v1277_v29 = vadd.f32 %v1243_v15, %v1037_v59  ;;  %1322 = sbr.rel (%p2101_p8) target bundleno = 1087 (0x43f), region = 44  ;;  %v1422_v13 = vmul.f32 (!%p2101_p8), 0.6931472, %v2414_v48  ;;  %v1391_v59 = vld [vmem:[#allocation2 + $0x20] sm:$0xff] (!%p2101_p8)  ;;  %v1380_v48 = vld [vmem:[#allocation4 + $0x48] sm:$0xff] (!%p2101_p8) }
 0x367   : > { %v1407_v47 = vld [vmem:[#allocation3 + $0x20] sm:$0xff] (!%p2101_p8) }
 0x368   : > { %1293 = vst.msk [vmem:[#allocation3 + $0x30] sm:$0xff] %vm832_vm3, %v1277_v29  ;;  %2415 = vlog2.f32 (!%p2101_p8), %v1407_v47  ;;  %v1451_v29 = vadd.f32 (!%p2101_p8), %v1420_v30, %v1387_v26  ;;  %v1452_v12 = vadd.f32 (!%p2101_p8), %v1422_v13, %v1388_v10  ;;  %v1390_v26 = vld [vmem:[#allocation2 + $0x18] sm:$0xff] (!%p2101_p8) }
 0x369   : > { %v1267_v44 = vpop.xlane.xlu1 %1266  ;;  %2417 = vlog2.f32 (!%p2101_p8), %v1408_v4  ;;  %v1410_v17 = vld [vmem:[#allocation3 + $0x38] sm:$0xff] (!%p2101_p8) }
 0x36a   : > { %v1285_v45 = vadd.f32 %v1267_v44, %v1045_v58  ;;  %2419 = vlog2.f32 (!%p2101_p8), %v1411_v57  ;;  %v1392_v58 = vld [vmem:[#allocation2 + $0x28] sm:$0xff] (!%p2101_p8)  ;;  %v1467_v43 = vsub.f32 (!%p2101_p8), %v1371_v16, %v1451_v29  ;;  %v1468_v20 = vsub.f32 (!%p2101_p8), %v1372_v39, %v1452_v12  ;;  %v1398_v30 = vld [vmem:[#allocation2 + $0x58] sm:$0xff] (!%p2101_p8) }
 0x36b   : > { %2421 = vlog2.f32 (!%p2101_p8), %v1405_v60  ;;  %v1415_v11 = vld [vmem:[#allocation3 + $0x60] sm:$0xff] (!%p2101_p8)  ;;  %v1374_v13 = vld [vmem:[#allocation4 + $0x18] sm:$0xff] (!%p2101_p8) }
 0x36c   : > { %1301 = vst.msk [vmem:[#allocation3 + $0x70] sm:$0xff] %vm832_vm3, %v1285_v45  ;;  %vm1326_vm3 = vcmp.ne.s32.totalorder (!%p2101_p8), %v4091_v40, 0  ;;  %2423 = vlog2.f32 (!%p2101_p8), %v1412_v42  ;;  %v1413_v45 = vld [vmem:[#allocation3 + $0x50] sm:$0xff] (!%p2101_p8)  ;;  %v1483_v4 = vmul.f32 (!%p2101_p8), 1.442695, %v1467_v43  ;;  %v1379_v42 = vld [vmem:[#allocation4 + $0x40] sm:$0xff] (!%p2101_p8) }
 0x36d   : > { %v3614_v7 = vsel %vm1326_vm3, 1.0, %v2629_v9  ;;  %2425 = vlog2.f32 %v1406_v37  ;;  %v1418_v52 = vld [vmem:[#allocation3 + $0x78] sm:$0xff]  ;;  %v1485_v14 = vmul.f32 1.442695, %v1468_v20 }
 0x36e   : > { %v2375_v49 = vpack.i.bf16 %v3614_v7, %v3611_v50  ;;  %2427 = vlog2.f32 %v1414_v3 }
 0x36f   : > { %v1409_v46 = vld [vmem:[#allocation3 + $0x30] sm:$0xff] }
 0x370   : > { %2376 = vperm.xlu1 %2369, %v2375_v49   ;;  %2429 = vlog2.f32 %v1409_v46  ;;  %v1373_v46 = vld [vmem:[#allocation4 + $0x10] sm:$0xff] }
 0x371   : > { %2431 = vlog2.f32 %v1416_v33 }
 0x372   : > { %v2416_v41 = vpop.eup %2415  ;;  %2433 = vlog2.f32 %v1410_v17 }
 0x373   : > { %v2418_v15 = vpop.eup %2417  ;;  %v1428_v44 = vmul.f32 0.6931472, %v2416_v41  ;;  %2435 = vlog2.f32 %v1418_v52  ;;  %v1417_v6 = vld [vmem:[#allocation3 + $0x70] sm:$0xff] }
 0x374   : > { %2387 = vperm.xlu1 %2369, %v2386_v21   ;;  %v1430_v27 = vmul.f32 0.6931472, %v2418_v15  ;;  %2437 = vlog2.f32 %v1413_v45  ;;  %v2420_v49 = vpop.eup %2419  ;;  %v1393_v52 = vld [vmem:[#allocation2 + $0x30] sm:$0xff]  ;;  %v1400_v45 = vld [vmem:[#allocation2 + $0x68] sm:$0xff] }
 0x375   : > { %v1455_v40 = vadd.f32 %v1428_v44, %v1391_v59  ;;  %2439 = vlog2.f32 %v1415_v11  ;;  %v2422_v38 = vpop.eup %2421  ;;  %v1436_v57 = vmul.f32 0.6931472, %v2420_v49  ;;  %v1377_v11 = vld [vmem:[#allocation4 + $0x30] sm:$0xff]  ;;  %v1384_v49 = vld [vmem:[#allocation4 + $0x68] sm:$0xff] }
 0x376   : > { %v1456_v47 = vadd.f32 %v1430_v27, %v1392_v58  ;;  %2441 = vlog2.f32 %v1417_v6  ;;  %v2424_v60 = vpop.eup %2423  ;;  %v1424_v37 = vmul.f32 0.6931472, %v2422_v38  ;;  %v1382_v58 = vld [vmem:[#allocation4 + $0x58] sm:$0xff] }
 0x377   : > { %v1471_v25 = vsub.f32 %v1375_v0, %v1455_v40  ;;  %2443 = vpow2.f32 %v1483_v4  ;;  %v2426_v23 = vpop.eup %2425  ;;  %v1459_v3 = vadd.f32 %v1436_v57, %v1395_v32  ;;  %v1438_v51 = vmul.f32 0.6931472, %v2424_v60 }
 0x378   : > { %2392 = vperm.xlu1 %2369, %v2391_v5   ;;  %v1472_v18 = vsub.f32 %v1376_v54, %v1456_v47  ;;  %2445 = vpow2.f32 %v1485_v14  ;;  %v2428_v5 = vpop.eup %2427  ;;  %v1453_v33 = vadd.f32 %v1424_v37, %v1389_v63  ;;  %v1426_v10 = vmul.f32 0.6931472, %v2426_v23  ;;  %v1394_v54 = vld [vmem:[#allocation2 + $0x38] sm:$0xff] }
 0x379   : > { %v1491_v21 = vmul.f32 1.442695, %v1471_v25  ;;  %v1475_v41 = vsub.f32 %v1379_v42, %v1459_v3  ;;  %v1460_v16 = vadd.f32 %v1438_v51, %v1396_v36  ;;  %v1442_v59 = vmul.f32 0.6931472, %v2428_v5  ;;  %v1402_v42 = vld [vmem:[#allocation2 + $0x78] sm:$0xff]  ;;  %v1397_v3 = vld [vmem:[#allocation2 + $0x50] sm:$0xff] }
 0x37a   : > { %v1493_v61 = vmul.f32 1.442695, %v1472_v18  ;;  %v2430_v17 = vpop.eup %2429  ;;  %v1469_v39 = vsub.f32 %v1373_v46, %v1453_v33  ;;  %v1454_v29 = vadd.f32 %v1426_v10, %v1390_v26  ;;  %v1378_v18 = vld [vmem:[#allocation4 + $0x38] sm:$0xff] }
 0x37b   : > { %2447 = vpow2.f32 %v1491_v21  ;;  %v2432_v15 = vpop.eup %2431  ;;  %v1432_v44 = vmul.f32 0.6931472, %v2430_v17  ;;  %v1499_v0 = vmul.f32 1.442695, %v1475_v41  ;;  %v1476_v27 = vsub.f32 %v1380_v48, %v1460_v16  ;;  %v1386_v10 = vld [vmem:[#allocation4 + $0x78] sm:$0xff] }
 0x37c   : > { %2402 = vperm.xlu1 %2369, %v2401_v8   ;;  %2449 = vpow2.f32 %v1493_v61  ;;  %v2434_v12 = vpop.eup %2433  ;;  %v1462_v8 = vadd.f32 %v1442_v59, %v1398_v30  ;;  %v1446_v43 = vmul.f32 0.6931472, %v2432_v15  ;;  %v1487_v6 = vmul.f32 1.442695, %v1469_v39  ;;  %v1381_v15 = vld [vmem:[#allocation4 + $0x50] sm:$0xff]  ;;  %v1399_v39 = vld [vmem:[#allocation2 + $0x60] sm:$0xff] }
 0x37d   : > { %v2436_v40 = vpop.eup %2435  ;;  %v1470_v20 = vsub.f32 %v1374_v13, %v1454_v29  ;;  %v1457_v47 = vadd.f32 %v1432_v44, %v1393_v52  ;;  %v1434_v4 = vmul.f32 0.6931472, %v2434_v12  ;;  %2451 = vpow2.f32 %v1499_v0 }
 0x37e   : > { %v2438_v25 = vpop.eup %2437  ;;  %v1501_v32 = vmul.f32 1.442695, %v1476_v27  ;;  %v1478_v38 = vsub.f32 %v1382_v58, %v1462_v8  ;;  %v1464_v14 = vadd.f32 %v1446_v43, %v1400_v45  ;;  %2453 = vpow2.f32 %v1487_v6  ;;  %v1383_v8 = vld [vmem:[#allocation4 + $0x60] sm:$0xff] }
 0x37f   : > { %v2440_v57 = vpop.eup %2439  ;;  %v1489_v63 = vmul.f32 1.442695, %v1470_v20  ;;  %v1473_v60 = vsub.f32 %v1377_v11, %v1457_v47  ;;  %v1458_v21 = vadd.f32 %v1434_v4, %v1394_v54  ;;  %v1450_v61 = vmul.f32 0.6931472, %v2436_v40  ;;  %v1385_v4 = vld [vmem:[#allocation4 + $0x70] sm:$0xff] }
 0x380   : > { %v2442_v37 = vpop.eup %2441  ;;  %2455 = vpow2.f32 %v1501_v32  ;;  %v1505_v36 = vmul.f32 1.442695, %v1478_v38  ;;  %v1480_v23 = vsub.f32 %v1384_v49, %v1464_v14  ;;  %v1440_v5 = vmul.f32 0.6931472, %v2438_v25 }
 0x381   : > { %v2444_v46 = vpop.eup %2443  ;;  %2457 = vpow2.f32 %v1489_v63  ;;  %v1495_v51 = vmul.f32 1.442695, %v1473_v60  ;;  %v1474_v26 = vsub.f32 %v1378_v18, %v1458_v21  ;;  %v1466_v30 = vadd.f32 %v1450_v61, %v1402_v42  ;;  %v4101_v63 = vld [vmem:[#allocation59_spill] sm:$0xff] }
 0x382   : > { %v2446_v33 = vpop.eup %2445  ;;  %v1515_v48 = vmul.f32 %v2444_v46, %v3601_v62  ;;  %v1461_v16 = vadd.f32 %v1440_v5, %v1397_v3  ;;  %v1444_v29 = vmul.f32 0.6931472, %v2440_v57  ;;  %v1509_v58 = vmul.f32 1.442695, %v1480_v23 }
 0x383   : > { %2459 = vpow2.f32 %v1495_v51  ;;  %v1497_v41 = vmul.f32 1.442695, %v1474_v26  ;;  %v1516_v59 = vmul.f32 %v2446_v33, %v3604_v35  ;;  %v1482_v44 = vsub.f32 %v1386_v10, %v1466_v30  ;;  %v1401_v35 = vld [vmem:[#allocation2 + $0x70] sm:$0xff] }
 0x384   : > { %1632 = vperm.xlu0 %2380, %v1515_v48   ;;  %2461 = vpow2.f32 %v1505_v36  ;;  %v1477_v45 = vsub.f32 %v1381_v15, %v1461_v16  ;;  %v1463_v12 = vadd.f32 %v1444_v29, %v1399_v39  ;;  %v1448_v0 = vmul.f32 0.6931472, %v2442_v37 }
 0x385   : > { %v2448_v17 = vpop.eup %2447  ;;  %2463 = vpow2.f32 %v1497_v41  ;;  %vm1338_vm2 = vcmp.ne.s32.totalorder %v4101_v63, 0  ;;  %v2116_v42 = vsel %vm1337_vm4, 1.0, %v2629_v9  ;;  %v4103_v26 = vlaneseq }
 0x386   : > { %v2450_v13 = vpop.eup %2449  ;;  %v1519_v52 = vmul.f32 %v2448_v17, %v3621_v28  ;;  %2465 = vpow2.f32 %v1509_v58  ;;  %v1513_v28 = vmul.f32 1.442695, %v1482_v44  ;;  %v1479_v20 = vsub.f32 %v1383_v8, %v1463_v12 }
 0x387   : > { %v1520_v62 = vmul.f32 %v2450_v13, %v3624_v2  ;;  %v2452_v27 = vpop.eup %2451  ;;  %v1503_v2 = vmul.f32 1.442695, %v1477_v45  ;;  %v1465_v47 = vadd.f32 %v1448_v0, %v1401_v35  ;;  %v2117_v21 = vsel %vm1338_vm2, 1.0, %v2629_v9 }
 0x388   : > { %1652 = vperm.xlu1 %2369, %v1519_v52   ;;  %1637 = vperm.xlu0 %2380, %v1516_v59   ;;  %v2454_v11 = vpop.eup %2453  ;;  %v1523_v54 = vmul.f32 %v2452_v27, %v3646_v55  ;;  %2467 = vpow2.f32 %v1513_v28  ;;  %v1507_v14 = vmul.f32 1.442695, %v1479_v20  ;;  %v3694_v5 = vshrl.u32 %v4103_v26, 7 }
 0x389   : > { %v1517_v40 = vmul.f32 %v2454_v11, %v3611_v50  ;;  %2469 = vpow2.f32 %v1503_v2  ;;  %v1481_v18 = vsub.f32 %v1385_v4, %v1465_v47 }
 0x38a   : > { %v2456_v43 = vpop.eup %2455  ;;  %2471 = vpow2.f32 %v1507_v14  ;;  %v1535_v48 = vadd.s32 24, %v3694_v5  ;;  %v1536_v13 = vadd.s32 32, %v3694_v5  ;;  %v1537_v58 = vadd.s32 40, %v3694_v5 }
 0x38b   : > { %v2458_v6 = vpop.eup %2457  ;;  %v1524_v32 = vmul.f32 %v2456_v43, %v3649_v56  ;;  %v1511_v60 = vmul.f32 1.442695, %v1481_v18  ;;  %v1538_v35 = vadd.s32 48, %v3694_v5 }
 0x38c   : > { %1657 = vperm.xlu1 %2369, %v1520_v62   ;;  %1642 = vperm.xlu0 %2380, %v1517_v40   ;;  %v1518_v49 = vmul.f32 %v2458_v6, %v3614_v7  ;;  %v1539_v6 = vadd.s32 56, %v3694_v5 }
 0x38d   : > { %v2460_v25 = vpop.eup %2459  ;;  %2473 = vpow2.f32 %v1511_v60 }
 0x38e   : > { %v2462_v38 = vpop.eup %2461  ;;  %v1521_v50 = vmul.f32 %v2460_v25, %v3631_v19  ;;  %v1540_v25 = vadd.s32 64, %v3694_v5 }
 0x38f   : > { %v2464_v55 = vpop.eup %2463  ;;  %v1526_v57 = vmul.f32 %v2462_v38, %v3652_v34  ;;  %v2406_v34 = vpack.i.bf16 %v2117_v21, %v2116_v42 }
 0x390   : > { %1672 = vperm.xlu1 %2369, %v1523_v54   ;;  %1647 = vperm.xlu0 %2380, %v1518_v49   ;;  %v2466_v7 = vpop.eup %2465  ;;  %v1522_v56 = vmul.f32 %v2464_v55, %v3634_v31 }
 0x391   : > { %v1528_v19 = vmul.f32 %v2466_v7, %v3668_v24  ;;  %v4102_v24 = vld [vmem:[#allocation23_spill] sm:$0xff] }
 0x392   : > { %v2468_v37 = vpop.eup %2467  ;;  %v3691_v51 = vmul.u32 16, %v4102_v24 }
 0x393   : > { %v2470_v36 = vpop.eup %2469  ;;  %v1530_v1 = vmul.f32 %v2468_v37, %v2117_v21 }
 0x394   : > { %1677 = vperm.xlu1 %2369, %v1524_v32   ;;  %1662 = vperm.xlu0 %2380, %v1521_v50   ;;  %v1525_v23 = vmul.f32 %v2470_v36, %v3643_v22  ;;  %v2472_v61 = vpop.eup %2471  ;;  %v3697_v33 = vadd.s32 16, %v3691_v51  ;;  %v1533_v22 = vadd.s32 8, %v3694_v5  ;;  %vm1549_vm5 = vcmp.ge.s32.totalorder %v3694_v5, %v3691_v51 }
 0x395   : > { %v1527_v31 = vmul.f32 %v2472_v61, %v3663_v53  ;;  %v1534_v53 = vadd.s32 16, %v3694_v5  ;;  %vm1552_vm13 = vcmp.ge.s32.totalorder %v1535_v48, %v3691_v51  ;;  %vm1553_vm1 = vcmp.ge.s32.totalorder %v1536_v13, %v3691_v51 }
 0x396   : > { %vm1566_vm6 = vcmp.lt.s32.totalorder %v3694_v5, %v3697_v33  ;;  %vm1550_vm7 = vcmp.ge.s32.totalorder %v1533_v22, %v3691_v51  ;;  %vm1567_vm3 = vcmp.lt.s32.totalorder %v1533_v22, %v3697_v33  ;;  %vm1569_vm14 = vcmp.lt.s32.totalorder %v1535_v48, %v3697_v33 }
 0x397   : > { %v2474_v3 = vpop.eup %2473  ;;  %vm1582_vm8 = vmand %vm1549_vm5, %vm1566_vm6  ;;  %vm1551_vm10 = vcmp.ge.s32.totalorder %v1534_v53, %v3691_v51  ;;  %vm1568_vm11 = vcmp.lt.s32.totalorder %v1534_v53, %v3697_v33  ;;  %vm1570_vm2 = vcmp.lt.s32.totalorder %v1536_v13, %v3697_v33  ;;  %vm1554_vm5 = vcmp.ge.s32.totalorder %v1537_v58, %v3691_v51 }
 0x398   : > { %1687 = vperm.xlu1 %2369, %v1526_v57   ;;  %1667 = vperm.xlu0 %2380, %v1522_v56   ;;  %v1529_v46 = vmul.f32 %v2474_v3, %v2116_v42  ;;  %vm1583_vm9 = vmand %vm1550_vm7, %vm1567_vm3  ;;  %v3711_v30 = vsel %vm1582_vm8, 1.0, %v2629_v9  ;;  %vm1571_vm6 = vcmp.lt.s32.totalorder %v1537_v58, %v3697_v33  ;;  %vm1555_vm3 = vcmp.ge.s32.totalorder %v1538_v35, %v3691_v51 }
 0x399   : > { %v3714_v17 = vsel %vm1583_vm9, 1.0, %v2629_v9  ;;  %vm1584_vm12 = vmand %vm1551_vm10, %vm1568_vm11  ;;  %vm1572_vm8 = vcmp.lt.s32.totalorder %v1538_v35, %v3697_v33  ;;  %vm1556_vm10 = vcmp.ge.s32.totalorder %v1539_v6, %v3691_v51  ;;  %vm1573_vm11 = vcmp.lt.s32.totalorder %v1539_v6, %v3697_v33 }
 0x39a   : > { %v3722_v39 = vsel %vm1584_vm12, 1.0, %v2629_v9  ;;  %vm1585_vm0 = vmand %vm1552_vm13, %vm1569_vm14  ;;  %vm1557_vm13 = vcmp.ge.s32.totalorder %v1540_v25, %v3691_v51  ;;  %vm1574_vm14 = vcmp.lt.s32.totalorder %v1540_v25, %v3697_v33  ;;  %v1541_v57 = vadd.s32 72, %v3694_v5 }
 0x39b   : > { %v3731_v27 = vsel %vm1585_vm0, 1.0, %v2629_v9  ;;  %vm1586_vm4 = vmand %vm1553_vm1, %vm1570_vm2  ;;  %v1543_v42 = vadd.s32 88, %v3694_v5  ;;  %v1542_v36 = vadd.s32 80, %v3694_v5 }
 0x39c   : > { %1697 = vperm.xlu1 %2369, %v1528_v19   ;;  %2407 = vperm.xlu0 %2380, %v2406_v34   ;;  %v3739_v54 = vsel %vm1586_vm4, 1.0, %v2629_v9  ;;  %vm1587_vm7 = vmand %vm1554_vm5, %vm1571_vm6  ;;  %vm1558_vm1 = vcmp.ge.s32.totalorder %v1541_v57, %v3691_v51  ;;  %vm1575_vm2 = vcmp.lt.s32.totalorder %v1541_v57, %v3697_v33 }
 0x39d   : > { %v3747_v4 = vsel %vm1587_vm7, 1.0, %v2629_v9  ;;  %vm1588_vm9 = vmand %vm1555_vm3, %vm1572_vm8  ;;  %vm1560_vm5 = vcmp.ge.s32.totalorder %v1543_v42, %v3691_v51  ;;  %vm1559_vm6 = vcmp.ge.s32.totalorder %v1542_v36, %v3691_v51  ;;  %vm1576_vm7 = vcmp.lt.s32.totalorder %v1542_v36, %v3697_v33 }
 0x39e   : > { %v3755_v50 = vsel %vm1588_vm9, 1.0, %v2629_v9  ;;  %vm1589_vm12 = vmand %vm1556_vm10, %vm1573_vm11  ;;  %vm1577_vm3 = vcmp.lt.s32.totalorder %v1543_v42, %v3697_v33 }
 0x39f   : > { %v3763_v21 = vsel %vm1589_vm12, 1.0, %v2629_v9  ;;  %vm1590_vm0 = vmand %vm1557_vm13, %vm1574_vm14 }
 0x3a0   : > { %1707 = vperm.xlu1 %2369, %v1530_v1   ;;  %1682 = vperm.xlu0 %2380, %v1525_v23   ;;  %vm1591_vm4 = vmand %vm1558_vm1, %vm1575_vm2 }
 0x3a1   : > { %v3783_v48 = vsel %vm1591_vm4, 1.0, %v2629_v9  ;;  %vm1592_vm8 = vmand %vm1559_vm6, %vm1576_vm7 }
 0x3a2   : > { %vm1593_vm9 = vmand %vm1560_vm5, %vm1577_vm3  ;;  %v3790_v58 = vsel %vm1592_vm8, 1.0, %v2629_v9  ;;  %vm1900_vm3 = vcmask 57344  }
 0x3a4   : > { %1692 = vperm.xlu0 %2380, %v1527_v31   ;;  %v3774_v31 = vsel %vm1590_vm0, 1.0, %v2629_v9 }
 0x3a8   : > { %1702 = vperm.xlu0 %2380, %v1529_v46  }
 0x3d7   : > { %v2372_v10 = vpop.permute.xlu1 %2371 }
 0x3d8   : > { %v2374_v41 = vunpack.i.h.bf16 %v2372_v10  ;;  %v2373_v16 = vunpack.i.l.bf16 %v2372_v10 }
 0x3da   : > { %v1844_v59 = vmul.f32 %v2373_v16, %v3711_v30  ;;  %v1845_v52 = vmul.f32 %v2374_v41, %v3714_v17  ;;  %v2383_v0 = vpop.permute.xlu0 %2382  ;;  %v1544_v16 = vadd.s32 96, %v3694_v5 }
 0x3db   : > { %v2384_v11 = vunpack.i.l.bf16 %v2383_v0  ;;  %v2385_v2 = vunpack.i.h.bf16 %v2383_v0 }
 0x3dc   : > { %v1860_v62 = vsel %vm1726_vm15, %v1844_v59, 0.0  ;;  %v1861_v45 = vsel %vm1726_vm15, %v1845_v52, 0.0  ;;  %vm1561_vm10 = vcmp.ge.s32.totalorder %v1544_v16, %v3691_v51  ;;  %vm1578_vm11 = vcmp.lt.s32.totalorder %v1544_v16, %v3697_v33 }
 0x3dd   : > { %v1862_v8 = vadd.f32 %v1861_v45, %v1860_v62  ;;  %v1848_v20 = vmul.f32 %v2384_v11, %v3739_v54  ;;  %v1849_v18 = vmul.f32 %v2385_v2, %v3747_v4  ;;  %v3794_v62 = vsel %vm1593_vm9, 1.0, %v2629_v9  ;;  %vm1594_vm13 = vmand %vm1561_vm10, %vm1578_vm11 }
 0x3de   : > { %v1545_v45 = vadd.s32 104, %v3694_v5 }
 0x3df   : > { %v1867_v14 = vsel %vm1726_vm15, %v1848_v20, 0.0  ;;  %v1869_v60 = vsel %vm1726_vm15, %v1849_v18, 0.0  ;;  %v1546_v18 = vadd.s32 112, %v3694_v5 }
 0x3e0   : > { %v2398_v19 = vpop.permute.xlu0 %2397  ;;  %vm1562_vm12 = vcmp.ge.s32.totalorder %v1545_v45, %v3691_v51  ;;  %vm1579_vm14 = vcmp.lt.s32.totalorder %v1545_v45, %v3697_v33 }
 0x3e1   : > { %v2399_v13 = vunpack.i.l.bf16 %v2398_v19  ;;  %vm1595_vm0 = vmand %vm1562_vm12, %vm1579_vm14  ;;  %vm1563_vm1 = vcmp.ge.s32.totalorder %v1546_v18, %v3691_v51  ;;  %vm1580_vm2 = vcmp.lt.s32.totalorder %v1546_v18, %v3697_v33 }
 0x3e2   : > { %vm1596_vm6 = vmand %vm1563_vm1, %vm1580_vm2 }
 0x3ef   : > { %v2377_v15 = vpop.permute.xlu1 %2376 }
 0x3f0   : > { %v2378_v29 = vunpack.i.l.bf16 %v2377_v15  ;;  %v2379_v44 = vunpack.i.h.bf16 %v2377_v15 }
 0x3f2   : > { %v1846_v12 = vmul.f32 %v2378_v29, %v3722_v39  ;;  %v1847_v43 = vmul.f32 %v2379_v44, %v3731_v27 }
 0x3f3   : > { %v2388_v49 = vpop.permute.xlu1 %2387 }
 0x3f4   : > { %v1863_v28 = vsel %vm1726_vm15, %v1846_v12, 0.0  ;;  %v1865_v47 = vsel %vm1726_vm15, %v1847_v43, 0.0  ;;  %v2389_v38 = vunpack.i.l.bf16 %v2388_v49  ;;  %v2390_v7 = vunpack.i.h.bf16 %v2388_v49 }
 0x3f5   : > { %v1864_v40 = vadd.f32 %v1863_v28, %v1862_v8  ;;  %v2400_v12 = vunpack.i.h.bf16 %v2398_v19 }
 0x3f6   : > { %v1850_v56 = vmul.f32 %v2389_v38, %v3755_v50  ;;  %v1851_v61 = vmul.f32 %v2390_v7, %v3763_v21 }
 0x3f7   : > { %v1866_v32 = vadd.f32 %v1865_v47, %v1864_v40  ;;  %v2393_v55 = vpop.permute.xlu1 %2392  ;;  %v1855_v20 = vmul.f32 %v2400_v12, %v3794_v62 }
 0x3f8   : > { %v2394_v1 = vunpack.i.l.bf16 %v2393_v55  ;;  %v1871_v23 = vsel %vm1726_vm15, %v1850_v56, 0.0  ;;  %v2395_v24 = vunpack.i.h.bf16 %v2393_v55  ;;  %v1873_v22 = vsel %vm1726_vm15, %v1851_v61, 0.0 }
 0x3f9   : > { %v1868_v63 = vadd.f32 %v1867_v14, %v1866_v32  ;;  %v3813_v14 = vsel %vm1594_vm13, 1.0, %v2629_v9  ;;  %v1881_v42 = vsel %vm1726_vm15, %v1855_v20, 0.0 }
 0x3fa   : > { %v1852_v26 = vmul.f32 %v2394_v1, %v3774_v31  ;;  %v1853_v15 = vmul.f32 %v2395_v24, %v3783_v48 }
 0x3fb   : > { %v3766_v37 = vpop.permute.xlu1 %2402  ;;  %v1870_v34 = vadd.f32 %v1869_v60, %v1868_v63 }
 0x3fc   : > { %v1875_v52 = vsel %vm1726_vm15, %v1852_v26, 0.0  ;;  %v1877_v11 = vsel %vm1726_vm15, %v1853_v15, 0.0  ;;  %v2405_v36 = vunpack.i.h.bf16 %v3766_v37 }
 0x3fd   : > { %v1872_v46 = vadd.f32 %v1871_v23, %v1870_v34 }
 0x3ff   : > { %v1874_v41 = vadd.f32 %v1873_v22, %v1872_v46 }
 0x401   : > { %v1876_v8 = vadd.f32 %v1875_v52, %v1874_v41 }
 0x403   : > { %v1633_v3 = vpop.permute.xlu0 %1632  ;;  %v1878_v47 = vadd.f32 %v1877_v11, %v1876_v8 }
 0x404   : > { %v1710_v44 = vmul.f32 %v3711_v30, %v1633_v3  ;;  %v1854_v30 = vmul.f32 %v2399_v13, %v3790_v58 }
 0x406   : > { %v1727_v43 = vsel %vm1726_vm15, %v1710_v44, 0.0  ;;  %v1879_v32 = vsel %vm1726_vm15, %v1854_v30, 0.0 }
 0x407   : > { %v1653_v53 = vpop.permute.xlu1 %1652  ;;  %v1638_v10 = vpop.permute.xlu0 %1637 }
 0x408   : > { %v1711_v59 = vmul.f32 %v3714_v17, %v1638_v10  ;;  %v1714_v49 = vmul.f32 %v3739_v54, %v1653_v53  ;;  %v1880_v54 = vadd.f32 %v1879_v32, %v1878_v47 }
 0x40a   : > { %v1728_v17 = vsel %vm1726_vm15, %v1711_v59, 0.0  ;;  %v1734_v56 = vsel %vm1726_vm15, %v1714_v49, 0.0 }
 0x40b   : > { %v1658_v29 = vpop.permute.xlu1 %1657  ;;  %v1643_v0 = vpop.permute.xlu0 %1642  ;;  %v1729_v6 = vadd.f32 %v1728_v17, %v1727_v43 }
 0x40c   : > { %v1712_v35 = vmul.f32 %v3722_v39, %v1643_v0  ;;  %v2404_v39 = vunpack.i.l.bf16 %v3766_v37  ;;  %v1715_v55 = vmul.f32 %v3747_v4, %v1658_v29 }
 0x40e   : > { %v1730_v40 = vsel %vm1726_vm15, %v1712_v35, 0.0  ;;  %v1856_v34 = vmul.f32 %v2404_v39, %v3813_v14  ;;  %v1736_v1 = vsel %vm1726_vm15, %v1715_v55, 0.0 }
 0x40f   : > { %v1673_v28 = vpop.permute.xlu1 %1672  ;;  %v1648_v2 = vpop.permute.xlu0 %1647  ;;  %v1731_v38 = vadd.f32 %v1730_v40, %v1729_v6 }
 0x410   : > { %v1713_v25 = vmul.f32 %v3731_v27, %v1648_v2  ;;  %v1547_v27 = vadd.s32 120, %v3694_v5  ;;  %v2131_v5 = vsel %vm1595_vm0, 1.0, %v2629_v9  ;;  %v1718_v3 = vmul.f32 %v3774_v31, %v1673_v28 }
 0x411   : > { %v1883_v26 = vsel %vm1726_vm15, %v1856_v34, 0.0  ;;  %v1857_v53 = vmul.f32 %v2405_v36, %v2131_v5 }
 0x412   : > { %v1732_v57 = vsel %vm1726_vm15, %v1713_v25, 0.0  ;;  %vm1564_vm4 = vcmp.ge.s32.totalorder %v1547_v27, %v3691_v51  ;;  %vm1581_vm5 = vcmp.lt.s32.totalorder %v1547_v27, %v3697_v33  ;;  %v2132_v33 = vsel %vm1596_vm6, 1.0, %v2629_v9 }
 0x413   : > { %v1678_v63 = vpop.permute.xlu1 %1677  ;;  %v1733_v7 = vadd.f32 %v1732_v57, %v1731_v38  ;;  %v1663_v60 = vpop.permute.xlu0 %1662  ;;  %vm1597_vm7 = vmand %vm1564_vm4, %vm1581_vm5  ;;  %v1742_v31 = vsel %vm1726_vm15, %v1718_v3, 0.0  ;;  %v1885_v29 = vsel %vm1726_vm15, %v1857_v53, 0.0 }
 0x414   : > { %v1716_v19 = vmul.f32 %v3755_v50, %v1663_v60  ;;  %v1882_v50 = vadd.f32 %v1881_v42, %v1880_v54  ;;  %v1719_v13 = vmul.f32 %v3783_v48, %v1678_v63  ;;  %v2133_v15 = vsel %vm1597_vm7, 1.0, %v2629_v9 }
 0x415   : > { %v1735_v4 = vadd.f32 %v1734_v56, %v1733_v7 }
 0x416   : > { %v1738_v46 = vsel %vm1726_vm15, %v1716_v19, 0.0  ;;  %v1884_v16 = vadd.f32 %v1883_v26, %v1882_v50  ;;  %v1744_v17 = vsel %vm1726_vm15, %v1719_v13, 0.0 }
 0x417   : > { %v1737_v23 = vadd.f32 %v1736_v1, %v1735_v4  ;;  %v1668_v61 = vpop.permute.xlu0 %1667  ;;  %v1688_v37 = vpop.permute.xlu1 %1687 }
 0x418   : > { %v1717_v24 = vmul.f32 %v3763_v21, %v1668_v61  ;;  %v1886_v8 = vadd.f32 %v1885_v29, %v1884_v16  ;;  %v1721_v35 = vmul.f32 %v3794_v62, %v1688_v37 }
 0x419   : > { %v1739_v22 = vadd.f32 %v1738_v46, %v1737_v23 }
 0x41a   : > { %v1740_v10 = vsel %vm1726_vm15, %v1717_v24, 0.0  ;;  %v1748_v20 = vsel %vm1726_vm15, %v1721_v35, 0.0 }
 0x41b   : > { %v1741_v41 = vadd.f32 %v1740_v10, %v1739_v22  ;;  %v2408_v51 = vpop.permute.xlu0 %2407  ;;  %v1698_v12 = vpop.permute.xlu1 %1697 }
 0x41c   : > { %v2410_v59 = vunpack.i.h.bf16 %v2408_v51  ;;  %v2409_v21 = vunpack.i.l.bf16 %v2408_v51  ;;  %v1723_v47 = vmul.f32 %v2131_v5, %v1698_v12 }
 0x41d   : > { %v1743_v52 = vadd.f32 %v1742_v31, %v1741_v41 }
 0x41e   : > { %v1859_v44 = vmul.f32 %v2410_v59, %v2133_v15  ;;  %v1858_v45 = vmul.f32 %v2409_v21, %v2132_v33  ;;  %v1752_v55 = vsel %vm1726_vm15, %v1723_v47, 0.0 }
 0x41f   : > { %v1683_v0 = vpop.permute.xlu0 %1682  ;;  %v1745_v30 = vadd.f32 %v1744_v17, %v1743_v52  ;;  %v1708_v49 = vpop.permute.xlu1 %1707 }
 0x420   : > { %v1720_v11 = vmul.f32 %v3790_v58, %v1683_v0  ;;  %v1887_v48 = vsel %vm1726_vm15, %v1858_v45, 0.0  ;;  %v1889_v43 = vsel %vm1726_vm15, %v1859_v44, 0.0  ;;  %v1725_v57 = vmul.f32 %v2133_v15, %v1708_v49 }
 0x421   : > { %v1888_v28 = vadd.f32 %v1887_v48, %v1886_v8 }
 0x422   : > { %v1746_v9 = vsel %vm1726_vm15, %v1720_v11, 0.0 }
 0x423   : > { %v1747_v40 = vadd.f32 %v1746_v9, %v1745_v30  ;;  %v1693_v6 = vpop.permute.xlu0 %1692  ;;  %v1890_v2 = vadd.f32 %v1889_v43, %v1888_v28 }
 0x424   : > { %v1722_v39 = vmul.f32 %v3813_v14, %v1693_v6  ;;  %v1756_v14 = vsel %vm1726_vm15, %v1725_v57, 0.0 }
 0x425   : > { %v1749_v62 = vadd.f32 %v1748_v20, %v1747_v40  ;;  %v1891_v25 = vrot.slane %v1890_v2, 4 }
 0x426   : > { %v1750_v58 = vsel %vm1726_vm15, %v1722_v39, 0.0 }
 0x427   : > { %v1751_v32 = vadd.f32 %v1750_v58, %v1749_v62  ;;  %v1703_v38 = vpop.permute.xlu0 %1702  ;;  %v1892_v18 = vadd.f32 %v1891_v25, %v1890_v2 }
 0x428   : > { %v1724_v63 = vmul.f32 %v2132_v33, %v1703_v38 }
 0x429   : > { %v1753_v7 = vadd.f32 %v1752_v55, %v1751_v32  ;;  %v1893_v60 = vrot.slane %v1892_v18, 2 }
 0x42a   : > { %v1754_v27 = vsel %vm1726_vm15, %v1724_v63, 0.0 }
 0x42b   : > { %v1755_v54 = vadd.f32 %v1754_v27, %v1753_v7  ;;  %v1894_v56 = vadd.f32 %v1893_v60, %v1892_v18 }
 0x42d   : > { %v1757_v42 = vadd.f32 %v1756_v14, %v1755_v54  ;;  %v1895_v19 = vrot.slane %v1894_v56, 1 }
 0x42f   : > { %v1758_v34 = vrot.slane %v1757_v42, 4  ;;  %v1896_v4 = vadd.f32 %v1895_v19, %v1894_v56 }
 0x431   : > { %v1759_v36 = vadd.f32 %v1758_v34, %v1757_v42  ;;  %2475 = vrcp.f32 %v1896_v4 }
 0x433   : > { %v1760_v1 = vrot.slane %v1759_v36, 2 }
 0x435   : > { %v1761_v5 = vadd.f32 %v1760_v1, %v1759_v36 }
 0x437   : > { %v1762_v23 = vrot.slane %v1761_v5, 1 }
 0x439   : > { %v1763_v61 = vadd.f32 %v1762_v23, %v1761_v5 }
 0x43b   : > { %v2476_v50 = vpop.eup %2475 }
 0x43c   : > { %v1899_v3 = vmul.f32 %v2476_v50, %v1763_v61 }
 0x43e   : > { %1901 = vst.msk [vmem:[#allocation9] sm:$0x1] %vm1900_vm3, %v1899_v3 }
 0x43f PF: > { %s3859_s14 = scalar_lea.hbm %s3936_s3, %s2100_s26  ;;  %s1919_s21 = sshll.u32 %s2787_s13, 4  ;;  %s3862_s21 = int_to_ptr.vmem [resolvable:$true] %s1919_s21 }
 0x440   : > { %s1903_s9 = scalar_lea.sflag [#allocation7], %s2776_s25  ;;  %s2507_s10 = scalar_lea.vmem %s3862_s21, 1024 }
 0x441   : > { %p2508_p9 = scmp.ne.s32.totalorder %s3862_s21, %s2507_s10  ;;  %p4104_p0 = scmp.ne.s32.totalorder %s3993_s29, 0 }
 0x442   : > { %s2630_s18 = smov [#allocation8]  }
 0x443   : > { %p2509_p5 = pnand %p2508_p9, %p4104_p0  ;;  %s2511_s12 = sshll.u32 %s2630_s18, 4  ;;  %s2512_s12 = int_to_ptr.vmem [resolvable:$false] %s2511_s12 }
 0x444   : > { %s2513_s6 = scalar_lea.vmem %s2512_s12, 2048  ;;  %p2514_p1 = scmp.lt.s32.totalorder %s3862_s21, %s2512_s12 }
 0x445   : > { %p2510_p13 = pneg %p2509_p5  ;;  %p2515_p3 = scmp.lt.s32.totalorder %s2513_s6, %s2507_s10 }
 0x447   : > { %p2516_p4 = por %p2515_p3, %p2514_p1 }
 0x449   : > { %p2517_p7 = pnand %p2516_p4, %p2510_p13 }
 0x44b   : > { %2520 = shalt.err (!%p2517_p7)
}
 0x44c   : > { %s2521_s13 = scalar_lea.hbm %s3859_s14, 1024  ;;  %s2525_s24 = scalar_lea.hbm %s3936_s3, 2048 }
 0x44d   : > { %p2522_p10 = scmp.ne.s32.totalorder %s3859_s14, %s2521_s13  ;;  %p2526_p2 = scmp.lt.u32.totalorder %s3859_s14, %s3936_s3 }
 0x44e   : > { %p2527_p6 = scmp.lt.u32.totalorder %s2525_s24, %s2521_s13  ;;  %p2529_p9 = scmp.lt.u32.totalorder %s2521_s13, %s3859_s14 }
 0x44f   : > { %p2523_p11 = pnand %p2522_p10, %p4104_p0 }
 0x450   : > { %p2528_p8 = por %p2527_p6, %p2526_p2 }
 0x451   : > { %p2524_p12 = pneg %p2523_p11 }
 0x452   : > { %p2530_p5 = por %p2529_p9, %p2528_p8 }
 0x454   : > { %p2531_p13 = pnand %p2530_p5, %p2524_p12 }
 0x456   : > { %2534 = shalt.err (!%p2531_p13)
}
 0x457   : > { %s2631_s11 = smov 256   ;;  %s2632_s28 = smov 512  }
 0x458   : > { %s2633_s10 = smov 16   ;;  %s2634_s18 = smov [#allocation9]  }
 0x459   : > { %2161 = dma.vmem_to_hbm [thread:$0]  (%p4104_p0), %s3862_s21, 1024, %s3859_s14, %s1903_s9, %s2631_s11, %s2632_s28, %s2633_s10  }
 0x45a   : > { %s1935_s12 = sshll.u32 %s2634_s18, 4  ;;  %p4105_p3 = scmp.ne.s32.totalorder %s3991_s27, 0  ;;  %s1936_s12 = int_to_ptr.vmem [resolvable:$true] %s1935_s12 }
 0x45b   : > { %s2535_s6 = scalar_lea.vmem %s1936_s12, 16  ;;  %s2541_s13 = scalar_lea.vmem %s1936_s12, 32 }
 0x45c   : > { %p2536_p1 = scmp.ne.s32.totalorder %s1936_s12, %s2535_s6  ;;  %p2542_p10 = scmp.lt.s32.totalorder %s1936_s12, %s1936_s12 }
 0x45d   : > { %p2543_p11 = scmp.lt.s32.totalorder %s2541_s13, %s2535_s6 }
 0x45e   : > { %p2537_p4 = pnand %p2536_p1, %p4105_p3 }
 0x45f   : > { %p2544_p12 = por %p2543_p11, %p2542_p10 }
 0x460   : > { %p2538_p7 = pneg %p2537_p4 }
 0x462   : > { %p2545_p2 = pnand %p2544_p12, %p2538_p7 }
 0x464   : > { %2548 = shalt.err (!%p2545_p2)
}
 0x465   : > { %s2549_s29 = scalar_lea.hbm %s3937_s4, 16 }
 0x466   : > { %p2550_p0 = scmp.ne.s32.totalorder %s3937_s4, %s2549_s29  ;;  %p2555_p9 = scmp.lt.u32.totalorder %s2549_s29, %s3937_s4 }
 0x468   : > { %p2551_p6 = pnand %p2550_p0, %p4105_p3 }
 0x46a   : > { %p2552_p8 = pneg %p2551_p6 }
 0x46c   : > { %p2557_p5 = pnand %p2555_p9, %p2552_p8 }
 0x46e   : > { %2560 = shalt.err (!%p2557_p5)
}
 0x46f   : > { %2163 = dma.vmem_to_hbm [thread:$0]  (%p4105_p3), %s1936_s12, 16, %s3937_s4, [#allocation10]  }
 0x470   : > { %2590 = dma.done.wait (%p4105_p3), [#allocation10], 16  }
 0x471   : > { %2592 = vsyncadd (%p4105_p3), [#allocation10], 4294967280 }
 0x472 PF: > { %s1951_s8 = sand.u32 1, %s2599_s15   ;;  %p4106_p13 = scmp.ne.s32.totalorder %s3994_s5, 0 }
 0x473   : > { %p4107_p1 = scmp.ge.s32.totalorder %s2619_s20, 2  ;;  %s1952_s11 = scalar_lea.sflag [#allocation7], %s1951_s8 }
 0x475   : > { %p2172_p4 = pnand %p4107_p1, %p4106_p13 }
 0x477   : > { %2594 = dma.done.wait (!%p2172_p4), %s1952_s11, 1024  }
 0x478   : > { %2596 = vsyncadd (!%p2172_p4), %s1952_s11, 4294966272  ;;  %s22_s20 = sadd.s32 1, %s2619_s20   ;;  %s4108_s15 = smov %s2603_s16 }
 0x479   : > { %p19_p7 = scmp.ge.s32.totalorder %s22_s20, 4   ;;  %s4109_s16 = smov %s2607_s17 }
 0x47a   : > { %s4110_s17 = smov %s2722_s30  ;;  %s4111_s18 = smov %s2615_s19 }
 0x47b   : > { %s4112_s19 = smov %s4114_s23  ;;  %21 = sbr.rel (!%p19_p7) target bundleno = 7 (0x7), region = 101 }
 0x482   :  { %1957 = vsyncpa [#allocation6], 1 }
 0x483   :  { %1959 = vsyncpa [#allocation6 + $0x1], 1 }
 0x484   :  { %1960 = vsyncpa [#allocation7], 1 }
 0x485   :  { %1962 = vsyncpa [#allocation7 + $0x1], 1 }
 0x486   :  { %1963 = vsyncpa [#allocation10], 1 }

</bundles_post_ra>
